<compile_context>
chip_gen: v5e
topology: v5e:2x2
jax: 0.10.0
libtpu: 0.0.40
codegen_flags: <defaults>
</compile_context>

<pallas_src>
import jax
import jax.numpy as jnp
from jax import lax
from jax.experimental import pallas as pl
from jax.experimental.pallas import tpu as pltpu


def _round_up(n, m):
    return ((n + m - 1) // m) * m


def _vmem_capacity_bytes():
    try:
        return int(pltpu.get_tpu_info().vmem_capacity_bytes)
    except Exception:
        return 64 * 1024 * 1024  # conservative fallback (v7x per-core VMEM)


# Row layout of the packed "small params" operand (f32, shape (56, 20)).
# Rows are 8-aligned so every in-kernel slice starts on a sublane-tile boundary.
_ROW_B1 = 0        # fc1 bias            (1, 20)
_ROW_W2 = 8        # fc2 weight [out,in] (10, 20)
_ROW_B2 = 24       # fc2 bias            (1, 10)  (cols 0..9)
_ROW_W3 = 32       # fc3 weight [in,out] (10, 20)
_ROW_B3 = 48       # fc3 bias            (1, 20)
_SMALL_ROWS = 56


def sae_kernel(x_ref, w1t_ref, small_ref, w4_ref, b4_ref, o_ref, xpad_ref):
    """Fused 4-layer MLP on one batch tile; all intermediates stay in VMEM."""
    cdt = w1t_ref.dtype                 # bf16 MXU operand dtype
    nb = x_ref.shape[1]                 # nb_movies (unpadded feature width)
    tb, nm_pad = xpad_ref.shape         # lane-aligned feature width

    # Copy the activation tile into a lane-aligned scratch and explicitly zero
    # the padding lanes (done every step: cheap, hidden under DMA, and safe
    # with megacore grid splitting), so the fc1 contraction never touches
    # uninitialized VMEM lane padding.
    xpad_ref[:, :nb] = x_ref[...]
    if nm_pad > nb:
        xpad_ref[:, nb:] = jnp.zeros((tb, nm_pad - nb), cdt)
    x = xpad_ref[...]

    # fc1: x @ W1^T  (W1 kept lane-dense as [20, nm_pad], PyTorch [out, in]).
    z1 = lax.dot_general(x, w1t_ref[...], (((1,), (1,)), ((), ())),
                         preferred_element_type=jnp.float32)            # [tb, 20]
    h = jax.nn.sigmoid(z1 + small_ref[_ROW_B1:_ROW_B1 + 1, :])

    # fc2: h @ W2^T  (W2 stored [out, in] = (10, 20)).
    w2t = small_ref[_ROW_W2:_ROW_W2 + 10, :].astype(cdt)
    z2 = lax.dot_general(h.astype(cdt), w2t, (((1,), (1,)), ((), ())),
                         preferred_element_type=jnp.float32)            # [tb, 10]
    h = jax.nn.sigmoid(z2 + small_ref[_ROW_B2:_ROW_B2 + 1, :10])

    # fc3: h @ W3  (W3 stored [in, out] = (10, 20)).
    w3 = small_ref[_ROW_W3:_ROW_W3 + 10, :].astype(cdt)
    z3 = jnp.dot(h.astype(cdt), w3, preferred_element_type=jnp.float32)  # [tb, 20]
    h = jax.nn.sigmoid(z3 + small_ref[_ROW_B3:_ROW_B3 + 1, :])

    # fc4: h @ W4  ([in, out] lane-dense, out dim zero-padded to nm_pad);
    # store only the valid nb columns (the HBM output array is unpadded).
    z4 = jnp.dot(h.astype(cdt), w4_ref[...],
                 preferred_element_type=jnp.float32) + b4_ref[...]       # [tb, nm_pad]
    o_ref[...] = z4[:, :nb]


def _choose_tile_batch(batch, nm_pad, requested=None):
    """Batch tile: big enough to amortize per-step overhead, small enough to
    give >= ~8 grid steps for pipelining, and within the device VMEM budget."""
    vmem_cap = _vmem_capacity_bytes()
    # Per-row VMEM bytes of the batch-tiled buffers: double-buffered bf16 x,
    # double-buffered f32 out, plus the single bf16 lane-aligned scratch.
    per_row = (2 * 2 + 2 * 4 + 2) * nm_pad
    cap_rows = max(8, (vmem_cap // 2) // per_row)
    if requested is None:
        requested = min(512, max(128, _round_up(pl.cdiv(batch, 8), 8)))
    tb = min(_round_up(requested, 8), (cap_rows // 8) * 8, _round_up(batch, 8))
    return max(8, tb)


def prepare_params(params, compute_dtype=jnp.bfloat16):
    """One-time packing of PyTorch-layout params into kernel-ready operands.

    Lane-padding of the big fc1/fc4 weights and the fc4 bias happens ONCE here
    (cached by the caller), never per forward call; MXU operands are cast to
    bf16; the tiny fc2/fc3 weights and fc1/fc2/fc3 biases are consolidated
    into a single (56, 20) f32 array."""
    w1, b1 = params["fc1"]   # (20, nb_movies), (20,)
    w2, b2 = params["fc2"]   # (10, 20),        (10,)
    w3, b3 = params["fc3"]   # (20, 10),        (20,)
    w4, b4 = params["fc4"]   # (nb_movies, 20), (nb_movies,)
    nb_movies = int(w1.shape[1])
    nm_pad = _round_up(nb_movies, 128)
    pad_f = nm_pad - nb_movies

    w1t = jnp.pad(w1, ((0, 0), (0, pad_f))).astype(compute_dtype)       # [20, nm_pad] [out,in]
    w4io = jnp.pad(w4.T, ((0, 0), (0, pad_f))).astype(compute_dtype)    # [20, nm_pad] [in,out]
    b4p = jnp.pad(b4.reshape(1, -1), ((0, 0), (0, pad_f))).astype(jnp.float32)

    small = jnp.zeros((_SMALL_ROWS, 20), jnp.float32)
    small = small.at[_ROW_B1, :].set(b1)
    small = small.at[_ROW_W2:_ROW_W2 + 10, :].set(w2)      # (10, 20) [out, in]
    small = small.at[_ROW_B2, :10].set(b2)
    small = small.at[_ROW_W3:_ROW_W3 + 10, :].set(w3.T)    # (10, 20) [in, out]
    small = small.at[_ROW_B3, :].set(b3)

    return {"nb_movies": nb_movies, "nm_pad": nm_pad, "compute_dtype": compute_dtype,
            "w1t": w1t, "small": small, "w4": w4io, "b4": b4p}


def sae_forward(x, kparams, *, tile_batch=None):
    """x: [B, nb_movies] (any float dtype; cast to bf16 for the MXU).
    Returns f32 [B, nb_movies] (fc4 output, no activation)."""
    B, nb_movies = x.shape
    assert nb_movies == kparams["nb_movies"]
    nm_pad = kparams["nm_pad"]
    cdt = kparams["compute_dtype"]

    # bf16 activations halve input DMA bytes; ratings 0..5 are exact in bf16.
    if x.dtype != cdt:
        x = x.astype(cdt)

    tb = _choose_tile_batch(B, nm_pad, tile_batch)
    grid = (pl.cdiv(B, tb),)   # ragged batch handled by masking the edge tile

    # --- explicit, device-aware VMEM budget ---------------------------------
    bf16_rows = _round_up(20, 16)                 # bf16 packs 16 sublanes/vreg
    x_bytes = 2 * tb * nm_pad * 2                 # x tile, 2 bufs, bf16
    out_bytes = 2 * tb * nm_pad * 4               # out tile, 2 bufs, f32
    scratch_bytes = tb * nm_pad * 2               # lane-aligned x scratch
    w_bytes = 2 * 2 * bf16_rows * nm_pad * 2      # w1t + w4, 2 bufs each, bf16
    b4_bytes = 2 * 8 * nm_pad * 4                 # b4, 2 bufs, sublane-padded f32
    small_bytes = 2 * _SMALL_ROWS * 128 * 4
    total = x_bytes + out_bytes + scratch_bytes + w_bytes + b4_bytes + small_bytes
    vmem_limit = int(min(max(total + (8 << 20), 32 << 20),
                         int(0.75 * _vmem_capacity_bytes())))

    cost = pl.CostEstimate(
        flops=2 * B * (40 * nb_movies + 400),
        transcendentals=50 * B,                                   # sigmoids per row
        bytes_accessed=int(B * nb_movies * (2 + 4)                # bf16 in, f32 out
                           + 2 * 20 * nm_pad * 2                  # big bf16 weights
                           + nm_pad * 4 + _SMALL_ROWS * 20 * 4))

    return pl.pallas_call(
        sae_kernel,
        out_shape=jax.ShapeDtypeStruct((B, nb_movies), jnp.float32),
        grid_spec=pltpu.PrefetchScalarGridSpec(
            num_scalar_prefetch=0,
            grid=grid,
            in_specs=[
                pl.BlockSpec((tb, nb_movies), lambda i: (i, 0)),      # x tile
                pl.BlockSpec((20, nm_pad), lambda i: (0, 0)),         # fc1 weight
                pl.BlockSpec((_SMALL_ROWS, 20), lambda i: (0, 0)),    # packed small params
                pl.BlockSpec((20, nm_pad), lambda i: (0, 0)),         # fc4 weight
                pl.BlockSpec((1, nm_pad), lambda i: (0, 0)),          # fc4 bias
            ],
            out_specs=pl.BlockSpec((tb, nb_movies), lambda i: (i, 0)),
            scratch_shapes=[pltpu.VMEM((tb, nm_pad), cdt)],
        ),
        compiler_params=pltpu.CompilerParams(
            dimension_semantics=("parallel",),
            vmem_limit_bytes=vmem_limit,
        ),
        cost_estimate=cost,
    )(x, kparams["w1t"], kparams["small"], kparams["w4"], kparams["b4"])


def init_params(key, nb_movies):
    """nn.Linear-style params in PyTorch layout: weight [out, in], bias [out],
    init U(-1/sqrt(fan_in), 1/sqrt(fan_in))."""
    defs = [("fc1", nb_movies, 20), ("fc2", 20, 10),
            ("fc3", 10, 20), ("fc4", 20, nb_movies)]
    params = {}
    for name, din, dout in defs:
        key, kw, kb = jax.random.split(key, 3)
        bound = float(din) ** -0.5
        w = jax.random.uniform(kw, (dout, din), jnp.float32, -bound, bound)
        b = jax.random.uniform(kb, (dout,), jnp.float32, -bound, bound)
        params[name] = (w, b)
    return params


def sae_reference(x, params):
    """Pure-JAX f32 reference matching the PyTorch forward."""
    w1, b1 = params["fc1"]
    h = jax.nn.sigmoid(x @ w1.T + b1)
    w2, b2 = params["fc2"]
    h = jax.nn.sigmoid(h @ w2.T + b2)
    w3, b3 = params["fc3"]
    h = jax.nn.sigmoid(h @ w3.T + b3)
    w4, b4 = params["fc4"]
    return h @ w4.T + b4


if __name__ == "__main__":
    key = jax.random.PRNGKey(0)
    nb_movies = 1682   # MovieLens-100k movie count: exercises the unaligned-lane path
    batch = 400        # not a multiple of the 128-row tile: exercises the masked edge tile

    kx, kp = jax.random.split(key)
    # Ratings-like input (0..5 integers); exact in bf16.
    x_f32 = jnp.round(jax.random.uniform(kx, (batch, nb_movies), jnp.float32, 0.0, 5.0))
    params = init_params(kp, nb_movies)
    kparams = prepare_params(params)           # one-time pad/cast/pack, cached

    out = jax.block_until_ready(sae_forward(x_f32.astype(jnp.bfloat16), kparams))
    ref = sae_reference(x_f32, params)

    assert out.shape == (batch, nb_movies) and out.dtype == jnp.float32
    max_err = float(jnp.max(jnp.abs(out - ref)))
    # bf16 MXU operands with f32 accumulation -> relaxed tolerance vs f32 reference.
    assert jnp.allclose(out, ref, atol=5e-2, rtol=5e-2), f"max abs err {max_err}"

    print("KERNEL_OK")
</pallas_src>

<mosaic_0001>
module attributes {stable_mosaic.version = 11 : i64} {
  func.func @sae_kernel(%arg0: i32, %arg1: memref<128x1682xbf16, #tpu.memory_space<vmem>>, %arg2: memref<20x1792xbf16, #tpu.memory_space<vmem>>, %arg3: memref<56x20xf32, #tpu.memory_space<vmem>>, %arg4: memref<20x1792xbf16, #tpu.memory_space<vmem>>, %arg5: memref<1x1792xf32, #tpu.memory_space<vmem>>, %arg6: memref<128x1682xf32, #tpu.memory_space<vmem>>, %arg7: memref<128x1792xbf16, #tpu.memory_space<vmem>>) attributes {dimension_semantics = [#tpu.dimension_semantics<parallel>], iteration_bounds = array<i64: 4>, scalar_prefetch = 0 : i64, scratch_operands = 1 : i64, tpu.core_type = #tpu.core_type<tc>, window_params = [{transform_indices = @transform_0, window_bounds = array<i64: 128, 1682>}, {pipeline_mode = #tpu.pipeline_mode<synchronous>, transform_indices = @transform_1, window_bounds = array<i64: 20, 1792>}, {pipeline_mode = #tpu.pipeline_mode<synchronous>, transform_indices = @transform_2, window_bounds = array<i64: 56, 20>}, {pipeline_mode = #tpu.pipeline_mode<synchronous>, transform_indices = @transform_3, window_bounds = array<i64: 20, 1792>}, {pipeline_mode = #tpu.pipeline_mode<synchronous>, transform_indices = @transform_4, window_bounds = array<i64: 1, 1792>}, {transform_indices = @transform_5, window_bounds = array<i64: 128, 1682>}]} {
    %c0 = arith.constant 0 : index
    %c0_0 = arith.constant 0 : index
    %0 = vector.load %arg1[%c0, %c0_0] : memref<128x1682xbf16, #tpu.memory_space<vmem>>, vector<128x1682xbf16>
    %c0_1 = arith.constant 0 : index
    %c0_2 = arith.constant 0 : index
    %1 = vector.load %arg7[%c0_1, %c0_2] : memref<128x1792xbf16, #tpu.memory_space<vmem>>, vector<128x1682xbf16>
    tpu.vector_store %arg7[%c0_1, %c0_2], %0 {strides = array<i32>} : memref<128x1792xbf16, #tpu.memory_space<vmem>>, vector<128x1682xbf16>,
    %cst = arith.constant 0.000000e+00 : bf16
    %2 = vector.broadcast %cst : bf16 to vector<128x110xbf16>
    %c0_3 = arith.constant 0 : index
    %c1682 = arith.constant 1682 : index
    %3 = vector.load %arg7[%c0_3, %c1682] : memref<128x1792xbf16, #tpu.memory_space<vmem>>, vector<128x110xbf16>
    tpu.vector_store %arg7[%c0_3, %c1682], %2 {strides = array<i32>} : memref<128x1792xbf16, #tpu.memory_space<vmem>>, vector<128x110xbf16>,
    %c0_4 = arith.constant 0 : index
    %c0_5 = arith.constant 0 : index
    %4 = vector.load %arg7[%c0_4, %c0_5] : memref<128x1792xbf16, #tpu.memory_space<vmem>>, vector<128x1792xbf16>
    %c0_6 = arith.constant 0 : index
    %c0_7 = arith.constant 0 : index
    %5 = vector.load %arg2[%c0_6, %c0_7] : memref<20x1792xbf16, #tpu.memory_space<vmem>>, vector<20x1792xbf16>
    %cst_8 = arith.constant dense<0.000000e+00> : vector<128x20xf32>
    %6 = tpu.matmul %4, %5, %cst_8 {dimension_numbers = #tpu.dot_dimension_numbers<[1], [1], [0], [0], [0, 0, 1, 0], [], []>} : vector<128x1792xbf16>, vector<20x1792xbf16>, vector<128x20xf32> -> vector<128x20xf32>
    %c0_9 = arith.constant 0 : index
    %c0_10 = arith.constant 0 : index
    %7 = vector.load %arg3[%c0_9, %c0_10] : memref<56x20xf32, #tpu.memory_space<vmem>>, vector<1x20xf32>
    %8 = vector.broadcast %7 : vector<1x20xf32> to vector<128x20xf32>
    %9 = arith.addf %6, %8 : vector<128x20xf32>
    %10 = arith.negf %9 : vector<128x20xf32>
    %11 = math.exp %10 : vector<128x20xf32>
    %cst_11 = arith.constant 1.000000e+00 : f32
    %12 = vector.broadcast %cst_11 : f32 to vector<128x20xf32>
    %13 = arith.addf %12, %11 : vector<128x20xf32>
    %14 = arith.divf %12, %13 : vector<128x20xf32>
    %c8 = arith.constant 8 : index
    %c0_12 = arith.constant 0 : index
    %15 = vector.load %arg3[%c8, %c0_12] : memref<56x20xf32, #tpu.memory_space<vmem>>, vector<10x20xf32>
    %16 = arith.truncf %15 : vector<10x20xf32> to vector<10x20xbf16>
    %17 = arith.truncf %14 : vector<128x20xf32> to vector<128x20xbf16>
    %cst_13 = arith.constant dense<0.000000e+00> : vector<128x10xf32>
    %18 = tpu.matmul %17, %16, %cst_13 {dimension_numbers = #tpu.dot_dimension_numbers<[1], [1], [0], [0], [0, 0, 1, 0], [], []>} : vector<128x20xbf16>, vector<10x20xbf16>, vector<128x10xf32> -> vector<128x10xf32>
    %c24 = arith.constant 24 : index
    %c0_14 = arith.constant 0 : index
    %19 = vector.load %arg3[%c24, %c0_14] : memref<56x20xf32, #tpu.memory_space<vmem>>, vector<1x10xf32>
    %20 = vector.broadcast %19 : vector<1x10xf32> to vector<128x10xf32>
    %21 = arith.addf %18, %20 : vector<128x10xf32>
    %22 = arith.negf %21 : vector<128x10xf32>
    %23 = math.exp %22 : vector<128x10xf32>
    %cst_15 = arith.constant 1.000000e+00 : f32
    %24 = vector.broadcast %cst_15 : f32 to vector<128x10xf32>
    %25 = arith.addf %24, %23 : vector<128x10xf32>
    %26 = arith.divf %24, %25 : vector<128x10xf32>
    %c32 = arith.constant 32 : index
    %c0_16 = arith.constant 0 : index
    %27 = vector.load %arg3[%c32, %c0_16] : memref<56x20xf32, #tpu.memory_space<vmem>>, vector<10x20xf32>
    %28 = arith.truncf %27 : vector<10x20xf32> to vector<10x20xbf16>
    %29 = arith.truncf %26 : vector<128x10xf32> to vector<128x10xbf16>
    %cst_17 = arith.constant dense<0.000000e+00> : vector<128x20xf32>
    %30 = tpu.matmul %29, %28, %cst_17 {dimension_numbers = #tpu.dot_dimension_numbers<[1], [0], [0], [1], [0, 0, 1, 1], [], []>} : vector<128x10xbf16>, vector<10x20xbf16>, vector<128x20xf32> -> vector<128x20xf32>
    %c48 = arith.constant 48 : index
    %c0_18 = arith.constant 0 : index
    %31 = vector.load %arg3[%c48, %c0_18] : memref<56x20xf32, #tpu.memory_space<vmem>>, vector<1x20xf32>
    %32 = vector.broadcast %31 : vector<1x20xf32> to vector<128x20xf32>
    %33 = arith.addf %30, %32 : vector<128x20xf32>
    %34 = arith.negf %33 : vector<128x20xf32>
    %35 = math.exp %34 : vector<128x20xf32>
    %cst_19 = arith.constant 1.000000e+00 : f32
    %36 = vector.broadcast %cst_19 : f32 to vector<128x20xf32>
    %37 = arith.addf %36, %35 : vector<128x20xf32>
    %38 = arith.divf %36, %37 : vector<128x20xf32>
    %39 = arith.truncf %38 : vector<128x20xf32> to vector<128x20xbf16>
    %c0_20 = arith.constant 0 : index
    %c0_21 = arith.constant 0 : index
    %40 = vector.load %arg4[%c0_20, %c0_21] : memref<20x1792xbf16, #tpu.memory_space<vmem>>, vector<20x1792xbf16>
    %cst_22 = arith.constant dense<0.000000e+00> : vector<128x1792xf32>
    %41 = tpu.matmul %39, %40, %cst_22 {dimension_numbers = #tpu.dot_dimension_numbers<[1], [0], [0], [1], [0, 0, 1, 1], [], []>} : vector<128x20xbf16>, vector<20x1792xbf16>, vector<128x1792xf32> -> vector<128x1792xf32>
    %c0_23 = arith.constant 0 : index
    %c0_24 = arith.constant 0 : index
    %42 = vector.load %arg5[%c0_23, %c0_24] : memref<1x1792xf32, #tpu.memory_space<vmem>>, vector<1x1792xf32>
    %43 = vector.broadcast %42 : vector<1x1792xf32> to vector<128x1792xf32>
    %44 = arith.addf %41, %43 : vector<128x1792xf32>
    %45 = vector.extract_strided_slice %44 {offsets = [0, 0], sizes = [128, 1682], strides = [1, 1]} : vector<128x1792xf32> to vector<128x1682xf32>
    %c0_25 = arith.constant 0 : index
    %c0_26 = arith.constant 0 : index
    %46 = vector.load %arg6[%c0_25, %c0_26] : memref<128x1682xf32, #tpu.memory_space<vmem>>, vector<128x1682xf32>
    tpu.vector_store %arg6[%c0_25, %c0_26], %45 {strides = array<i32>} : memref<128x1682xf32, #tpu.memory_space<vmem>>, vector<128x1682xf32>,
    return
  }
  func.func @transform_0(%arg0: i32) -> (i32, i32) {
    %c0_i32 = arith.constant 0 : i32
    %c0_i32_0 = arith.constant 0 : i32
    return %arg0, %c0_i32 : i32, i32
  }
  func.func @transform_1(%arg0: i32) -> (i32, i32) {
    %c0_i32 = arith.constant 0 : i32
    %c0_i32_0 = arith.constant 0 : i32
    %c0_i32_1 = arith.constant 0 : i32
    return %c0_i32, %c0_i32_0 : i32, i32
  }
  func.func @transform_2(%arg0: i32) -> (i32, i32) {
    %c0_i32 = arith.constant 0 : i32
    %c0_i32_0 = arith.constant 0 : i32
    %c0_i32_1 = arith.constant 0 : i32
    return %c0_i32, %c0_i32_0 : i32, i32
  }
  func.func @transform_3(%arg0: i32) -> (i32, i32) {
    %c0_i32 = arith.constant 0 : i32
    %c0_i32_0 = arith.constant 0 : i32
    %c0_i32_1 = arith.constant 0 : i32
    return %c0_i32, %c0_i32_0 : i32, i32
  }
  func.func @transform_4(%arg0: i32) -> (i32, i32) {
    %c0_i32 = arith.constant 0 : i32
    %c0_i32_0 = arith.constant 0 : i32
    %c0_i32_1 = arith.constant 0 : i32
    return %c0_i32, %c0_i32_0 : i32, i32
  }
  func.func @transform_5(%arg0: i32) -> (i32, i32) {
    %c0_i32 = arith.constant 0 : i32
    %c0_i32_0 = arith.constant 0 : i32
    return %arg0, %c0_i32 : i32, i32
  }
}

</mosaic_0001>

<bundles_post_ra>
// kernel: tpu_custom_call.1
= control target key start
LH: loop header
LB: loop body
LE: loop exit
PB: predicated region body
PF: predicated region fallthrough
CT: control target
= control target key end

     0   :  { %s7694_s0 = inlined_call_operand.hbm [shape: bf16[400,1682], index: 0, kind: input, shape index: {}]   ;;  %s7695_s1 = inlined_call_operand.hbm [shape: bf16[20,1792], index: 1, kind: input, shape index: {}]   ;;  %s7696_s2 = inlined_call_operand.vmem [shape: f32[56,20], index: 2, kind: input, shape index: {}]   ;;  %s7697_s3 = inlined_call_operand.hbm [shape: bf16[20,1792], index: 3, kind: input, shape index: {}]   ;;  %s7698_s4 = inlined_call_operand.hbm [shape: f32[1,1792], index: 4, kind: input, shape index: {}]   ;;  %s7699_s5 = inlined_call_operand.hbm [shape: f32[400,1682], index: 5, kind: output, shape index: {}]  }
   0x1   :  { %7703 = sst [smem:[#allocation17_spill]] %s7695_s1 }
   0x2   :  { %7704 = sst [smem:[#allocation18_spill]] %s7697_s3 }
   0x3   :  { %10 = vsyncpa [#allocation4], 0 }
   0x4   :  { %12 = vsyncpa [#allocation4 + $0x1], 0 }
   0x5   :  { %13 = vsyncpa [#allocation7], 0 }
   0x6   :  { %14 = vsyncpa [#allocation10], 0 }
   0x7   :  { %15 = vsyncpa [#allocation5], 0 }
   0x8   :  { %17 = vsyncpa [#allocation5 + $0x1], 0  ;;  %s5864_s18 = smov 0   ;;  %s5866_s19 = smov 0  }
   0x9   :  { %s5868_s20 = smov 0   ;;  %s5870_s21 = smov 0  }
   0xa LB: > { %s5885_s22 = sadd.s32 4294967295, %s5820_s21   ;;  %s4423_s23 = sadd.s32 4294967294, %s5820_s21   ;;  %s5820_s21 = sphi %s5870_s21, %s7782_s21   ;;  %s5816_s20 = sphi %s5868_s20, %s7781_s20   ;;  %s5812_s19 = sphi %s5866_s19, %s7780_s19   ;;  %s5808_s18 = sphi %s5864_s18, %s7779_s18  }
   0xb   : > { %s5889_s24 = sadd.s32 1, %s5820_s21   ;;  %s30_s25 = sadd.s32 1, %s5816_s20 }
   0xc   : > { %s27_s26 = ssub.s32 %s5820_s21, %s5889_s24  ;;  %p37_p0 = scmp.ne.s32.totalorder %s5816_s20, %s5812_s19 }
   0xd   : > { %p28_p1 = scmp.eq.s32.totalorder %s27_s26, 0  ;;  %p38_p2 = scmp.eq.s32.totalorder %s5820_s21, 0 }
   0xe   : > { %p43_p3 = scmp.ne.s32.totalorder %s5812_s19, %s5808_s18  ;;  %p7702_p4 = scmp.eq.s32.totalorder %s5885_s22, 0 }
   0xf   : > { %s5901_s27 = scalar_select %p28_p1, %s5816_s20, %s30_s25  }
  0x10   : > { %p5903_p5 = por %p38_p2, %p37_p0  ;;  %p5909_p6 = por %p7702_p4, %p43_p3 }
  0x11   : > { %p151_p7 = scmp.eq.s32.totalorder %s5885_s22, 3  ;;  %p157_p8 = scmp.eq.s32.totalorder %s4423_s23, 3 }
  0x12   : > { %p4424_p9 = scmp.ge.s32.totalorder %s5820_s21, 1  ;;  %p164_p10 = scmp.lt.s32.totalorder %s5820_s21, 5 }
  0x13   : > { %p5916_p11 = por %p151_p7, %p37_p0  ;;  %p5920_p12 = por %p157_p8, %p43_p3 }
  0x14   : > { %p5924_p13 = pnand %p4424_p9, %p164_p10  ;;  %s7710_s1 = sld [smem:[#allocation17_spill]] }
  0x15   : > { %s7708_s6 = scalar_select %p5920_p12, 1, 0 }
  0x16   : > { %p5348_p1 = pneg %p5924_p13  ;;  %s5822_s11 = smov [#allocation6]  }
  0x17   : > { %s177_s12 = sshll.u32 %s5822_s11, 4  ;;  %s7712_s3 = sld [smem:[#allocation18_spill]]  ;;  %s178_s12 = int_to_ptr.vmem [resolvable:$true] %s177_s12 }
  0x18   : > { %p5935_p0 = pnand %p5348_p1, %p7702_p4  ;;  %s5823_s17 = smov 896  }
  0x19   : > { %s5824_s23 = smov 56   ;;  %s207_s8 = sshll.u32 %s7698_s4, 4  ;;  %s208_s8 = int_to_ptr.hbm [resolvable:$true] %s207_s8 }
  0x1a   : > { %s175_s10 = sshll.u32 %s7710_s1, 4  ;;  %s5825_s9 = smov [#allocation8]   ;;  %s176_s10 = int_to_ptr.hbm [resolvable:$true] %s175_s10 }
  0x1b   : > { %5351 = dma.hbm_to_vmem [thread:$0]  (!%p5935_p0), %s176_s10, 2688, %s178_s12, [#allocation7], %s5823_s17, %s5823_s17, %s5824_s23  }
  0x1c   : > { %s194_s11 = sshll.u32 %s5825_s9, 4  ;;  %s5826_s14 = smov [#allocation9]   ;;  %s195_s11 = int_to_ptr.vmem [resolvable:$true] %s194_s11 }
  0x1d   : > { %s192_s16 = sshll.u32 %s7712_s3, 4  ;;  %s209_s15 = sshll.u32 %s5826_s14, 4  ;;  %s193_s16 = int_to_ptr.hbm [resolvable:$true] %s192_s16  ;;  %s210_s15 = int_to_ptr.vmem [resolvable:$true] %s209_s15 }
  0x1e   : > { %5354 = dma.hbm_to_vmem [thread:$0]  (!%p5935_p0), %s193_s16, 2688, %s195_s11, [#allocation7], %s5823_s17, %s5823_s17, %s5824_s23  }
  0x1f   : > { %5357 = dma.hbm_to_vmem [thread:$0]  (!%p5935_p0), %s208_s8, 224, %s210_s15, [#allocation10]  }
  0x20   : > { %p4428_p2 = scmp.ge.s32.totalorder %s5820_s21, 4 }
  0x22   : > { %216 = sbr.rel (%p4428_p2) target bundleno = 91 (0x5b), region = 32 }
  0x27   : > { %219 = sbr.rel (!%p5903_p5) target bundleno = 91 (0x5b), region = 36 }
  0x2c   : > { %s220_s10 = sand.u32 1, %s5816_s20   ;;  %s4429_s12 = sshll.u32 %s5820_s21, 4 }
  0x2d   : > { %s5329_s25 = smul.u32 896, %s220_s10  ;;  %s226_s26 = ssub.s32 50, %s4429_s12 }
  0x2e   : > { %p227_p3 = scmp.lt.s32.totalorder %s226_s26, 16  ;;  %s5956_s9 = scalar_lea.sflag [#allocation4], %s220_s10 }
  0x2f   : > { %s224_s13 = scalar_lea.vmem [#allocation3], %s5329_s25 }
  0x30   : > { %s7784_s26 = smov (!%p227_p3, %s226_s26), 16 }
  0x31   : > { %s4431_s16 = smul.u32 56, %s7784_s26 }
  0x33   : > { %s231_s17 = ssub.s32 896, %s4431_s16 }
  0x34   : > { %s232_s23 = sshll.u32 %s231_s17, 4 }
  0x35   : > { %233 = vsyncadd %s5956_s9, %s232_s23  ;;  %p5959_p7 = scmp.ne.s32.totalorder %s4431_s16, 0  ;;  %s5330_s8 = smul.u32 896, %s5820_s21 }
  0x36   : > { %s5964_s11 = sshll.u32 %s224_s13, 4  ;;  %s5966_s14 = smul.u32 896, %s7784_s26 }
  0x37   : > { %7714 = sst [smem:[#allocation16_spill]] %s5964_s11  ;;  %s237_s10 = scalar_lea.hbm %s7694_s0, %s5330_s8 }
  0x38   : > { %s239_s25 = sshll.u32 %s237_s10, 4  ;;  %s5698_s17 = sshrl.u32 %s5966_s14, 4  ;;  %s5972_s25 = int_to_ptr.hbm [resolvable:$true] %s239_s25 }
  0x39   : > { %s5696_s16 = sshra.s32 %s5972_s25, 4  ;;  %s5734_s23 = sshll.u32 %s5698_s17, 4  ;;  %s5697_s16 = int_to_ptr.hbm [resolvable:$true] %s5696_s16 }
  0x3a   : > { %p5700_p5 = scmp.ne.s32.totalorder %s5734_s23, %s5966_s14  ;;  %s5701_s13 = sadd.s32 1, %s5698_s17 }
  0x3b   : > { %s5707_s8 = scalar_lea.hbm %s7694_s0, 2800  ;;  %p5708_p1 = scmp.lt.s32.totalorder %s5697_s16, %s7694_s0 }
  0x3c   : > { %s7786_s13 = smov (!%p5700_p5, %s5701_s13), %s5698_s17 }
  0x3d   : > { %s5703_s26 = scalar_lea.hbm %s5697_s16, %s7786_s13 }
  0x3e   : > { %p5704_p8 = scmp.ne.s32.totalorder %s5697_s16, %s5703_s26  ;;  %p5709_p0 = scmp.lt.s32.totalorder %s5707_s8, %s5703_s26 }
  0x40   : > { %p5705_p9 = pnand %p5704_p8, %p5959_p7  ;;  %p5710_p2 = por %p5709_p0, %p5708_p1 }
  0x42   : > { %p5706_p10 = pneg %p5705_p9 }
  0x44   : > { %p5711_p3 = pnand %p5710_p2, %p5706_p10 }
  0x46   : > { %5714 = shalt.err (!%p5711_p3)
}
  0x47   : > { %s7715_s23 = sld [smem:[#allocation16_spill]]  ;;  %s5827_s15 = smov [#allocation3]  }
  0x48   : > { %s5726_s12 = scalar_lea.vmem %s5827_s15, 1792 }
  0x4d   : > { %s7716_s1 = int_to_ptr.vmem [resolvable:$true] %s7715_s23 }
  0x4e   : > { %s5715_s17 = sshra.s32 %s7716_s1, 4  ;;  %s5716_s17 = int_to_ptr.vmem [resolvable:$true] %s5715_s17 }
  0x4f   : > { %s5722_s3 = scalar_lea.vmem %s5716_s17, %s7786_s13 }
  0x50   : > { %p5723_p5 = scmp.ne.s32.totalorder %s5716_s17, %s5722_s3  ;;  %p5728_p4 = scmp.lt.s32.totalorder %s5726_s12, %s5722_s3 }
  0x52   : > { %p5724_p8 = pnand %p5723_p5, %p5959_p7 }
  0x54   : > { %p5725_p9 = pneg %p5724_p8 }
  0x56   : > { %p5730_p12 = pnand %p5728_p4, %p5725_p9 }
  0x58   : > { %5733 = shalt.err (!%p5730_p12)
}
  0x59   : > { %s5828_s11 = smov 896   ;;  %s5829_s16 = smov 56  }
  0x5a   : > { %247 = dma.hbm_to_vmem [thread:$0]  (%p5959_p7), %s5972_s25, %s5966_s14, %s7716_s1, %s5956_s9, %s5828_s11, %s5828_s11, %s5829_s16  }
  0x5b PF: > { %253 = sbr.rel (%p5924_p13) target bundleno = 1635 (0x663), region = 40  ;;  %s5999_s3 = sand.u32 (!%p5924_p13), 1, %s5812_s19  }
  0x5c   : > { %s5331_s13 = smul.u32 (!%p5924_p13), 896, %s5999_s3  ;;  %s256_s26 = scalar_lea.sflag (!%p5924_p13), [#allocation4], %s5999_s3 }
  0x5e   : > { %s6003_s8 = scalar_lea.vmem (!%p5924_p13), [#allocation3], %s5331_s13 }
  0x60   : > { %5791 = dma.done.wait (%p5909_p6), %s256_s26, 14336  }
  0x61   : > { %5793 = vsyncadd (%p5909_p6), %s256_s26, 4294952960  ;;  %p7717_p4 = scmp.eq.s32.totalorder %s5885_s22, 0 }
  0x63   : > { %5795 = dma.done.wait (%p7717_p4), [#allocation7], 5376   ;;  %p7718_p12 = pmov %p7717_p4 }
  0x64   : > { %p7719_p13 = pmov %p7717_p4 }
  0x65   : > { %5797 = vsyncadd (%p7718_p12), [#allocation7], 4294961920 }
  0x66   : > { %5799 = dma.done.wait (%p7719_p13), [#allocation10], 224   ;;  %p7720_p7 = pmov %p7717_p4 }
  0x67   : > { %v685_v0 = vld [vmem:[#allocation6 + $0x70] sm:$0x33]  ;;  %v371_v3 = vld [vmem:[%s6003_s8 + $0x1c0] sm:$0xff]  ;;  %v378_v4 = vld [vmem:[%s6003_s8 + $0x1f8] sm:$0xff]  ;;  %vm433_vm0 = vcmask 1043456   ;;  %vm434_vm1 = vcmask 146436  }
  0x68   : > { %5801 = vsyncadd (%p7720_p7), [#allocation10], 4294967072  ;;  %v1303_v1 = vunpack.c.l.b16 %v685_v0  ;;  %v1304_v2 = vunpack.c.h.b16 %v685_v0  ;;  %486 = vst [vmem:[#allocation2 + $0x1c0] sm:$0xff] %v371_v3  ;;  %v315_v5 = vld [vmem:[%s6003_s8] sm:$0xff]  ;;  %v322_v8 = vld [vmem:[%s6003_s8 + $0x38] sm:$0xff]  ;;  %vm542_vm3 = vcmask 1043600  }
  0x69   : > { %493 = vst [vmem:[#allocation2 + $0x1f8] sm:$0xff] %v378_v4  ;;  %v385_v9 = vld [vmem:[%s6003_s8 + $0x230] sm:$0xff]  ;;  %v4890_v10 = vld [vmem:[#allocation6] sm:$0xf]  ;;  %v5304_v11 = vld [vmem:[#allocation6 + $0x34] sm:$0xf0] }
  0x6a   : > { %v1331_v6 = vpack.c.b16 %v1303_v1, %v1303_v1  ;;  %v1332_v7 = vpack.c.b16 %v1304_v2, %v1304_v2  ;;  %v5297_v12 = vld [vmem:[#allocation6 + $0x4] sm:$0xf]  ;;  %v4892_v13 = vld [vmem:[#allocation6 + $0x38] sm:$0xf0]  ;;  %427 = vst [vmem:[#allocation2] sm:$0xff] %v315_v5  ;;  %v392_v15 = vld [vmem:[%s6003_s8 + $0x268] sm:$0xff]  ;;  %v4891_v25 = vor.u32 %v5304_v11, %v4890_v10 }
  0x6b   : > { %v686_v14 = vld [vmem:[#allocation6 + $0x78] sm:$0x33]  ;;  %437 = vst [vmem:[#allocation2 + $0x38] sm:$0xff] %v322_v8  ;;  %v687_v16 = vld [vmem:[#allocation6 + $0x80] sm:$0x33]  ;;  %v329_v17 = vld [vmem:[%s6003_s8 + $0x70] sm:$0xff]  ;;  %v4895_v26 = vor.u32 %v5297_v12, %v4892_v13 }
  0x6c   : > { %5325 = vmatpush.bf16.xpose.msra.mxu2 %v1331_v6  ;;  %5327 = vmatpush.bf16.xpose.msra.mxu3 %v1332_v7  ;;  %500 = vst [vmem:[#allocation2 + $0x230] sm:$0xff] %v385_v9  ;;  %v336_v18 = vld [vmem:[%s6003_s8 + $0xa8] sm:$0xff]  ;;  %v1305_v19 = vunpack.c.l.b16 %v686_v14  ;;  %v1306_v20 = vunpack.c.h.b16 %v686_v14  ;;  %v399_v21 = vld [vmem:[%s6003_s8 + $0x2a0] sm:$0xff]  ;;  %v1307_v22 = vunpack.c.l.b16 %v687_v16  ;;  %v1308_v23 = vunpack.c.h.b16 %v687_v16  ;;  %v406_v24 = vld [vmem:[%s6003_s8 + $0x2d8] sm:$0xff]  ;;  %s5332_s13 = smul.u32 1792, %s5999_s3  ;;  %s5176_s29 = sshll.u32 (%p5916_p11), %s5885_s22, 4 }
  0x6d   : > { %1379 = vmatpush.bf16.xpose.msra.mxu0 %v1331_v6  ;;  %1428 = vmatpush.bf16.xpose.msra.mxu1 %v1332_v7  ;;  %507 = vst [vmem:[#allocation2 + $0x268] sm:$0xff] %v392_v15  ;;  %v343_v30 = vld [vmem:[%s6003_s8 + $0xe0] sm:$0xff]  ;;  %v350_v35 = vld [vmem:[%s6003_s8 + $0x118] sm:$0xff]  ;;  %v4898_v45 = vld [vmem:[#allocation6 + $0x8] sm:$0xf]  ;;  %vm2376_vm4 = vcmask 162816  }
  0x6e   : > { %444 = vst [vmem:[#allocation2 + $0x70] sm:$0xff] %v329_v17  ;;  %v1333_v28 = vpack.c.b16 %v1305_v19, %v1305_v19  ;;  %v1334_v29 = vpack.c.b16 %v1306_v20, %v1306_v20  ;;  %v1335_v33 = vpack.c.b16 %v1307_v22, %v1307_v22  ;;  %v1336_v34 = vpack.c.b16 %v1308_v23, %v1308_v23  ;;  %v5305_v46 = vld [vmem:[#allocation6 + $0x3c] sm:$0xf0]  ;;  %v5298_v48 = vld [vmem:[#allocation6 + $0xc] sm:$0xf]  ;;  %v413_v56 = vld [vmem:[%s6003_s8 + $0x310] sm:$0xff] }
  0x6f   : > { %451 = vst [vmem:[#allocation2 + $0xa8] sm:$0xff] %v336_v18  ;;  %v4666_v27 = vld [vmem:[#allocation2 + $0x1c0] sm:$0xf]  ;;  %v5241_v32 = vld [vmem:[#allocation2 + $0x1c4] sm:$0xf]  ;;  %v4899_v47 = vor.u32 %v5305_v46, %v4898_v45  ;;  %v420_v58 = vld [vmem:[%s6003_s8 + $0x348] sm:$0xff] }
  0x70   : > { %514 = vst [vmem:[#allocation2 + $0x2a0] sm:$0xff] %v399_v21  ;;  %v5248_v31 = vld [vmem:[#allocation2 + $0x1f4] sm:$0xf0]  ;;  %v4668_v36 = vld [vmem:[#allocation2 + $0x1f8] sm:$0xf0]  ;;  %v357_v60 = vld [vmem:[%s6003_s8 + $0x150] sm:$0xff] }
  0x71   : > { %521 = vst [vmem:[#allocation2 + $0x2d8] sm:$0xff] %v406_v24  ;;  %v4442_v37 = vld [vmem:[#allocation2] sm:$0xf]  ;;  %v5185_v39 = vld [vmem:[#allocation2 + $0x4] sm:$0xf]  ;;  %v4667_v41 = vor.u32 %v5248_v31, %v4666_v27  ;;  %v4671_v42 = vor.u32 %v5241_v32, %v4668_v36  ;;  %v364_v61 = vld [vmem:[%s6003_s8 + $0x188] sm:$0xff] }
  0x72   : > { %458 = vst [vmem:[#allocation2 + $0xe0] sm:$0xff] %v343_v30  ;;  %v5192_v38 = vld [vmem:[#allocation2 + $0x34] sm:$0xf0]  ;;  %v4444_v40 = vld [vmem:[#allocation2 + $0x38] sm:$0xf0]  ;;  %v316_v9 = vld [vmem:[%s6003_s8 + $0x8] sm:$0xff] }
  0x73   : > { %465 = vst [vmem:[#allocation2 + $0x118] sm:$0xff] %v350_v35  ;;  %v4443_v43 = vor.u32 %v5192_v38, %v4442_v37  ;;  %v4447_v44 = vor.u32 %v5185_v39, %v4444_v40  ;;  %v4900_v49 = vld [vmem:[#allocation6 + $0x40] sm:$0xf0]  ;;  %v4906_v51 = vld [vmem:[#allocation6 + $0x10] sm:$0xf]  ;;  %v324_v13 = vld [vmem:[%s6003_s8 + $0x48] sm:$0xff] }
  0x74   : > { %5326 = vmatpush.bf16.xpose.msra.mxu2 %v4891_v25  ;;  %5328 = vmatpush.bf16.xpose.msra.mxu3 %v4895_v26  ;;  %v4903_v50 = vor.u32 %v5298_v48, %v4900_v49  ;;  %v5306_v52 = vld [vmem:[#allocation6 + $0x44] sm:$0xf0]  ;;  %v5299_v54 = vld [vmem:[#allocation6 + $0x14] sm:$0xf]  ;;  %v4908_v55 = vld [vmem:[#allocation6 + $0x48] sm:$0xf0] }
  0x75   : > { %1380 = vmatpush.bf16.xpose.msra.mxu0 %v4891_v25  ;;  %1429 = vmatpush.bf16.xpose.msra.mxu1 %v4895_v26  ;;  %v4907_v53 = vor.u32 %v5306_v52, %v4906_v51  ;;  %v4911_v57 = vor.u32 %v5299_v54, %v4908_v55  ;;  %528 = vst [vmem:[#allocation2 + $0x310] sm:$0xff] %v413_v56  ;;  %v4722_v59 = vld [vmem:[#allocation2 + $0x230] sm:$0xf]  ;;  %v5262_v62 = vld [vmem:[#allocation2 + $0x264] sm:$0xf0]  ;;  %v323_v10 = vld [vmem:[%s6003_s8 + $0x40] sm:$0xff] }
  0x76   : > { %535 = vst [vmem:[#allocation2 + $0x348] sm:$0xff] %v420_v58  ;;  %v5255_v63 = vld [vmem:[#allocation2 + $0x234] sm:$0xf]  ;;  %v4724_v0 = vld [vmem:[#allocation2 + $0x268] sm:$0xf0]  ;;  %v4723_v5 = vor.u32 %v5262_v62, %v4722_v59  ;;  %v330_v31 = vld [vmem:[%s6003_s8 + $0x78] sm:$0xff] }
  0x77   : > { %472 = vst [vmem:[#allocation2 + $0x150] sm:$0xff] %v357_v60  ;;  %v4498_v1 = vld [vmem:[#allocation2 + $0x70] sm:$0xf]  ;;  %v5206_v2 = vld [vmem:[#allocation2 + $0xa4] sm:$0xf0]  ;;  %v4727_v6 = vor.u32 %v5255_v63, %v4724_v0  ;;  %v331_v38 = vld [vmem:[%s6003_s8 + $0x80] sm:$0xff] }
  0x78   : > { %479 = vst [vmem:[#allocation2 + $0x188] sm:$0xff] %v364_v61  ;;  %v5199_v3 = vld [vmem:[#allocation2 + $0x74] sm:$0xf]  ;;  %v4500_v4 = vld [vmem:[#allocation2 + $0xa8] sm:$0xf0]  ;;  %v4499_v7 = vor.u32 %v5206_v2, %v4498_v1  ;;  %v338_v39 = vld [vmem:[%s6003_s8 + $0xb8] sm:$0xff] }
  0x79   : > { %v4503_v8 = vor.u32 %v5199_v3, %v4500_v4  ;;  %428 = vst [vmem:[#allocation2 + $0x8] sm:$0xff] %v316_v9  ;;  %v4778_v11 = vld [vmem:[#allocation2 + $0x2a0] sm:$0xf]  ;;  %v317_v12 = vld [vmem:[%s6003_s8 + $0x10] sm:$0xff]  ;;  %v5276_v14 = vld [vmem:[#allocation2 + $0x2d4] sm:$0xf0] }
  0x7a   : > { %438 = vst [vmem:[#allocation2 + $0x40] sm:$0xff] %v323_v10  ;;  %v5269_v15 = vld [vmem:[#allocation2 + $0x2a4] sm:$0xf]  ;;  %v4780_v16 = vld [vmem:[#allocation2 + $0x2d8] sm:$0xf0]  ;;  %v4779_v21 = vor.u32 %v5276_v14, %v4778_v11  ;;  %v337_v32 = vld [vmem:[%s6003_s8 + $0xb0] sm:$0xff] }
  0x7b   : > { %1401 = vmatmul.bf16.vlgmr.msra.gmra.mxu2 %v4667_v41  ;;  %1450 = vmatmul.bf16.vlgmr.msra.gmra.mxu3 %v4671_v42  ;;  %429 = vst [vmem:[#allocation2 + $0x10] sm:$0xff] %v317_v12  ;;  %v4554_v17 = vld [vmem:[#allocation2 + $0xe0] sm:$0xf]  ;;  %v5220_v18 = vld [vmem:[#allocation2 + $0x114] sm:$0xf0]  ;;  %v4783_v22 = vor.u32 %v5269_v15, %v4780_v16  ;;  %v344_v51 = vld [vmem:[%s6003_s8 + $0xe8] sm:$0xff] }
  0x7c   : > { %1477 = vmatpush.bf16.xpose.msrb.mxu2 %v1333_v28  ;;  %1526 = vmatpush.bf16.xpose.msrb.mxu3 %v1334_v29  ;;  %439 = vst [vmem:[#allocation2 + $0x48] sm:$0xff] %v324_v13  ;;  %v5213_v19 = vld [vmem:[#allocation2 + $0xe4] sm:$0xf]  ;;  %v4556_v20 = vld [vmem:[#allocation2 + $0x118] sm:$0xf0]  ;;  %v4555_v23 = vor.u32 %v5220_v18, %v4554_v17  ;;  %v345_v54 = vld [vmem:[%s6003_s8 + $0xf0] sm:$0xff] }
  0x7d   : > { %1575 = vmatpush.bf16.xpose.msrb.mxu0 %v1335_v33  ;;  %1624 = vmatpush.bf16.xpose.msrb.mxu1 %v1336_v34  ;;  %v4559_v24 = vor.u32 %v5213_v19, %v4556_v20  ;;  %v688_v25 = vld [vmem:[#allocation6 + $0x88] sm:$0x33]  ;;  %v689_v28 = vld [vmem:[#allocation6 + $0x90] sm:$0x33]  ;;  %445 = vst [vmem:[#allocation2 + $0x78] sm:$0xff] %v330_v31  ;;  %v351_v52 = vld [vmem:[%s6003_s8 + $0x120] sm:$0xff] }
  0x7e   : > { %1381 = vmatmul.bf16.vlgmr.msra.gmra.mxu0 %v4443_v43  ;;  %1430 = vmatmul.bf16.vlgmr.msra.gmra.mxu1 %v4447_v44  ;;  %v1309_v26 = vunpack.c.l.b16 %v688_v25  ;;  %v1310_v27 = vunpack.c.h.b16 %v688_v25  ;;  %v1311_v29 = vunpack.c.l.b16 %v689_v28  ;;  %v1312_v30 = vunpack.c.h.b16 %v689_v28  ;;  %452 = vst [vmem:[#allocation2 + $0xb0] sm:$0xff] %v337_v32  ;;  %v4834_v37 = vld [vmem:[#allocation2 + $0x310] sm:$0xf]  ;;  %v5290_v40 = vld [vmem:[#allocation2 + $0x344] sm:$0xf0]  ;;  %v358_v3 = vld [vmem:[%s6003_s8 + $0x158] sm:$0xff] }
  0x7f   : > { %v5283_v41 = vld [vmem:[#allocation2 + $0x314] sm:$0xf]  ;;  %446 = vst [vmem:[#allocation2 + $0x80] sm:$0xff] %v331_v38  ;;  %v4836_v42 = vld [vmem:[#allocation2 + $0x348] sm:$0xf0]  ;;  %v379_v20 = vld [vmem:[%s6003_s8 + $0x200] sm:$0xff] }
  0x80   : > { %v1337_v33 = vpack.c.b16 %v1309_v26, %v1309_v26  ;;  %v1338_v34 = vpack.c.b16 %v1310_v27, %v1310_v27  ;;  %v1339_v35 = vpack.c.b16 %v1311_v29, %v1311_v29  ;;  %v1340_v36 = vpack.c.b16 %v1312_v30, %v1312_v30  ;;  %v4610_v43 = vld [vmem:[#allocation2 + $0x150] sm:$0xf]  ;;  %453 = vst [vmem:[#allocation2 + $0xb8] sm:$0xff] %v338_v39  ;;  %v5234_v44 = vld [vmem:[#allocation2 + $0x184] sm:$0xf0]  ;;  %vm6185_vm2 = vmor %vm434_vm1, %vm433_vm0  ;;  %s6969_s26 = scalar_lea.vmem [#allocation11], %s5332_s13 }
  0x81   : > { %v5227_v45 = vld [vmem:[#allocation2 + $0x154] sm:$0xf]  ;;  %v4612_v46 = vld [vmem:[#allocation2 + $0x188] sm:$0xf0]  ;;  %v4839_v48 = vor.u32 %v5283_v41, %v4836_v42  ;;  %v4611_v49 = vor.u32 %v5234_v44, %v4610_v43  ;;  %459 = vst [vmem:[#allocation2 + $0xe8] sm:$0xff] %v344_v51  ;;  %v386_v41 = vld [vmem:[%s6003_s8 + $0x238] sm:$0xff] }
  0x82   : > { %466 = vst [vmem:[#allocation2 + $0x120] sm:$0xff] %v351_v52  ;;  %v352_v55 = vld [vmem:[%s6003_s8 + $0x128] sm:$0xff]  ;;  %v5193_v56 = vld [vmem:[#allocation2 + $0x3c] sm:$0xf0]  ;;  %v4452_v58 = vld [vmem:[#allocation2 + $0x40] sm:$0xf0] }
  0x83   : > { %460 = vst [vmem:[#allocation2 + $0xf0] sm:$0xff] %v345_v54  ;;  %v4458_v59 = vld [vmem:[#allocation2 + $0x10] sm:$0xf]  ;;  %v5194_v60 = vld [vmem:[#allocation2 + $0x44] sm:$0xf0]  ;;  %s4305_s7 = ssub.s32 (%p5916_p11), 50, %s5176_s29 }
  0x84   : > { %1478 = vmatpush.bf16.xpose.msrb.mxu2 %v4899_v47  ;;  %1527 = vmatpush.bf16.xpose.msrb.mxu3 %v4903_v50  ;;  %v4835_v47 = vor.u32 %v5290_v40, %v4834_v37  ;;  %v4615_v50 = vor.u32 %v5227_v45, %v4612_v46  ;;  %467 = vst [vmem:[#allocation2 + $0x128] sm:$0xff] %v352_v55  ;;  %v5187_v61 = vld [vmem:[#allocation2 + $0x14] sm:$0xf]  ;;  %v4460_v62 = vld [vmem:[#allocation2 + $0x48] sm:$0xf0]  ;;  %v387_v46 = vld [vmem:[%s6003_s8 + $0x240] sm:$0xff] }
  0x85   : > { %1576 = vmatpush.bf16.xpose.msrb.mxu0 %v4907_v53  ;;  %1625 = vmatpush.bf16.xpose.msrb.mxu1 %v4911_v57  ;;  %v4450_v53 = vld [vmem:[#allocation2 + $0x8] sm:$0xf]  ;;  %v5186_v57 = vld [vmem:[#allocation2 + $0xc] sm:$0xf]  ;;  %v4459_v1 = vor.u32 %v5194_v60, %v4458_v59  ;;  %v4463_v2 = vor.u32 %v5187_v61, %v4460_v62  ;;  %v365_v4 = vld [vmem:[%s6003_s8 + $0x190] sm:$0xff]  ;;  %473 = vst [vmem:[#allocation2 + $0x158] sm:$0xff] %v358_v3 }
  0x86   : > { %v4451_v63 = vor.u32 %v5193_v56, %v4450_v53  ;;  %v4455_v0 = vor.u32 %v5186_v57, %v4452_v58  ;;  %480 = vst [vmem:[#allocation2 + $0x190] sm:$0xff] %v365_v4  ;;  %v5200_v9 = vld [vmem:[#allocation2 + $0x7c] sm:$0xf]  ;;  %v4508_v10 = vld [vmem:[#allocation2 + $0xb0] sm:$0xf0]  ;;  %v372_v19 = vld [vmem:[%s6003_s8 + $0x1c8] sm:$0xff] }
  0x87   : > { %v4514_v11 = vld [vmem:[#allocation2 + $0x80] sm:$0xf]  ;;  %v5208_v12 = vld [vmem:[#allocation2 + $0xb4] sm:$0xf0]  ;;  %v5201_v13 = vld [vmem:[#allocation2 + $0x84] sm:$0xf]  ;;  %v4511_v16 = vor.u32 %v5200_v9, %v4508_v10 }
  0x88   : > { %v4516_v14 = vld [vmem:[#allocation2 + $0xb8] sm:$0xf0]  ;;  %v4515_v17 = vor.u32 %v5208_v12, %v4514_v11  ;;  %487 = vst [vmem:[#allocation2 + $0x1c8] sm:$0xff] %v372_v19  ;;  %v5214_v25 = vld [vmem:[#allocation2 + $0xec] sm:$0xf]  ;;  %v393_v42 = vld [vmem:[%s6003_s8 + $0x270] sm:$0xff] }
  0x89   : > { %v4519_v18 = vor.u32 %v5201_v13, %v4516_v14  ;;  %494 = vst [vmem:[#allocation2 + $0x200] sm:$0xff] %v379_v20  ;;  %v4564_v26 = vld [vmem:[#allocation2 + $0x120] sm:$0xf0]  ;;  %v5300_v38 = vld [vmem:[#allocation6 + $0x1c] sm:$0xf]  ;;  %v408_v3 = vld [vmem:[%s6003_s8 + $0x2e8] sm:$0xff] }
  0x8a   : > { %v4570_v27 = vld [vmem:[#allocation2 + $0xf0] sm:$0xf]  ;;  %v5215_v29 = vld [vmem:[#allocation2 + $0xf4] sm:$0xf]  ;;  %v4567_v32 = vor.u32 %v5214_v25, %v4564_v26  ;;  %501 = vst [vmem:[#allocation2 + $0x238] sm:$0xff] %v386_v41  ;;  %p4306_p6 = scmp.lt.s32.totalorder (%p5916_p11), %s4305_s7, 16 }
  0x8b   : > { %1406 = vmatmul.bf16.gmra.mxu2 %v4723_v5  ;;  %1455 = vmatmul.bf16.gmra.mxu3 %v4727_v6  ;;  %v4506_v5 = vld [vmem:[#allocation2 + $0x78] sm:$0xf]  ;;  %v359_v6 = vld [vmem:[%s6003_s8 + $0x160] sm:$0xff]  ;;  %v5222_v28 = vld [vmem:[#allocation2 + $0x124] sm:$0xf0]  ;;  %508 = vst [vmem:[#allocation2 + $0x270] sm:$0xff] %v393_v42 }
  0x8c   : > { %1673 = vmatpush.bf16.xpose.msra.mxu2 %v1337_v33  ;;  %1722 = vmatpush.bf16.xpose.msra.mxu3 %v1338_v34  ;;  %474 = vst [vmem:[#allocation2 + $0x160] sm:$0xff] %v359_v6  ;;  %v4572_v30 = vld [vmem:[#allocation2 + $0x128] sm:$0xf0]  ;;  %v4571_v33 = vor.u32 %v5222_v28, %v4570_v27  ;;  %v4916_v39 = vld [vmem:[#allocation6 + $0x50] sm:$0xf0] }
  0x8d   : > { %1771 = vmatpush.bf16.xpose.msra.mxu0 %v1339_v35  ;;  %1820 = vmatpush.bf16.xpose.msra.mxu1 %v1340_v36  ;;  %v4575_v34 = vor.u32 %v5215_v29, %v4572_v30  ;;  %v4914_v35 = vld [vmem:[#allocation6 + $0x18] sm:$0xf]  ;;  %v5307_v36 = vld [vmem:[#allocation6 + $0x4c] sm:$0xf0]  ;;  %v4919_v40 = vor.u32 %v5300_v38, %v4916_v39  ;;  %v5228_v45 = vld [vmem:[#allocation2 + $0x15c] sm:$0xf] }
  0x8e   : > { %1386 = vmatmul.bf16.gmra.mxu0 %v4499_v7  ;;  %1435 = vmatmul.bf16.gmra.mxu1 %v4503_v8  ;;  %v366_v7 = vld [vmem:[%s6003_s8 + $0x198] sm:$0xff]  ;;  %v5207_v8 = vld [vmem:[#allocation2 + $0xac] sm:$0xf0]  ;;  %v4915_v37 = vor.u32 %v5307_v36, %v4914_v35  ;;  %502 = vst [vmem:[#allocation2 + $0x240] sm:$0xff] %v387_v46  ;;  %v5301_v60 = vld [vmem:[#allocation6 + $0x24] sm:$0xf] }
  0x8f   : > { %481 = vst [vmem:[#allocation2 + $0x198] sm:$0xff] %v366_v7  ;;  %v4507_v15 = vor.u32 %v5207_v8, %v4506_v5  ;;  %v4618_v43 = vld [vmem:[#allocation2 + $0x158] sm:$0xf]  ;;  %v5235_v44 = vld [vmem:[#allocation2 + $0x18c] sm:$0xf0]  ;;  %v415_v30 = vld [vmem:[%s6003_s8 + $0x320] sm:$0xff] }
  0x90   : > { %v5308_v51 = vld [vmem:[#allocation6 + $0x54] sm:$0xf0]  ;;  %v4619_v56 = vor.u32 %v5235_v44, %v4618_v43  ;;  %v4924_v61 = vld [vmem:[#allocation6 + $0x58] sm:$0xf0]  ;;  %v5249_v4 = vld [vmem:[#allocation2 + $0x1fc] sm:$0xf0] }
  0x91   : > { %v4927_v62 = vor.u32 %v5301_v60, %v4924_v61  ;;  %v5242_v5 = vld [vmem:[#allocation2 + $0x1cc] sm:$0xf]  ;;  %v4676_v6 = vld [vmem:[#allocation2 + $0x200] sm:$0xf0]  ;;  %523 = vst [vmem:[#allocation2 + $0x2e8] sm:$0xff] %v408_v3 }
  0x92   : > { %v4679_v12 = vor.u32 %v5242_v5, %v4676_v6  ;;  %v6064_v13 = vld [vmem:[%s7696_s2] ss:$0 sm:$0xff]  ;;  %v4730_v29 = vld [vmem:[#allocation2 + $0x238] sm:$0xf]  ;;  %530 = vst [vmem:[#allocation2 + $0x320] sm:$0xff] %v415_v30 }
  0x93   : > { %v5229_v53 = vld [vmem:[#allocation2 + $0x164] sm:$0xf]  ;;  %v4732_v35 = vld [vmem:[#allocation2 + $0x270] sm:$0xf0] }
  0x94   : > { %1674 = vmatpush.bf16.xpose.msra.mxu2 %v4915_v37  ;;  %1723 = vmatpush.bf16.xpose.msra.mxu3 %v4919_v40 }
  0x95   : > { %1821 = vmatpush.bf16.xpose.msra.mxu1 %v4927_v62  ;;  %v4738_v36 = vld [vmem:[#allocation2 + $0x240] sm:$0xf]  ;;  %v5257_v38 = vld [vmem:[#allocation2 + $0x244] sm:$0xf] }
  0x96   : > { %v5236_v52 = vld [vmem:[#allocation2 + $0x194] sm:$0xf0]  ;;  %v4628_v54 = vld [vmem:[#allocation2 + $0x198] sm:$0xf0]  ;;  %v319_v62 = vld [vmem:[%s6003_s8 + $0x20] sm:$0xff] }
  0x97   : > { %v4631_v59 = vor.u32 %v5229_v53, %v4628_v54  ;;  %431 = vst [vmem:[#allocation2 + $0x20] sm:$0xff] %v319_v62 }
  0x98   : > { %v5278_v5 = vld [vmem:[#allocation2 + $0x2e4] sm:$0xf0] }
  0x9b   : > { %1411 = vmatmul.bf16.gmra.mxu2 %v4779_v21  ;;  %1460 = vmatmul.bf16.gmra.mxu3 %v4783_v22  ;;  %v4562_v21 = vld [vmem:[#allocation2 + $0xe8] sm:$0xf]  ;;  %v373_v22 = vld [vmem:[%s6003_s8 + $0x1d0] sm:$0xff] }
  0x9c   : > { %488 = vst [vmem:[#allocation2 + $0x1d0] sm:$0xff] %v373_v22 }
  0x9e   : > { %1391 = vmatmul.bf16.gmra.mxu0 %v4555_v23  ;;  %1440 = vmatmul.bf16.gmra.mxu1 %v4559_v24  ;;  %v380_v23 = vld [vmem:[%s6003_s8 + $0x208] sm:$0xff]  ;;  %v5221_v24 = vld [vmem:[#allocation2 + $0x11c] sm:$0xf0] }
  0x9f   : > { %495 = vst [vmem:[#allocation2 + $0x208] sm:$0xff] %v380_v23  ;;  %v4563_v31 = vor.u32 %v5221_v24, %v4562_v21  ;;  %v414_v23 = vld [vmem:[%s6003_s8 + $0x318] sm:$0xff]  ;;  %v421_v24 = vld [vmem:[%s6003_s8 + $0x350] sm:$0xff] }
  0xa0   : > { %529 = vst [vmem:[#allocation2 + $0x318] sm:$0xff] %v414_v23 }
  0xa1   : > { %536 = vst [vmem:[#allocation2 + $0x350] sm:$0xff] %v421_v24 }
  0xa3   : > { %v4682_v7 = vld [vmem:[#allocation2 + $0x1d0] sm:$0xf]  ;;  %v5243_v9 = vld [vmem:[#allocation2 + $0x1d4] sm:$0xf] }
  0xa6   : > { %v5250_v8 = vld [vmem:[#allocation2 + $0x204] sm:$0xf0]  ;;  %v4684_v10 = vld [vmem:[#allocation2 + $0x208] sm:$0xf0] }
  0xa7   : > { %v4683_v14 = vor.u32 %v5250_v8, %v4682_v7  ;;  %v4796_v7 = vld [vmem:[#allocation2 + $0x2e8] sm:$0xf0] }
  0xab   : > { %1416 = vmatmul.bf16.gmra.mxu2 %v4835_v47  ;;  %1465 = vmatmul.bf16.gmra.mxu3 %v4839_v48  ;;  %v394_v47 = vld [vmem:[%s6003_s8 + $0x278] sm:$0xff]  ;;  %v4620_v48 = vld [vmem:[#allocation2 + $0x190] sm:$0xf0] }
  0xac   : > { %509 = vst [vmem:[#allocation2 + $0x278] sm:$0xff] %v394_v47  ;;  %v4623_v57 = vor.u32 %v5228_v45, %v4620_v48 }
  0xae   : > { %1396 = vmatmul.bf16.gmra.mxu0 %v4611_v49  ;;  %1445 = vmatmul.bf16.gmra.mxu1 %v4615_v50  ;;  %v4626_v49 = vld [vmem:[#allocation2 + $0x160] sm:$0xf] }
  0xaf   : > { %v4922_v50 = vld [vmem:[#allocation6 + $0x20] sm:$0xf]  ;;  %v4627_v58 = vor.u32 %v5236_v52, %v4626_v49 }
  0xb0   : > { %v4923_v55 = vor.u32 %v5308_v51, %v4922_v50 }
  0xb2   : > { %1772 = vmatpush.bf16.xpose.msra.mxu0 %v4923_v55  ;;  %v318_v55 = vld [vmem:[%s6003_s8 + $0x18] sm:$0xff] }
  0xb3   : > { %v5264_v37 = vld [vmem:[#allocation2 + $0x274] sm:$0xf0]  ;;  %v4740_v39 = vld [vmem:[#allocation2 + $0x278] sm:$0xf0]  ;;  %430 = vst [vmem:[#allocation2 + $0x18] sm:$0xff] %v318_v55 }
  0xb4   : > { %v4739_v45 = vor.u32 %v5264_v37, %v4738_v36  ;;  %v4743_v46 = vor.u32 %v5257_v38, %v4740_v39  ;;  %v4842_v38 = vld [vmem:[#allocation2 + $0x318] sm:$0xf]  ;;  %v5284_v39 = vld [vmem:[#allocation2 + $0x31c] sm:$0xf] }
  0xbb   : > { %1479 = vmatmul.bf16.vlgmr.msrb.gmra.mxu2 %v4451_v63  ;;  %1528 = vmatmul.bf16.vlgmr.msrb.gmra.mxu3 %v4455_v0  ;;  %v400_v63 = vld [vmem:[%s6003_s8 + $0x2a8] sm:$0xff]  ;;  %v407_v0 = vld [vmem:[%s6003_s8 + $0x2e0] sm:$0xff] }
  0xbc   : > { %515 = vst [vmem:[#allocation2 + $0x2a8] sm:$0xff] %v400_v63  ;;  %v326_v63 = vld [vmem:[%s6003_s8 + $0x58] sm:$0xff] }
  0xbd   : > { %522 = vst [vmem:[#allocation2 + $0x2e0] sm:$0xff] %v407_v0 }
  0xbe   : > { %1577 = vmatmul.bf16.vlgmr.msrb.gmra.mxu0 %v4459_v1  ;;  %1626 = vmatmul.bf16.vlgmr.msrb.gmra.mxu1 %v4463_v2  ;;  %v4674_v1 = vld [vmem:[#allocation2 + $0x1c8] sm:$0xf]  ;;  %v401_v2 = vld [vmem:[%s6003_s8 + $0x2b0] sm:$0xff]  ;;  %441 = vst [vmem:[#allocation2 + $0x58] sm:$0xff] %v326_v63 }
  0xbf   : > { %516 = vst [vmem:[#allocation2 + $0x2b0] sm:$0xff] %v401_v2  ;;  %v4675_v11 = vor.u32 %v5249_v4, %v4674_v1 }
  0xc3   : > { %v4786_v61 = vld [vmem:[#allocation2 + $0x2a8] sm:$0xf]  ;;  %v5270_v1 = vld [vmem:[#allocation2 + $0x2ac] sm:$0xf] }
  0xc4   : > { %v5277_v0 = vld [vmem:[#allocation2 + $0x2dc] sm:$0xf0]  ;;  %v4788_v3 = vld [vmem:[#allocation2 + $0x2e0] sm:$0xf0] }
  0xc6   : > { %v4794_v4 = vld [vmem:[#allocation2 + $0x2b0] sm:$0xf]  ;;  %v5271_v6 = vld [vmem:[#allocation2 + $0x2b4] sm:$0xf] }
  0xcb   : > { %1484 = vmatmul.bf16.gmra.mxu2 %v4507_v15  ;;  %1533 = vmatmul.bf16.gmra.mxu3 %v4511_v16  ;;  %v4687_v15 = vor.u32 %v5243_v9, %v4684_v10 }
  0xce   : > { %1582 = vmatmul.bf16.gmra.mxu0 %v4515_v17  ;;  %1631 = vmatmul.bf16.gmra.mxu1 %v4519_v18 }
  0xdb   : > { %1489 = vmatmul.bf16.gmra.mxu2 %v4563_v31  ;;  %1538 = vmatmul.bf16.gmra.mxu3 %v4567_v32  ;;  %v422_v31 = vld [vmem:[%s6003_s8 + $0x358] sm:$0xff]  ;;  %v5263_v32 = vld [vmem:[#allocation2 + $0x26c] sm:$0xf0] }
  0xdc   : > { %537 = vst [vmem:[#allocation2 + $0x358] sm:$0xff] %v422_v31  ;;  %v4731_v43 = vor.u32 %v5263_v32, %v4730_v29  ;;  %v332_v31 = vld [vmem:[%s6003_s8 + $0x88] sm:$0xff]  ;;  %v339_v32 = vld [vmem:[%s6003_s8 + $0xc0] sm:$0xff] }
  0xdd   : > { %447 = vst [vmem:[#allocation2 + $0x88] sm:$0xff] %v332_v31 }
  0xde   : > { %1587 = vmatmul.bf16.gmra.mxu0 %v4571_v33  ;;  %1636 = vmatmul.bf16.gmra.mxu1 %v4575_v34  ;;  %v5256_v33 = vld [vmem:[#allocation2 + $0x23c] sm:$0xf]  ;;  %454 = vst [vmem:[#allocation2 + $0xc0] sm:$0xff] %v339_v32 }
  0xdf   : > { %v4735_v44 = vor.u32 %v5256_v33, %v4732_v35 }
  0xeb   : > { %1494 = vmatmul.bf16.gmra.mxu2 %v4619_v56  ;;  %1543 = vmatmul.bf16.gmra.mxu3 %v4623_v57  ;;  %v325_v56 = vld [vmem:[%s6003_s8 + $0x50] sm:$0xff] }
  0xec   : > { %440 = vst [vmem:[#allocation2 + $0x50] sm:$0xff] %v325_v56 }
  0xee   : > { %1592 = vmatmul.bf16.gmra.mxu0 %v4627_v58  ;;  %1641 = vmatmul.bf16.gmra.mxu1 %v4631_v59 }
  0xfb   : > { %v1382_v16 = vpop.f32.mrf.mxu0  ;;  %v1431_v17 = vpop.f32.mrf.mxu1  ;;  %1499 = vmatmul.bf16.gmra.mxu2 %v4675_v11  ;;  %1548 = vmatmul.bf16.gmra.mxu3 %v4679_v12  ;;  %v4787_v11 = vor.u32 %v5277_v0, %v4786_v61  ;;  %v4791_v12 = vor.u32 %v5270_v1, %v4788_v3 }
  0xfc   : > { %v1383_v18 = vadd.f32 %v6064_v13, %v1382_v16 }
  0xfe   : > { %v6067_v19 = vadd.f32 %v1431_v17, %v1383_v18  ;;  %1597 = vmatmul.bf16.gmra.mxu0 %v4683_v14  ;;  %1646 = vmatmul.bf16.gmra.mxu1 %v4687_v15  ;;  %v1402_v20 = vpop.f32.mrf.mxu2  ;;  %v1451_v21 = vpop.f32.mrf.mxu3  ;;  %v4795_v14 = vor.u32 %v5278_v5, %v4794_v4  ;;  %v4799_v15 = vor.u32 %v5271_v6, %v4796_v7 }
  0xff   : > { %v1403_v22 = vadd.f32 %v6064_v13, %v1402_v20 }
 0x101   : > { %v6072_v25 = vadd.f32 %v1451_v21, %v1403_v22  ;;  %v690_v21 = vld [vmem:[#allocation6 + $0x98] sm:$0x33] }
 0x102   : > { %v1313_v23 = vunpack.c.l.b16 %v690_v21  ;;  %v1314_v24 = vunpack.c.h.b16 %v690_v21  ;;  %v5195_v21 = vld [vmem:[#allocation2 + $0x4c] sm:$0xf0] }
 0x103   : > { %v1384_v26 = vpop.f32.mrf.mxu0  ;;  %v1433_v27 = vpop.f32.mrf.mxu1 }
 0x104   : > { %v1385_v28 = vadd.f32 %v6064_v13, %v1384_v26  ;;  %v1342_v29 = vpack.c.b16 %v1314_v24, %v1314_v24 }
 0x106   : > { %v6077_v34 = vadd.f32 %v1433_v27, %v1385_v28  ;;  %v1404_v40 = vpop.f32.mrf.mxu2  ;;  %v1453_v41 = vpop.f32.mrf.mxu3  ;;  %v1341_v28 = vpack.c.b16 %v1313_v23, %v1313_v23  ;;  %1918 = vmatpush.bf16.xpose.msrb.mxu3 %v1342_v29  ;;  %v5188_v23 = vld [vmem:[#allocation2 + $0x1c] sm:$0xf]  ;;  %v5189_v29 = vld [vmem:[#allocation2 + $0x24] sm:$0xf] }
 0x107   : > { %v1405_v42 = vadd.f32 %v6064_v13, %v1404_v40  ;;  %v333_v40 = vld [vmem:[%s6003_s8 + $0x90] sm:$0xff] }
 0x108   : > { %1869 = vmatpush.bf16.xpose.msrb.mxu2 %v1341_v28  ;;  %448 = vst [vmem:[#allocation2 + $0x90] sm:$0xff] %v333_v40  ;;  %v5196_v28 = vld [vmem:[#allocation2 + $0x54] sm:$0xf0] }
 0x109   : > { %v6080_v47 = vadd.f32 %v1453_v41, %v1405_v42  ;;  %v340_v41 = vld [vmem:[%s6003_s8 + $0xc8] sm:$0xff]  ;;  %v5291_v42 = vld [vmem:[#allocation2 + $0x34c] sm:$0xf0] }
 0x10a   : > { %455 = vst [vmem:[#allocation2 + $0xc8] sm:$0xff] %v340_v41 }
 0x10b   : > { %v1387_v48 = vpop.f32.mrf.mxu0  ;;  %v1436_v49 = vpop.f32.mrf.mxu1  ;;  %1504 = vmatmul.bf16.gmra.mxu2 %v4731_v43  ;;  %1553 = vmatmul.bf16.gmra.mxu3 %v4735_v44  ;;  %v691_v43 = vld [vmem:[#allocation6 + $0xa0] sm:$0x33] }
 0x10c   : > { %v1388_v50 = vadd.f32 %v6064_v13, %v1387_v48  ;;  %v1315_v48 = vunpack.c.l.b16 %v691_v43  ;;  %v1316_v3 = vunpack.c.h.b16 %v691_v43 }
 0x10e   : > { %v6083_v51 = vadd.f32 %v1436_v49, %v1388_v50  ;;  %1602 = vmatmul.bf16.gmra.mxu0 %v4739_v45  ;;  %1651 = vmatmul.bf16.gmra.mxu1 %v4743_v46  ;;  %v1407_v52 = vpop.f32.mrf.mxu2  ;;  %v1456_v53 = vpop.f32.mrf.mxu3  ;;  %v4844_v45 = vld [vmem:[#allocation2 + $0x350] sm:$0xf0]  ;;  %v4850_v46 = vld [vmem:[#allocation2 + $0x320] sm:$0xf]  ;;  %v5292_v49 = vld [vmem:[#allocation2 + $0x354] sm:$0xf0]  ;;  %v1343_v55 = vpack.c.b16 %v1315_v48, %v1315_v48  ;;  %v1344_v5 = vpack.c.b16 %v1316_v3, %v1316_v3 }
 0x10f   : > { %v1408_v54 = vadd.f32 %v6064_v13, %v1407_v52  ;;  %v5285_v50 = vld [vmem:[#allocation2 + $0x324] sm:$0xf]  ;;  %v4852_v52 = vld [vmem:[#allocation2 + $0x358] sm:$0xf0] }
 0x110   : > { %v4855_v61 = vor.u32 %v5285_v50, %v4852_v52  ;;  %1967 = vmatpush.bf16.xpose.msrb.mxu0 %v1343_v55  ;;  %2016 = vmatpush.bf16.xpose.msrb.mxu1 %v1344_v5  ;;  %v367_v48 = vld [vmem:[%s6003_s8 + $0x1a0] sm:$0xff]  ;;  %v368_v55 = vld [vmem:[%s6003_s8 + $0x1a8] sm:$0xff] }
 0x111   : > { %v6088_v57 = vadd.f32 %v1456_v53, %v1408_v54  ;;  %482 = vst [vmem:[#allocation2 + $0x1a0] sm:$0xff] %v367_v48 }
 0x112   : > { %483 = vst [vmem:[#allocation2 + $0x1a8] sm:$0xff] %v368_v55 }
 0x113   : > { %v1389_v58 = vpop.f32.mrf.mxu0  ;;  %v1438_v59 = vpop.f32.mrf.mxu1 }
 0x114   : > { %v1390_v60 = vadd.f32 %v6064_v13, %v1389_v58  ;;  %v4843_v58 = vor.u32 %v5291_v42, %v4842_v38 }
 0x116   : > { %v6093_v2 = vadd.f32 %v1438_v59, %v1390_v60  ;;  %v1409_v8 = vpop.f32.mrf.mxu2  ;;  %v1458_v9 = vpop.f32.mrf.mxu3  ;;  %v4847_v59 = vor.u32 %v5284_v39, %v4844_v45  ;;  %v4851_v60 = vor.u32 %v5292_v49, %v4850_v46 }
 0x117   : > { %v1410_v10 = vadd.f32 %v6064_v13, %v1409_v8 }
 0x119   : > { %v6096_v16 = vadd.f32 %v1458_v9, %v1410_v10  ;;  %v346_v9 = vld [vmem:[%s6003_s8 + $0xf8] sm:$0xff]  ;;  %v353_v10 = vld [vmem:[%s6003_s8 + $0x130] sm:$0xff] }
 0x11a   : > { %461 = vst [vmem:[#allocation2 + $0xf8] sm:$0xff] %v346_v9 }
 0x11b   : > { %v1392_v17 = vpop.f32.mrf.mxu0  ;;  %v1441_v18 = vpop.f32.mrf.mxu1  ;;  %1509 = vmatmul.bf16.gmra.mxu2 %v4787_v11  ;;  %1558 = vmatmul.bf16.gmra.mxu3 %v4791_v12  ;;  %468 = vst [vmem:[#allocation2 + $0x130] sm:$0xff] %v353_v10 }
 0x11c   : > { %v1393_v20 = vadd.f32 %v6064_v13, %v1392_v17  ;;  %v4466_v17 = vld [vmem:[#allocation2 + $0x18] sm:$0xf] }
 0x11e   : > { %v6099_v22 = vadd.f32 %v1441_v18, %v1393_v20  ;;  %1607 = vmatmul.bf16.gmra.mxu0 %v4795_v14  ;;  %1656 = vmatmul.bf16.gmra.mxu1 %v4799_v15  ;;  %v1412_v26 = vpop.f32.mrf.mxu2  ;;  %v1461_v27 = vpop.f32.mrf.mxu3  ;;  %v347_v18 = vld [vmem:[%s6003_s8 + $0x100] sm:$0xff]  ;;  %v354_v20 = vld [vmem:[%s6003_s8 + $0x138] sm:$0xff] }
 0x11f   : > { %v1413_v30 = vadd.f32 %v6064_v13, %v1412_v26  ;;  %462 = vst [vmem:[#allocation2 + $0x100] sm:$0xff] %v347_v18  ;;  %v4468_v26 = vld [vmem:[#allocation2 + $0x50] sm:$0xf0] }
 0x120   : > { %469 = vst [vmem:[#allocation2 + $0x138] sm:$0xff] %v354_v20 }
 0x121   : > { %v6104_v33 = vadd.f32 %v1461_v27, %v1413_v30  ;;  %v4474_v27 = vld [vmem:[#allocation2 + $0x20] sm:$0xf]  ;;  %v4476_v30 = vld [vmem:[#allocation2 + $0x58] sm:$0xf0] }
 0x122   : > { %v4475_v38 = vor.u32 %v5196_v28, %v4474_v27  ;;  %v4479_v39 = vor.u32 %v5189_v29, %v4476_v30  ;;  %v4578_v30 = vld [vmem:[#allocation2 + $0xf8] sm:$0xf] }
 0x123   : > { %v1394_v35 = vpop.f32.mrf.mxu0  ;;  %v1443_v36 = vpop.f32.mrf.mxu1 }
 0x124   : > { %v1395_v37 = vadd.f32 %v6064_v13, %v1394_v35 }
 0x126   : > { %v6109_v44 = vadd.f32 %v1443_v36, %v1395_v37  ;;  %v1414_v53 = vpop.f32.mrf.mxu2  ;;  %v1463_v54 = vpop.f32.mrf.mxu3  ;;  %v4467_v36 = vor.u32 %v5195_v21, %v4466_v17  ;;  %v4471_v37 = vor.u32 %v5188_v23, %v4468_v26  ;;  %v374_v23 = vld [vmem:[%s6003_s8 + $0x1d8] sm:$0xff]  ;;  %v381_v26 = vld [vmem:[%s6003_s8 + $0x210] sm:$0xff] }
 0x127   : > { %v1415_v56 = vadd.f32 %v6064_v13, %v1414_v53  ;;  %v4522_v53 = vld [vmem:[#allocation2 + $0x88] sm:$0xf]  ;;  %489 = vst [vmem:[#allocation2 + $0x1d8] sm:$0xff] %v374_v23 }
 0x128   : > { %496 = vst [vmem:[#allocation2 + $0x210] sm:$0xff] %v381_v26  ;;  %v5310_v23 = vld [vmem:[#allocation6 + $0x64] sm:$0xf0]  ;;  %v4636_v26 = vld [vmem:[#allocation2 + $0x1a0] sm:$0xf0] }
 0x129   : > { %v6112_v62 = vadd.f32 %v1463_v54, %v1415_v56  ;;  %v361_v54 = vld [vmem:[%s6003_s8 + $0x170] sm:$0xff] }
 0x12a   : > { %476 = vst [vmem:[#allocation2 + $0x170] sm:$0xff] %v361_v54 }
 0x12b   : > { %v1397_v63 = vpop.f32.mrf.mxu0  ;;  %v1446_v0 = vpop.f32.mrf.mxu1  ;;  %1514 = vmatmul.bf16.gmra.mxu2 %v4843_v58  ;;  %1563 = vmatmul.bf16.gmra.mxu3 %v4847_v59  ;;  %v5209_v58 = vld [vmem:[#allocation2 + $0xbc] sm:$0xf0]  ;;  %v5202_v59 = vld [vmem:[#allocation2 + $0x8c] sm:$0xf] }
 0x12c   : > { %v1398_v1 = vadd.f32 %v6064_v13, %v1397_v63  ;;  %v5210_v63 = vld [vmem:[#allocation2 + $0xc4] sm:$0xf0] }
 0x12e   : > { %v6115_v4 = vadd.f32 %v1446_v0, %v1398_v1  ;;  %1612 = vmatmul.bf16.gmra.mxu0 %v4851_v60  ;;  %1661 = vmatmul.bf16.gmra.mxu1 %v4855_v61  ;;  %v1417_v6 = vpop.f32.mrf.mxu2  ;;  %v1466_v7 = vpop.f32.mrf.mxu3  ;;  %v4524_v60 = vld [vmem:[#allocation2 + $0xc0] sm:$0xf0]  ;;  %v4530_v61 = vld [vmem:[#allocation2 + $0x90] sm:$0xf]  ;;  %v5203_v0 = vld [vmem:[#allocation2 + $0x94] sm:$0xf] }
 0x12f   : > { %v1418_v8 = vadd.f32 %v6064_v13, %v1417_v6  ;;  %v4531_v9 = vor.u32 %v5210_v63, %v4530_v61  ;;  %v5302_v61 = vld [vmem:[#allocation6 + $0x2c] sm:$0xf]  ;;  %v4932_v63 = vld [vmem:[#allocation6 + $0x60] sm:$0xf0] }
 0x131   : > { %v6120_v11 = vadd.f32 %v1466_v7, %v1418_v8  ;;  %v4523_v7 = vor.u32 %v5209_v58, %v4522_v53  ;;  %v4527_v8 = vor.u32 %v5202_v59, %v4524_v60  ;;  %v4930_v58 = vld [vmem:[#allocation6 + $0x28] sm:$0xf]  ;;  %v5309_v59 = vld [vmem:[#allocation6 + $0x5c] sm:$0xf0] }
 0x132   : > { %v4931_v60 = vor.u32 %v5309_v59, %v4930_v58 }
 0x133   : > { %v1399_v12 = vpop.f32.mrf.mxu0  ;;  %v1448_v14 = vpop.f32.mrf.mxu1 }
 0x134   : > { %v1400_v15 = vadd.f32 %v6064_v13, %v1399_v12  ;;  %1870 = vmatpush.bf16.xpose.msrb.mxu2 %v4931_v60  ;;  %v4690_v60 = vld [vmem:[#allocation2 + $0x1d8] sm:$0xf] }
 0x136   : > { %v6125_v24 = vadd.f32 %v1448_v14, %v1400_v15  ;;  %v1419_v31 = vpop.f32.mrf.mxu2  ;;  %v1468_v32 = vpop.f32.mrf.mxu3 }
 0x137   : > { %v1420_v35 = vadd.f32 %v6064_v13, %v1419_v31  ;;  %v360_v13 = vld [vmem:[%s6003_s8 + $0x168] sm:$0xff]  ;;  %v375_v31 = vld [vmem:[%s6003_s8 + $0x1e0] sm:$0xff] }
 0x138   : > { %475 = vst [vmem:[#allocation2 + $0x168] sm:$0xff] %v360_v13 }
 0x139   : > { %v6128_v40 = vadd.f32 %v1468_v32, %v1420_v35  ;;  %v382_v32 = vld [vmem:[%s6003_s8 + $0x218] sm:$0xff]  ;;  %490 = vst [vmem:[#allocation2 + $0x1e0] sm:$0xff] %v375_v31 }
 0x13a   : > { %497 = vst [vmem:[#allocation2 + $0x218] sm:$0xff] %v382_v32 }
 0x13b   : > { %v1578_v41 = vpop.f32.mrf.mxu0  ;;  %v1627_v42 = vpop.f32.mrf.mxu1  ;;  %1675 = vmatmul.bf16.vlgmr.msra.gmra.mxu2 %v4467_v36  ;;  %1724 = vmatmul.bf16.vlgmr.msra.gmra.mxu3 %v4471_v37  ;;  %v5223_v36 = vld [vmem:[#allocation2 + $0x12c] sm:$0xf0]  ;;  %v5216_v37 = vld [vmem:[#allocation2 + $0xfc] sm:$0xf] }
 0x13c   : > { %v4579_v48 = vor.u32 %v5223_v36, %v4578_v30  ;;  %v4644_v30 = vld [vmem:[#allocation2 + $0x1a8] sm:$0xf0] }
 0x13e   : > { %1773 = vmatmul.bf16.vlgmr.msra.gmra.mxu0 %v4475_v38  ;;  %1822 = vmatmul.bf16.vlgmr.msra.gmra.mxu1 %v4479_v39  ;;  %v1480_v43 = vpop.f32.mrf.mxu2  ;;  %v1529_v45 = vpop.f32.mrf.mxu3  ;;  %v4580_v38 = vld [vmem:[#allocation2 + $0x130] sm:$0xf0]  ;;  %v4586_v39 = vld [vmem:[#allocation2 + $0x100] sm:$0xf] }
 0x13f   : > { %v1481_v46 = vadd.f32 %v1480_v43, %v6067_v19  ;;  %v4532_v19 = vld [vmem:[#allocation2 + $0xc8] sm:$0xf0] }
 0x140   : > { %v4535_v10 = vor.u32 %v5203_v0, %v4532_v19 }
 0x141   : > { %v1530_v49 = vadd.f32 %v1529_v45, %v1481_v46 }
 0x143   : > { %v1580_v50 = vpop.f32.mrf.mxu0  ;;  %v1629_v52 = vpop.f32.mrf.mxu1  ;;  %v1579_v56 = vadd.f32 %v1578_v41, %v1530_v49  ;;  %v5224_v41 = vld [vmem:[#allocation2 + $0x134] sm:$0xf0]  ;;  %v4583_v49 = vor.u32 %v5216_v37, %v4580_v38 }
 0x145   : > { %v6135_v1 = vadd.f32 %v1627_v42, %v1579_v56  ;;  %v5217_v42 = vld [vmem:[#allocation2 + $0x104] sm:$0xf] }
 0x146   : > { %v1482_v3 = vpop.f32.mrf.mxu2  ;;  %v1531_v5 = vpop.f32.mrf.mxu3 }
 0x147   : > { %v1483_v6 = vadd.f32 %v1482_v3, %v6077_v34 }
 0x149   : > { %v1532_v12 = vadd.f32 %v1531_v5, %v1483_v6  ;;  %v388_v6 = vld [vmem:[%s6003_s8 + $0x248] sm:$0xff] }
 0x14a   : > { %503 = vst [vmem:[#allocation2 + $0x248] sm:$0xff] %v388_v6  ;;  %v4698_v6 = vld [vmem:[#allocation2 + $0x1e0] sm:$0xf] }
 0x14b   : > { %v1583_v14 = vpop.f32.mrf.mxu0  ;;  %v1632_v15 = vpop.f32.mrf.mxu1  ;;  %v1581_v17 = vadd.f32 %v1580_v50, %v1532_v12  ;;  %1680 = vmatmul.bf16.gmra.mxu2 %v4523_v7  ;;  %1729 = vmatmul.bf16.gmra.mxu3 %v4527_v8  ;;  %v4587_v50 = vor.u32 %v5224_v41, %v4586_v39  ;;  %v395_v7 = vld [vmem:[%s6003_s8 + $0x280] sm:$0xff]  ;;  %v4634_v12 = vld [vmem:[#allocation2 + $0x168] sm:$0xf] }
 0x14c   : > { %510 = vst [vmem:[#allocation2 + $0x280] sm:$0xff] %v395_v7  ;;  %v5252_v7 = vld [vmem:[#allocation2 + $0x214] sm:$0xf0] }
 0x14d   : > { %v6138_v18 = vadd.f32 %v1629_v52, %v1581_v17  ;;  %v389_v17 = vld [vmem:[%s6003_s8 + $0x250] sm:$0xff] }
 0x14e   : > { %1778 = vmatmul.bf16.gmra.mxu0 %v4531_v9  ;;  %1827 = vmatmul.bf16.gmra.mxu1 %v4535_v10  ;;  %v1485_v20 = vpop.f32.mrf.mxu2  ;;  %v1534_v34 = vpop.f32.mrf.mxu3  ;;  %504 = vst [vmem:[#allocation2 + $0x250] sm:$0xff] %v389_v17 }
 0x14f   : > { %v1486_v21 = vadd.f32 %v1485_v20, %v6083_v51  ;;  %v4588_v51 = vld [vmem:[#allocation2 + $0x138] sm:$0xf0]  ;;  %v396_v20 = vld [vmem:[%s6003_s8 + $0x288] sm:$0xff] }
 0x150   : > { %v4591_v52 = vor.u32 %v5217_v42, %v4588_v51  ;;  %511 = vst [vmem:[#allocation2 + $0x288] sm:$0xff] %v396_v20  ;;  %v4699_v20 = vor.u32 %v5252_v7, %v4698_v6  ;;  %v320_v6 = vld [vmem:[%s6003_s8 + $0x28] sm:$0xff]  ;;  %v327_v7 = vld [vmem:[%s6003_s8 + $0x60] sm:$0xff] }
 0x151   : > { %v1535_v27 = vadd.f32 %v1534_v34, %v1486_v21  ;;  %v4938_v21 = vld [vmem:[#allocation6 + $0x30] sm:$0xf]  ;;  %432 = vst [vmem:[#allocation2 + $0x28] sm:$0xff] %v320_v6 }
 0x152   : > { %442 = vst [vmem:[#allocation2 + $0x60] sm:$0xff] %v327_v7 }
 0x153   : > { %v1585_v28 = vpop.f32.mrf.mxu0  ;;  %v1634_v29 = vpop.f32.mrf.mxu1  ;;  %v1584_v35 = vadd.f32 %v1583_v14, %v1535_v27  ;;  %v5237_v14 = vld [vmem:[#allocation2 + $0x19c] sm:$0xf0]  ;;  %v4642_v27 = vld [vmem:[#allocation2 + $0x170] sm:$0xf] }
 0x154   : > { %v4635_v37 = vor.u32 %v5237_v14, %v4634_v12 }
 0x155   : > { %v6145_v43 = vadd.f32 %v1632_v15, %v1584_v35  ;;  %v5230_v15 = vld [vmem:[#allocation2 + $0x16c] sm:$0xf] }
 0x156   : > { %v1487_v45 = vpop.f32.mrf.mxu2  ;;  %v1536_v46 = vpop.f32.mrf.mxu3  ;;  %v4639_v38 = vor.u32 %v5230_v15, %v4636_v26 }
 0x157   : > { %v1488_v13 = vadd.f32 %v1487_v45, %v6093_v2  ;;  %v4935_v2 = vor.u32 %v5302_v61, %v4932_v63  ;;  %v403_v61 = vld [vmem:[%s6003_s8 + $0x2c0] sm:$0xff]  ;;  %v410_v63 = vld [vmem:[%s6003_s8 + $0x2f8] sm:$0xff] }
 0x158   : > { %518 = vst [vmem:[#allocation2 + $0x2c0] sm:$0xff] %v403_v61 }
 0x159   : > { %v1537_v53 = vadd.f32 %v1536_v46, %v1488_v13  ;;  %1919 = vmatpush.bf16.xpose.msrb.mxu3 %v4935_v2  ;;  %v5303_v13 = vld [vmem:[#allocation6 + $0x34] sm:$0xf]  ;;  %525 = vst [vmem:[#allocation2 + $0x2f8] sm:$0xff] %v410_v63 }
 0x15b   : > { %v1588_v54 = vpop.f32.mrf.mxu0  ;;  %v1637_v55 = vpop.f32.mrf.mxu1  ;;  %v1586_v56 = vadd.f32 %v1585_v28, %v1537_v53  ;;  %1685 = vmatmul.bf16.gmra.mxu2 %v4579_v48  ;;  %1734 = vmatmul.bf16.gmra.mxu3 %v4583_v49  ;;  %v5238_v28 = vld [vmem:[#allocation2 + $0x1a4] sm:$0xf0]  ;;  %v4940_v48 = vld [vmem:[#allocation6 + $0x68] sm:$0xf0] }
 0x15c   : > { %v4643_v39 = vor.u32 %v5238_v28, %v4642_v27  ;;  %v4943_v49 = vor.u32 %v5303_v13, %v4940_v48  ;;  %v4754_v13 = vld [vmem:[#allocation2 + $0x250] sm:$0xf]  ;;  %v5266_v48 = vld [vmem:[#allocation2 + $0x284] sm:$0xf0] }
 0x15d   : > { %v6148_v0 = vadd.f32 %v1634_v29, %v1586_v56  ;;  %v5231_v29 = vld [vmem:[#allocation2 + $0x174] sm:$0xf] }
 0x15e   : > { %1783 = vmatmul.bf16.gmra.mxu0 %v4587_v50  ;;  %1832 = vmatmul.bf16.gmra.mxu1 %v4591_v52  ;;  %v1490_v19 = vpop.f32.mrf.mxu2  ;;  %v1539_v3 = vpop.f32.mrf.mxu3  ;;  %v4647_v41 = vor.u32 %v5231_v29, %v4644_v30  ;;  %v416_v30 = vld [vmem:[%s6003_s8 + $0x328] sm:$0xff] }
 0x15f   : > { %v1491_v5 = vadd.f32 %v1490_v19, %v6099_v22  ;;  %v4939_v22 = vor.u32 %v5310_v23, %v4938_v21  ;;  %2017 = vmatpush.bf16.xpose.msrb.mxu1 %v4943_v49  ;;  %v5251_v19 = vld [vmem:[#allocation2 + $0x20c] sm:$0xf0]  ;;  %531 = vst [vmem:[#allocation2 + $0x328] sm:$0xff] %v416_v30  ;;  %v5259_v49 = vld [vmem:[#allocation2 + $0x254] sm:$0xf] }
 0x160   : > { %v4691_v15 = vor.u32 %v5251_v19, %v4690_v60 }
 0x161   : > { %v1540_v8 = vadd.f32 %v1539_v3, %v1491_v5  ;;  %1968 = vmatpush.bf16.xpose.msrb.mxu0 %v4939_v22  ;;  %v5244_v3 = vld [vmem:[#allocation2 + $0x1dc] sm:$0xf]  ;;  %v4692_v5 = vld [vmem:[#allocation2 + $0x210] sm:$0xf0] }
 0x162   : > { %v4695_v17 = vor.u32 %v5244_v3, %v4692_v5 }
 0x163   : > { %v1590_v9 = vpop.f32.mrf.mxu0  ;;  %v1639_v10 = vpop.f32.mrf.mxu1  ;;  %v1589_v34 = vadd.f32 %v1588_v54, %v1540_v8  ;;  %v402_v54 = vld [vmem:[%s6003_s8 + $0x2b8] sm:$0xff]  ;;  %v5245_v8 = vld [vmem:[#allocation2 + $0x1e4] sm:$0xf] }
 0x164   : > { %517 = vst [vmem:[#allocation2 + $0x2b8] sm:$0xff] %v402_v54 }
 0x165   : > { %v6155_v31 = vadd.f32 %v1637_v55, %v1589_v34  ;;  %v409_v55 = vld [vmem:[%s6003_s8 + $0x2f0] sm:$0xff] }
 0x166   : > { %v1492_v32 = vpop.f32.mrf.mxu2  ;;  %v1541_v35 = vpop.f32.mrf.mxu3  ;;  %524 = vst [vmem:[#allocation2 + $0x2f0] sm:$0xff] %v409_v55 }
 0x167   : > { %v1493_v36 = vadd.f32 %v1492_v32, %v6109_v44  ;;  %v423_v32 = vld [vmem:[%s6003_s8 + $0x360] sm:$0xff] }
 0x168   : > { %538 = vst [vmem:[#allocation2 + $0x360] sm:$0xff] %v423_v32 }
 0x169   : > { %v1542_v42 = vadd.f32 %v1541_v35, %v1493_v36 }
 0x16b   : > { %v1593_v51 = vpop.f32.mrf.mxu0  ;;  %v1642_v45 = vpop.f32.mrf.mxu1  ;;  %v1591_v46 = vadd.f32 %v1590_v9, %v1542_v42  ;;  %1690 = vmatmul.bf16.gmra.mxu2 %v4635_v37  ;;  %1739 = vmatmul.bf16.gmra.mxu3 %v4639_v38  ;;  %v4746_v38 = vld [vmem:[#allocation2 + $0x248] sm:$0xf] }
 0x16d   : > { %v6158_v44 = vadd.f32 %v1639_v10, %v1591_v46  ;;  %v4748_v46 = vld [vmem:[#allocation2 + $0x280] sm:$0xf0] }
 0x16e   : > { %1788 = vmatmul.bf16.gmra.mxu0 %v4643_v39  ;;  %1837 = vmatmul.bf16.gmra.mxu1 %v4647_v41  ;;  %v1495_v50 = vpop.f32.mrf.mxu2  ;;  %v1544_v52 = vpop.f32.mrf.mxu3  ;;  %v417_v39 = vld [vmem:[%s6003_s8 + $0x330] sm:$0xff]  ;;  %v424_v41 = vld [vmem:[%s6003_s8 + $0x368] sm:$0xff] }
 0x16f   : > { %v1496_v53 = vadd.f32 %v1495_v50, %v6115_v4  ;;  %v4700_v4 = vld [vmem:[#allocation2 + $0x218] sm:$0xf0]  ;;  %532 = vst [vmem:[#allocation2 + $0x330] sm:$0xff] %v417_v39 }
 0x170   : > { %v4703_v34 = vor.u32 %v5245_v8, %v4700_v4  ;;  %539 = vst [vmem:[#allocation2 + $0x368] sm:$0xff] %v424_v41 }
 0x171   : > { %v1545_v56 = vadd.f32 %v1544_v52, %v1496_v53 }
 0x173   : > { %v1595_v58 = vpop.f32.mrf.mxu0  ;;  %v1644_v59 = vpop.f32.mrf.mxu1  ;;  %v1594_v2 = vadd.f32 %v1593_v51, %v1545_v56  ;;  %v5265_v51 = vld [vmem:[#allocation2 + $0x27c] sm:$0xf0] }
 0x174   : > { %v4747_v55 = vor.u32 %v5265_v51, %v4746_v38 }
 0x175   : > { %v6165_v9 = vadd.f32 %v1642_v45, %v1594_v2  ;;  %v5258_v45 = vld [vmem:[#allocation2 + $0x24c] sm:$0xf] }
 0x176   : > { %v1497_v10 = vpop.f32.mrf.mxu2  ;;  %v1546_v12 = vpop.f32.mrf.mxu3  ;;  %v4751_v56 = vor.u32 %v5258_v45, %v4748_v46 }
 0x177   : > { %v1498_v14 = vadd.f32 %v1497_v10, %v6125_v24 }
 0x179   : > { %v1547_v21 = vadd.f32 %v1546_v12, %v1498_v14  ;;  %v4802_v12 = vld [vmem:[#allocation2 + $0x2b8] sm:$0xf]  ;;  %v5279_v14 = vld [vmem:[#allocation2 + $0x2ec] sm:$0xf0] }
 0x17b   : > { %v1598_v23 = vpop.f32.mrf.mxu0  ;;  %v1647_v26 = vpop.f32.mrf.mxu1  ;;  %v1596_v27 = vadd.f32 %v1595_v58, %v1547_v21  ;;  %1695 = vmatmul.bf16.gmra.mxu2 %v4691_v15  ;;  %1744 = vmatmul.bf16.gmra.mxu3 %v4695_v17  ;;  %v4755_v58 = vor.u32 %v5266_v48, %v4754_v13  ;;  %v5272_v15 = vld [vmem:[#allocation2 + $0x2bc] sm:$0xf]  ;;  %v321_v17 = vld [vmem:[%s6003_s8 + $0x30] sm:$0xff] }
 0x17c   : > { %436 = vst.msk [vmem:[#allocation2 + $0x30] sm:$0xff] %vm6185_vm2, %v321_v17 }
 0x17d   : > { %v6168_v22 = vadd.f32 %v1644_v59, %v1596_v27  ;;  %v5273_v27 = vld [vmem:[#allocation2 + $0x2c4] sm:$0xf] }
 0x17e   : > { %1793 = vmatmul.bf16.gmra.mxu0 %v4699_v20  ;;  %1842 = vmatmul.bf16.gmra.mxu1 %v4703_v34  ;;  %v1500_v28 = vpop.f32.mrf.mxu2  ;;  %v1549_v24 = vpop.f32.mrf.mxu3  ;;  %v328_v20 = vld [vmem:[%s6003_s8 + $0x68] sm:$0xff] }
 0x17f   : > { %v1501_v29 = vadd.f32 %v1500_v28, %v6072_v25  ;;  %v4756_v25 = vld [vmem:[#allocation2 + $0x288] sm:$0xf0]  ;;  %443 = vst.msk [vmem:[#allocation2 + $0x68] sm:$0xff] %vm6185_vm2, %v328_v20  ;;  %v4812_v28 = vld [vmem:[#allocation2 + $0x2f8] sm:$0xf0] }
 0x180   : > { %v4759_v59 = vor.u32 %v5259_v49, %v4756_v25  ;;  %v4815_v39 = vor.u32 %v5273_v27, %v4812_v28  ;;  %v334_v49 = vld [vmem:[%s6003_s8 + $0x98] sm:$0xff]  ;;  %v341_v25 = vld [vmem:[%s6003_s8 + $0xd0] sm:$0xff]  ;;  %v348_v27 = vld [vmem:[%s6003_s8 + $0x108] sm:$0xff] }
 0x181   : > { %v1550_v35 = vadd.f32 %v1549_v24, %v1501_v29  ;;  %v5830_v24 = vmov 0   ;;  %449 = vst [vmem:[#allocation2 + $0x98] sm:$0xff] %v334_v49  ;;  %v355_v28 = vld [vmem:[%s6003_s8 + $0x140] sm:$0xff] }
 0x182   : > { %543 = vst.msk [vmem:[#allocation2 + $0x34] sm:$0xf] %vm542_vm3, %v5830_v24 }
 0x183   : > { %v1600_v36 = vpop.f32.mrf.mxu0  ;;  %v1649_v37 = vpop.f32.mrf.mxu1  ;;  %v1599_v42 = vadd.f32 %v1598_v23, %v1550_v35  ;;  %v4810_v23 = vld [vmem:[#allocation2 + $0x2c0] sm:$0xf]  ;;  %544 = vst.msk [vmem:[#allocation2 + $0x6c] sm:$0xf] %vm542_vm3, %v5830_v24 }
 0x184   : > { %456 = vst [vmem:[#allocation2 + $0xd0] sm:$0xff] %v341_v25 }
 0x185   : > { %v6175_v50 = vadd.f32 %v1647_v26, %v1599_v42  ;;  %v5280_v26 = vld [vmem:[#allocation2 + $0x2f4] sm:$0xf0]  ;;  %463 = vst [vmem:[#allocation2 + $0x108] sm:$0xff] %v348_v27 }
 0x186   : > { %v1502_v52 = vpop.f32.mrf.mxu2  ;;  %v1551_v53 = vpop.f32.mrf.mxu3  ;;  %v4811_v38 = vor.u32 %v5280_v26, %v4810_v23  ;;  %470 = vst [vmem:[#allocation2 + $0x140] sm:$0xff] %v355_v28 }
 0x187   : > { %v1503_v54 = vadd.f32 %v1502_v52, %v6080_v47 }
 0x189   : > { %v1552_v60 = vadd.f32 %v1551_v53, %v1503_v54 }
 0x18b   : > { %v1603_v61 = vpop.f32.mrf.mxu0  ;;  %v1652_v63 = vpop.f32.mrf.mxu1  ;;  %v1601_v2 = vadd.f32 %v1600_v36, %v1552_v60  ;;  %1700 = vmatmul.bf16.gmra.mxu2 %v4747_v55  ;;  %1749 = vmatmul.bf16.gmra.mxu3 %v4751_v56  ;;  %v4803_v36 = vor.u32 %v5279_v14, %v4802_v12  ;;  %v4858_v55 = vld [vmem:[#allocation2 + $0x328] sm:$0xf]  ;;  %v5286_v56 = vld [vmem:[#allocation2 + $0x32c] sm:$0xf] }
 0x18d   : > { %v6178_v19 = vadd.f32 %v1649_v37, %v1601_v2  ;;  %v4866_v2 = vld [vmem:[#allocation2 + $0x330] sm:$0xf] }
 0x18e   : > { %1798 = vmatmul.bf16.gmra.mxu0 %v4755_v58  ;;  %1847 = vmatmul.bf16.gmra.mxu1 %v4759_v59  ;;  %v1505_v3 = vpop.f32.mrf.mxu2  ;;  %v1554_v47 = vpop.f32.mrf.mxu3  ;;  %v335_v58 = vld [vmem:[%s6003_s8 + $0xa0] sm:$0xff]  ;;  %v342_v59 = vld [vmem:[%s6003_s8 + $0xd8] sm:$0xff] }
 0x18f   : > { %v1506_v5 = vadd.f32 %v1505_v3, %v6088_v57  ;;  %v4804_v57 = vld [vmem:[#allocation2 + $0x2f0] sm:$0xf0]  ;;  %450 = vst.msk [vmem:[#allocation2 + $0xa0] sm:$0xff] %vm6185_vm2, %v335_v58  ;;  %v5294_v3 = vld [vmem:[#allocation2 + $0x364] sm:$0xf0] }
 0x190   : > { %v4807_v37 = vor.u32 %v5272_v15, %v4804_v57  ;;  %457 = vst.msk [vmem:[#allocation2 + $0xd8] sm:$0xff] %vm6185_vm2, %v342_v59  ;;  %v4867_v12 = vor.u32 %v5294_v3, %v4866_v2 }
 0x191   : > { %v1555_v8 = vadd.f32 %v1554_v47, %v1506_v5  ;;  %v4868_v47 = vld [vmem:[#allocation2 + $0x368] sm:$0xf0]  ;;  %545 = vst.msk [vmem:[#allocation2 + $0xa4] sm:$0xf] %vm542_vm3, %v5830_v24 }
 0x192   : > { %546 = vst.msk [vmem:[#allocation2 + $0xdc] sm:$0xf] %vm542_vm3, %v5830_v24 }
 0x193   : > { %v1605_v4 = vpop.f32.mrf.mxu0  ;;  %v1654_v10 = vpop.f32.mrf.mxu1  ;;  %v1604_v21 = vadd.f32 %v1603_v61, %v1555_v8  ;;  %v5293_v61 = vld [vmem:[#allocation2 + $0x35c] sm:$0xf0] }
 0x195   : > { %v6195_v29 = vadd.f32 %v1652_v63, %v1604_v21  ;;  %v4860_v63 = vld [vmem:[#allocation2 + $0x360] sm:$0xf0] }
 0x196   : > { %v1507_v30 = vpop.f32.mrf.mxu2  ;;  %v1556_v32 = vpop.f32.mrf.mxu3 }
 0x197   : > { %v1508_v35 = vadd.f32 %v1507_v30, %v6096_v16 }
 0x199   : > { %v1557_v41 = vadd.f32 %v1556_v32, %v1508_v35 }
 0x19b   : > { %v1608_v42 = vpop.f32.mrf.mxu0  ;;  %v1657_v51 = vpop.f32.mrf.mxu1  ;;  %v1606_v45 = vadd.f32 %v1605_v4, %v1557_v41  ;;  %1705 = vmatmul.bf16.gmra.mxu2 %v4803_v36  ;;  %1754 = vmatmul.bf16.gmra.mxu3 %v4807_v37  ;;  %v4859_v4 = vor.u32 %v5293_v61, %v4858_v55  ;;  %v4482_v36 = vld [vmem:[#allocation2 + $0x28] sm:$0xf]  ;;  %v5190_v37 = vld [vmem:[#allocation2 + $0x2c] sm:$0xf] }
 0x19d   : > { %v6200_v46 = vadd.f32 %v1654_v10, %v1606_v45  ;;  %v4863_v10 = vor.u32 %v5286_v56, %v4860_v63  ;;  %v4490_v45 = vld [vmem:[#allocation2 + $0x30] sm:$0xf] }
 0x19e   : > { %1803 = vmatmul.bf16.gmra.mxu0 %v4811_v38  ;;  %1852 = vmatmul.bf16.gmra.mxu1 %v4815_v39  ;;  %v1510_v13 = vpop.f32.mrf.mxu2  ;;  %v1559_v16 = vpop.f32.mrf.mxu3  ;;  %v349_v38 = vld [vmem:[%s6003_s8 + $0x110] sm:$0xff]  ;;  %v356_v39 = vld [vmem:[%s6003_s8 + $0x148] sm:$0xff] }
 0x19f   : > { %v1511_v48 = vadd.f32 %v1510_v13, %v6104_v33  ;;  %v5287_v33 = vld [vmem:[#allocation2 + $0x334] sm:$0xf]  ;;  %464 = vst.msk [vmem:[#allocation2 + $0x110] sm:$0xff] %vm6185_vm2, %v349_v38  ;;  %v5198_v13 = vld [vmem:[#allocation2 + $0x64] sm:$0xf0] }
 0x1a0   : > { %v4871_v14 = vor.u32 %v5287_v33, %v4868_v47  ;;  %471 = vst.msk [vmem:[#allocation2 + $0x148] sm:$0xff] %vm6185_vm2, %v356_v39  ;;  %v4491_v55 = vor.u32 %v5198_v13, %v4490_v45  ;;  %v362_v33 = vld [vmem:[%s6003_s8 + $0x178] sm:$0xff]  ;;  %v369_v47 = vld [vmem:[%s6003_s8 + $0x1b0] sm:$0xff] }
 0x1a1   : > { %v1560_v52 = vadd.f32 %v1559_v16, %v1511_v48  ;;  %v4492_v16 = vld [vmem:[#allocation2 + $0x68] sm:$0xf0]  ;;  %547 = vst.msk [vmem:[#allocation2 + $0x114] sm:$0xf] %vm542_vm3, %v5830_v24 }
 0x1a2   : > { %548 = vst.msk [vmem:[#allocation2 + $0x14c] sm:$0xf] %vm542_vm3, %v5830_v24 }
 0x1a3   : > { %v1610_v53 = vpop.f32.mrf.mxu0  ;;  %v1659_v54 = vpop.f32.mrf.mxu1  ;;  %v1609_v60 = vadd.f32 %v1608_v42, %v1560_v52  ;;  %v5197_v42 = vld [vmem:[#allocation2 + $0x5c] sm:$0xf0]  ;;  %477 = vst [vmem:[#allocation2 + $0x178] sm:$0xff] %v362_v33 }
 0x1a4   : > { %484 = vst [vmem:[#allocation2 + $0x1b0] sm:$0xff] %v369_v47 }
 0x1a5   : > { %v6213_v5 = vadd.f32 %v1657_v51, %v1609_v60  ;;  %v4484_v51 = vld [vmem:[#allocation2 + $0x60] sm:$0xf0] }
 0x1a6   : > { %v1512_v6 = vpop.f32.mrf.mxu2  ;;  %v1561_v7 = vpop.f32.mrf.mxu3 }
 0x1a7   : > { %v1513_v8 = vadd.f32 %v1512_v6, %v6112_v62  ;;  %v5226_v33 = vld [vmem:[#allocation2 + $0x144] sm:$0xf0] }
 0x1a8   : > { %v5219_v47 = vld [vmem:[#allocation2 + $0x114] sm:$0xf] }
 0x1a9   : > { %v1562_v15 = vadd.f32 %v1561_v7, %v1513_v8 }
 0x1ab   : > { %v1613_v17 = vpop.f32.mrf.mxu0  ;;  %v1662_v20 = vpop.f32.mrf.mxu1  ;;  %v1611_v21 = vadd.f32 %v1610_v53, %v1562_v15  ;;  %1710 = vmatmul.bf16.gmra.mxu2 %v4859_v4  ;;  %1759 = vmatmul.bf16.gmra.mxu3 %v4863_v10  ;;  %v4483_v53 = vor.u32 %v5197_v42, %v4482_v36  ;;  %v4538_v4 = vld [vmem:[#allocation2 + $0x98] sm:$0xf]  ;;  %v5204_v10 = vld [vmem:[#allocation2 + $0x9c] sm:$0xf] }
 0x1ad   : > { %v6218_v57 = vadd.f32 %v1659_v54, %v1611_v21  ;;  %v4487_v54 = vor.u32 %v5190_v37, %v4484_v51  ;;  %v4546_v21 = vld [vmem:[#allocation2 + $0xa0] sm:$0xf]  ;;  %v2363_v51 = vld [vmem:[%s7696_s2 + $0x8] sm:$0xff] }
 0x1ae   : > { %1808 = vmatmul.bf16.gmra.mxu0 %v4867_v12  ;;  %1857 = vmatmul.bf16.gmra.mxu1 %v4871_v14  ;;  %v1515_v23 = vpop.f32.mrf.mxu2  ;;  %v1564_v62 = vpop.f32.mrf.mxu3  ;;  %v363_v12 = vld [vmem:[%s6003_s8 + $0x180] sm:$0xff]  ;;  %v370_v14 = vld [vmem:[%s6003_s8 + $0x1b8] sm:$0xff] }
 0x1af   : > { %v1516_v26 = vadd.f32 %v1515_v23, %v6120_v11  ;;  %v5191_v11 = vld [vmem:[#allocation2 + $0x34] sm:$0xf]  ;;  %478 = vst.msk [vmem:[#allocation2 + $0x180] sm:$0xff] %vm6185_vm2, %v363_v12  ;;  %v5212_v23 = vld [vmem:[#allocation2 + $0xd4] sm:$0xf0] }
 0x1b0   : > { %v4495_v56 = vor.u32 %v5191_v11, %v4492_v16  ;;  %485 = vst.msk [vmem:[#allocation2 + $0x1b8] sm:$0xff] %vm6185_vm2, %v370_v14  ;;  %v4547_v36 = vor.u32 %v5212_v23, %v4546_v21 }
 0x1b1   : > { %v1565_v30 = vadd.f32 %v1564_v62, %v1516_v26  ;;  %v4548_v62 = vld [vmem:[#allocation2 + $0xd8] sm:$0xf0]  ;;  %549 = vst.msk [vmem:[#allocation2 + $0x184] sm:$0xf] %vm542_vm3, %v5830_v24 }
 0x1b2   : > { %550 = vst.msk [vmem:[#allocation2 + $0x1bc] sm:$0xf] %vm542_vm3, %v5830_v24 }
 0x1b3   : > { %v1615_v32 = vpop.f32.mrf.mxu0  ;;  %v1664_v35 = vpop.f32.mrf.mxu1  ;;  %v1614_v41 = vadd.f32 %v1613_v17, %v1565_v30  ;;  %v5211_v17 = vld [vmem:[#allocation2 + $0xcc] sm:$0xf0] }
 0x1b5   : > { %v6231_v48 = vadd.f32 %v1662_v20, %v1614_v41  ;;  %v4540_v20 = vld [vmem:[#allocation2 + $0xd0] sm:$0xf0] }
 0x1b6   : > { %v1517_v49 = vpop.f32.mrf.mxu2  ;;  %v1566_v25 = vpop.f32.mrf.mxu3 }
 0x1b7   : > { %v1518_v52 = vadd.f32 %v1517_v49, %v6128_v40 }
 0x1b9   : > { %v1567_v58 = vadd.f32 %v1566_v25, %v1518_v52  ;;  %v376_v52 = vld [vmem:[%s6003_s8 + $0x1e8] sm:$0xff] }
 0x1ba   : > { %491 = vst [vmem:[#allocation2 + $0x1e8] sm:$0xff] %v376_v52 }
 0x1bb   : > { %v1774_v59 = vpop.f32.mrf.mxu0  ;;  %v1823_v60 = vpop.f32.mrf.mxu1  ;;  %v1616_v61 = vadd.f32 %v1615_v32, %v1567_v58  ;;  %1871 = vmatmul.bf16.vlgmr.msrb.gmra.mxu2 %v4483_v53  ;;  %1920 = vmatmul.bf16.vlgmr.msrb.gmra.mxu3 %v4487_v54  ;;  %v4539_v32 = vor.u32 %v5211_v17, %v4538_v4  ;;  %v383_v53 = vld [vmem:[%s6003_s8 + $0x220] sm:$0xff]  ;;  %v4594_v58 = vld [vmem:[#allocation2 + $0x108] sm:$0xf] }
 0x1bc   : > { %498 = vst [vmem:[#allocation2 + $0x220] sm:$0xff] %v383_v53 }
 0x1bd   : > { %v6236_v63 = vadd.f32 %v1664_v35, %v1616_v61  ;;  %v4543_v35 = vor.u32 %v5204_v10, %v4540_v20  ;;  %v384_v61 = vld [vmem:[%s6003_s8 + $0x228] sm:$0xff] }
 0x1be   : > { %1969 = vmatmul.bf16.vlgmr.msrb.gmra.mxu0 %v4491_v55  ;;  %2018 = vmatmul.bf16.vlgmr.msrb.gmra.mxu1 %v4495_v56  ;;  %v1676_v2 = vpop.f32.mrf.mxu2  ;;  %v1725_v40 = vpop.f32.mrf.mxu3  ;;  %499 = vst.msk [vmem:[#allocation2 + $0x228] sm:$0xff] %vm6185_vm2, %v384_v61 }
 0x1bf   : > { %v1677_v3 = vadd.f32 %v1676_v2, %v6135_v1  ;;  %v5205_v1 = vld [vmem:[#allocation2 + $0xa4] sm:$0xf]  ;;  %552 = vst.msk [vmem:[#allocation2 + $0x22c] sm:$0xf] %vm542_vm3, %v5830_v24 }
 0x1c0   : > { %v4551_v37 = vor.u32 %v5205_v1, %v4548_v62 }
 0x1c1   : > { %v1726_v6 = vadd.f32 %v1725_v40, %v1677_v3  ;;  %v5225_v40 = vld [vmem:[#allocation2 + $0x13c] sm:$0xf0]  ;;  %v4596_v3 = vld [vmem:[#allocation2 + $0x140] sm:$0xf0] }
 0x1c2   : > { %v4595_v12 = vor.u32 %v5225_v40, %v4594_v58 }
 0x1c3   : > { %v1776_v7 = vpop.f32.mrf.mxu0  ;;  %v1825_v8 = vpop.f32.mrf.mxu1  ;;  %v1775_v15 = vadd.f32 %v1774_v59, %v1726_v6  ;;  %v5218_v59 = vld [vmem:[#allocation2 + $0x10c] sm:$0xf] }
 0x1c4   : > { %v4604_v6 = vld [vmem:[#allocation2 + $0x148] sm:$0xf0]  ;;  %v4599_v14 = vor.u32 %v5218_v59, %v4596_v3 }
 0x1c5   : > { %v6249_v26 = vadd.f32 %v1823_v60, %v1775_v15  ;;  %v377_v60 = vld [vmem:[%s6003_s8 + $0x1f0] sm:$0xff]  ;;  %v4607_v17 = vor.u32 %v5219_v47, %v4604_v6  ;;  %v404_v47 = vld [vmem:[%s6003_s8 + $0x2c8] sm:$0xff]  ;;  %v411_v6 = vld [vmem:[%s6003_s8 + $0x300] sm:$0xff] }
 0x1c6   : > { %v1678_v27 = vpop.f32.mrf.mxu2  ;;  %v1727_v28 = vpop.f32.mrf.mxu3  ;;  %492 = vst.msk [vmem:[#allocation2 + $0x1f0] sm:$0xff] %vm6185_vm2, %v377_v60 }
 0x1c7   : > { %v1679_v30 = vadd.f32 %v1678_v27, %v6138_v18  ;;  %v2364_v18 = vld [vmem:[%s7696_s2 + $0x10] sm:$0x3]  ;;  %551 = vst.msk [vmem:[#allocation2 + $0x1f4] sm:$0xf] %vm542_vm3, %v5830_v24 }
 0x1c8   : > { %v2365_v45 = vpack.c.bf16 %v2364_v18, %v2363_v51  ;;  %v5239_v18 = vld [vmem:[#allocation2 + $0x1ac] sm:$0xf0]  ;;  %519 = vst [vmem:[#allocation2 + $0x2c8] sm:$0xff] %v404_v47 }
 0x1c9   : > { %v1728_v38 = vadd.f32 %v1727_v28, %v1679_v30  ;;  %v390_v30 = vld [vmem:[%s6003_s8 + $0x258] sm:$0xff]  ;;  %526 = vst [vmem:[#allocation2 + $0x300] sm:$0xff] %v411_v6 }
 0x1ca   : > { %v2402_v25 = vsel %vm2376_vm4, %v2365_v45, 0  ;;  %505 = vst [vmem:[#allocation2 + $0x258] sm:$0xff] %v390_v30  ;;  %v4652_v45 = vld [vmem:[#allocation2 + $0x1b0] sm:$0xf0] }
 0x1cb   : > { %v1779_v39 = vpop.f32.mrf.mxu0  ;;  %v1828_v41 = vpop.f32.mrf.mxu1  ;;  %v1777_v42 = vadd.f32 %v1776_v7, %v1728_v38  ;;  %1876 = vmatmul.bf16.gmra.mxu2 %v4539_v32  ;;  %1925 = vmatmul.bf16.gmra.mxu3 %v4543_v35  ;;  %v397_v32 = vld [vmem:[%s6003_s8 + $0x290] sm:$0xff]  ;;  %v4650_v38 = vld [vmem:[#allocation2 + $0x178] sm:$0xf] }
 0x1cc   : > { %2411 = vmatpush.bf16.xpose.msra.mxu2 %v2402_v25  ;;  %512 = vst [vmem:[#allocation2 + $0x290] sm:$0xff] %v397_v32 }
 0x1cd   : > { %v6260_v13 = vadd.f32 %v1825_v8, %v1777_v42  ;;  %v398_v42 = vld [vmem:[%s6003_s8 + $0x298] sm:$0xff] }
 0x1ce   : > { %1974 = vmatmul.bf16.gmra.mxu0 %v4547_v36  ;;  %2023 = vmatmul.bf16.gmra.mxu1 %v4551_v37  ;;  %v1681_v11 = vpop.f32.mrf.mxu2  ;;  %v1730_v16 = vpop.f32.mrf.mxu3  ;;  %513 = vst.msk [vmem:[#allocation2 + $0x298] sm:$0xff] %vm6185_vm2, %v398_v42 }
 0x1cf   : > { %v1682_v49 = vadd.f32 %v1681_v11, %v6145_v43  ;;  %v4602_v43 = vld [vmem:[#allocation2 + $0x110] sm:$0xf]  ;;  %v4658_v11 = vld [vmem:[#allocation2 + $0x180] sm:$0xf]  ;;  %554 = vst.msk [vmem:[#allocation2 + $0x29c] sm:$0xf] %vm542_vm3, %v5830_v24 }
 0x1d0   : > { %v4603_v15 = vor.u32 %v5226_v33, %v4602_v43 }
 0x1d1   : > { %v1731_v54 = vadd.f32 %v1730_v16, %v1682_v49  ;;  %v5240_v16 = vld [vmem:[#allocation2 + $0x1b4] sm:$0xf0]  ;;  %v4660_v49 = vld [vmem:[#allocation2 + $0x1b8] sm:$0xf0] }
 0x1d2   : > { %v4659_v58 = vor.u32 %v5240_v16, %v4658_v11 }
 0x1d3   : > { %v1781_v55 = vpop.f32.mrf.mxu0  ;;  %v1830_v56 = vpop.f32.mrf.mxu1  ;;  %v1780_v2 = vadd.f32 %v1779_v39, %v1731_v54  ;;  %v5232_v39 = vld [vmem:[#allocation2 + $0x17c] sm:$0xf] }
 0x1d5   : > { %v6274_v7 = vadd.f32 %v1828_v41, %v1780_v2  ;;  %v391_v41 = vld [vmem:[%s6003_s8 + $0x260] sm:$0xff] }
 0x1d6   : > { %v1683_v8 = vpop.f32.mrf.mxu2  ;;  %v1732_v4 = vpop.f32.mrf.mxu3  ;;  %506 = vst.msk [vmem:[#allocation2 + $0x260] sm:$0xff] %vm6185_vm2, %v391_v41 }
 0x1d7   : > { %v1684_v10 = vadd.f32 %v1683_v8, %v6148_v0  ;;  %553 = vst.msk [vmem:[#allocation2 + $0x264] sm:$0xf] %vm542_vm3, %v5830_v24 }
 0x1d9   : > { %v1733_v20 = vadd.f32 %v1732_v4, %v1684_v10 }
 0x1db   : > { %v1784_v21 = vpop.f32.mrf.mxu0  ;;  %v1833_v23 = vpop.f32.mrf.mxu1  ;;  %v1782_v1 = vadd.f32 %v1781_v55, %v1733_v20  ;;  %1881 = vmatmul.bf16.gmra.mxu2 %v4595_v12  ;;  %1930 = vmatmul.bf16.gmra.mxu3 %v4599_v14  ;;  %v4651_v55 = vor.u32 %v5239_v18, %v4650_v38  ;;  %v4706_v12 = vld [vmem:[#allocation2 + $0x1e8] sm:$0xf]  ;;  %v5246_v14 = vld [vmem:[#allocation2 + $0x1ec] sm:$0xf] }
 0x1dd   : > { %v6279_v62 = vadd.f32 %v1830_v56, %v1782_v1  ;;  %v4655_v56 = vor.u32 %v5232_v39, %v4652_v45  ;;  %v4714_v1 = vld [vmem:[#allocation2 + $0x1f0] sm:$0xf] }
 0x1de   : > { %1979 = vmatmul.bf16.gmra.mxu0 %v4603_v15  ;;  %2028 = vmatmul.bf16.gmra.mxu1 %v4607_v17  ;;  %v1686_v27 = vpop.f32.mrf.mxu2  ;;  %v1735_v0 = vpop.f32.mrf.mxu3  ;;  %v405_v15 = vld [vmem:[%s6003_s8 + $0x2d0] sm:$0xff]  ;;  %v412_v17 = vld [vmem:[%s6003_s8 + $0x308] sm:$0xff] }
 0x1df   : > { %v1687_v28 = vadd.f32 %v1686_v27, %v6155_v31  ;;  %v5233_v31 = vld [vmem:[#allocation2 + $0x184] sm:$0xf]  ;;  %520 = vst.msk [vmem:[#allocation2 + $0x2d0] sm:$0xff] %vm6185_vm2, %v405_v15  ;;  %v5254_v27 = vld [vmem:[#allocation2 + $0x224] sm:$0xf0] }
 0x1e0   : > { %v4663_v59 = vor.u32 %v5233_v31, %v4660_v49  ;;  %527 = vst.msk [vmem:[#allocation2 + $0x308] sm:$0xff] %vm6185_vm2, %v412_v17  ;;  %v4715_v38 = vor.u32 %v5254_v27, %v4714_v1  ;;  %v418_v31 = vld [vmem:[%s6003_s8 + $0x338] sm:$0xff]  ;;  %v425_v49 = vld [vmem:[%s6003_s8 + $0x370] sm:$0xff]  ;;  %v4818_v27 = vld [vmem:[#allocation2 + $0x2c8] sm:$0xf] }
 0x1e1   : > { %v1736_v35 = vadd.f32 %v1735_v0, %v1687_v28  ;;  %v4716_v0 = vld [vmem:[#allocation2 + $0x228] sm:$0xf0]  ;;  %555 = vst.msk [vmem:[#allocation2 + $0x2d4] sm:$0xf] %vm542_vm3, %v5830_v24 }
 0x1e2   : > { %556 = vst.msk [vmem:[#allocation2 + $0x30c] sm:$0xf] %vm542_vm3, %v5830_v24 }
 0x1e3   : > { %v1786_v36 = vpop.f32.mrf.mxu0  ;;  %v1835_v37 = vpop.f32.mrf.mxu1  ;;  %v1785_v51 = vadd.f32 %v1784_v21, %v1736_v35  ;;  %v5253_v21 = vld [vmem:[#allocation2 + $0x21c] sm:$0xf0]  ;;  %533 = vst [vmem:[#allocation2 + $0x338] sm:$0xff] %v418_v31 }
 0x1e4   : > { %540 = vst [vmem:[#allocation2 + $0x370] sm:$0xff] %v425_v49 }
 0x1e5   : > { %v6292_v25 = vadd.f32 %v1833_v23, %v1785_v51  ;;  %v4708_v23 = vld [vmem:[#allocation2 + $0x220] sm:$0xf0] }
 0x1e6   : > { %v1688_v52 = vpop.f32.mrf.mxu2  ;;  %v1737_v53 = vpop.f32.mrf.mxu3 }
 0x1e7   : > { %v1689_v54 = vadd.f32 %v1688_v52, %v6158_v44 }
 0x1e9   : > { %v1738_v60 = vadd.f32 %v1737_v53, %v1689_v54 }
 0x1eb   : > { %v1789_v61 = vpop.f32.mrf.mxu0  ;;  %v1838_v2 = vpop.f32.mrf.mxu1  ;;  %v1787_v40 = vadd.f32 %v1786_v36, %v1738_v60  ;;  %1886 = vmatmul.bf16.gmra.mxu2 %v4651_v55  ;;  %1935 = vmatmul.bf16.gmra.mxu3 %v4655_v56  ;;  %v4707_v36 = vor.u32 %v5253_v21, %v4706_v12  ;;  %v4762_v55 = vld [vmem:[#allocation2 + $0x258] sm:$0xf]  ;;  %v5260_v56 = vld [vmem:[#allocation2 + $0x25c] sm:$0xf] }
 0x1ed   : > { %v6297_v3 = vadd.f32 %v1835_v37, %v1787_v40  ;;  %v4711_v37 = vor.u32 %v5246_v14, %v4708_v23  ;;  %v5268_v40 = vld [vmem:[#allocation2 + $0x294] sm:$0xf0] }
 0x1ee   : > { %1984 = vmatmul.bf16.gmra.mxu0 %v4659_v58  ;;  %2033 = vmatmul.bf16.gmra.mxu1 %v4663_v59  ;;  %v1691_v43 = vpop.f32.mrf.mxu2  ;;  %v1740_v44 = vpop.f32.mrf.mxu3  ;;  %v419_v58 = vld [vmem:[%s6003_s8 + $0x340] sm:$0xff]  ;;  %v426_v59 = vld [vmem:[%s6003_s8 + $0x378] sm:$0xff]  ;;  %s4297_s8 = scalar_lea.sflag [#allocation5], %s5999_s3 }
 0x1ef   : > { %v1692_v33 = vadd.f32 %v1691_v43, %v6165_v9  ;;  %v5247_v9 = vld [vmem:[#allocation2 + $0x1f4] sm:$0xf]  ;;  %534 = vst.msk [vmem:[#allocation2 + $0x340] sm:$0xff] %vm6185_vm2, %v419_v58  ;;  %v5261_v43 = vld [vmem:[#allocation2 + $0x264] sm:$0xf] }
 0x1f0   : > { %v4719_v39 = vor.u32 %v5247_v9, %v4716_v0  ;;  %541 = vst.msk [vmem:[#allocation2 + $0x378] sm:$0xff] %vm6185_vm2, %v426_v59  ;;  %v5274_v9 = vld [vmem:[#allocation2 + $0x2cc] sm:$0xf]  ;;  %v5281_v0 = vld [vmem:[#allocation2 + $0x2fc] sm:$0xf0] }
 0x1f1   : > { %v1741_v8 = vadd.f32 %v1740_v44, %v1692_v33  ;;  %v4772_v44 = vld [vmem:[#allocation2 + $0x298] sm:$0xf0]  ;;  %557 = vst.msk [vmem:[#allocation2 + $0x344] sm:$0xf] %vm542_vm3, %v5830_v24  ;;  %v4874_v59 = vld [vmem:[#allocation2 + $0x338] sm:$0xf] }
 0x1f2   : > { %558 = vst.msk [vmem:[#allocation2 + $0x37c] sm:$0xf] %vm542_vm3, %v5830_v24  ;;  %v4775_v12 = vor.u32 %v5261_v43, %v4772_v44 }
 0x1f3   : > { %v1791_v4 = vpop.f32.mrf.mxu0  ;;  %v1840_v10 = vpop.f32.mrf.mxu1  ;;  %v1790_v20 = vadd.f32 %v1789_v61, %v1741_v8  ;;  %v5267_v61 = vld [vmem:[#allocation2 + $0x28c] sm:$0xf0] }
 0x1f4   : > { %v4763_v8 = vor.u32 %v5267_v61, %v4762_v55  ;;  %v5295_v61 = vld [vmem:[#allocation2 + $0x36c] sm:$0xf0] }
 0x1f5   : > { %v6310_v28 = vadd.f32 %v1838_v2, %v1790_v20  ;;  %v4764_v2 = vld [vmem:[#allocation2 + $0x290] sm:$0xf0] }
 0x1f6   : > { %v1693_v30 = vpop.f32.mrf.mxu2  ;;  %v1742_v32 = vpop.f32.mrf.mxu3 }
 0x1f7   : > { %v1694_v35 = vadd.f32 %v1693_v30, %v6168_v22  ;;  %v4820_v30 = vld [vmem:[#allocation2 + $0x300] sm:$0xf0] }
 0x1f8   : > { %v5289_v43 = vld [vmem:[#allocation2 + $0x344] sm:$0xf] }
 0x1f9   : > { %v1743_v41 = vadd.f32 %v1742_v32, %v1694_v35  ;;  %v4826_v32 = vld [vmem:[#allocation2 + $0x2d0] sm:$0xf]  ;;  %v5282_v35 = vld [vmem:[#allocation2 + $0x304] sm:$0xf0]  ;;  %v4884_v44 = vld [vmem:[#allocation2 + $0x378] sm:$0xf0] }
 0x1fb   : > { %v1794_v42 = vpop.f32.mrf.mxu0  ;;  %v1843_v51 = vpop.f32.mrf.mxu1  ;;  %v1792_v18 = vadd.f32 %v1791_v4, %v1743_v41  ;;  %1891 = vmatmul.bf16.gmra.mxu2 %v4707_v36  ;;  %1940 = vmatmul.bf16.gmra.mxu3 %v4711_v37  ;;  %v4767_v4 = vor.u32 %v5260_v56, %v4764_v2  ;;  %v5275_v36 = vld [vmem:[#allocation2 + $0x2d4] sm:$0xf]  ;;  %v4828_v37 = vld [vmem:[#allocation2 + $0x308] sm:$0xf0] }
 0x1fc   : > { %v4876_v2 = vld [vmem:[#allocation2 + $0x370] sm:$0xf0] }
 0x1fd   : > { %v6315_v45 = vadd.f32 %v1840_v10, %v1792_v18  ;;  %v4831_v18 = vor.u32 %v5275_v36, %v4828_v37 }
 0x1fe   : > { %1989 = vmatmul.bf16.gmra.mxu0 %v4715_v38  ;;  %2038 = vmatmul.bf16.gmra.mxu1 %v4719_v39  ;;  %v1696_v11 = vpop.f32.mrf.mxu2  ;;  %v1745_v22 = vpop.f32.mrf.mxu3 }
 0x1ff   : > { %v1697_v16 = vadd.f32 %v1696_v11, %v6175_v50  ;;  %v4770_v50 = vld [vmem:[#allocation2 + $0x260] sm:$0xf] }
 0x200   : > { %v4771_v10 = vor.u32 %v5268_v40, %v4770_v50  ;;  %v4882_v50 = vld [vmem:[#allocation2 + $0x340] sm:$0xf]  ;;  %v5296_v40 = vld [vmem:[#allocation2 + $0x374] sm:$0xf0] }
 0x201   : > { %v1746_v52 = vadd.f32 %v1745_v22, %v1697_v16 }
 0x203   : > { %v6320_v53 = vpop.f32.mrf.mxu0  ;;  %v6322_v54 = vpop.f32.mrf.mxu1  ;;  %v1795_v60 = vadd.f32 %v1794_v42, %v1746_v52  ;;  %v4823_v42 = vor.u32 %v5274_v9, %v4820_v30 }
 0x205   : > { %v6332_v33 = vadd.f32 %v1843_v51, %v1795_v60  ;;  %v4827_v51 = vor.u32 %v5282_v35, %v4826_v32  ;;  %v5288_v60 = vld [vmem:[#allocation2 + $0x33c] sm:$0xf] }
 0x206   : > { %v6334_v47 = vpop.f32.mrf.mxu2  ;;  %v6336_v6 = vpop.f32.mrf.mxu3 }
 0x20b   : > { %v1799_v34 = vpop.f32.mrf.mxu0  ;;  %v1848_v14 = vpop.f32.mrf.mxu1  ;;  %1896 = vmatmul.bf16.gmra.mxu2 %v4763_v8  ;;  %1945 = vmatmul.bf16.gmra.mxu3 %v4767_v4 }
 0x20e   : > { %1994 = vmatmul.bf16.gmra.mxu0 %v4771_v10  ;;  %2043 = vmatmul.bf16.gmra.mxu1 %v4775_v12  ;;  %v1701_v15 = vpop.f32.mrf.mxu2  ;;  %v1750_v17 = vpop.f32.mrf.mxu3  ;;  %v4879_v12 = vor.u32 %v5288_v60, %v4876_v2 }
 0x20f   : > { %v1702_v20 = vadd.f32 %v1701_v15, %v6195_v29  ;;  %v4819_v29 = vor.u32 %v5281_v0, %v4818_v27 }
 0x211   : > { %v1751_v21 = vadd.f32 %v1750_v17, %v1702_v20 }
 0x213   : > { %v6341_v23 = vpop.f32.mrf.mxu0  ;;  %v6343_v1 = vpop.f32.mrf.mxu1  ;;  %v1800_v24 = vadd.f32 %v1799_v34, %v1751_v21  ;;  %v4883_v34 = vor.u32 %v5296_v40, %v4882_v50 }
 0x215   : > { %v6345_v38 = vadd.f32 %v1848_v14, %v1800_v24  ;;  %v4887_v14 = vor.u32 %v5289_v43, %v4884_v44 }
 0x216   : > { %v6347_v39 = vpop.f32.mrf.mxu2  ;;  %v6349_v41 = vpop.f32.mrf.mxu3 }
 0x21b   : > { %v1804_v11 = vpop.f32.mrf.mxu0  ;;  %v1853_v22 = vpop.f32.mrf.mxu1  ;;  %1901 = vmatmul.bf16.gmra.mxu2 %v4819_v29  ;;  %1950 = vmatmul.bf16.gmra.mxu3 %v4823_v42 }
 0x21e   : > { %1999 = vmatmul.bf16.gmra.mxu0 %v4827_v51  ;;  %2048 = vmatmul.bf16.gmra.mxu1 %v4831_v18  ;;  %v1706_v16 = vpop.f32.mrf.mxu2  ;;  %v1755_v31 = vpop.f32.mrf.mxu3 }
 0x21f   : > { %v1707_v49 = vadd.f32 %v1706_v16, %v6213_v5  ;;  %v4875_v5 = vor.u32 %v5295_v61, %v4874_v59 }
 0x221   : > { %v1756_v52 = vadd.f32 %v1755_v31, %v1707_v49 }
 0x223   : > { %v6352_v55 = vpop.f32.mrf.mxu0  ;;  %v6354_v56 = vpop.f32.mrf.mxu1  ;;  %v1805_v58 = vadd.f32 %v1804_v11, %v1756_v52 }
 0x225   : > { %v6356_v8 = vadd.f32 %v1853_v22, %v1805_v58 }
 0x226   : > { %v6358_v4 = vpop.f32.mrf.mxu2  ;;  %v6360_v10 = vpop.f32.mrf.mxu3 }
 0x22b   : > { %v1809_v15 = vpop.f32.mrf.mxu0  ;;  %v1858_v17 = vpop.f32.mrf.mxu1  ;;  %1906 = vmatmul.bf16.gmra.mxu2 %v4875_v5  ;;  %1955 = vmatmul.bf16.gmra.mxu3 %v4879_v12 }
 0x22e   : > { %2004 = vmatmul.bf16.gmra.mxu0 %v4883_v34  ;;  %2053 = vmatmul.bf16.gmra.mxu1 %v4887_v14  ;;  %v1711_v20 = vpop.f32.mrf.mxu2  ;;  %v1760_v21 = vpop.f32.mrf.mxu3 }
 0x22f   : > { %v1712_v24 = vadd.f32 %v1711_v20, %v6231_v48 }
 0x231   : > { %v1761_v27 = vadd.f32 %v1760_v21, %v1712_v24 }
 0x233   : > { %v6363_v9 = vpop.f32.mrf.mxu0  ;;  %v6365_v0 = vpop.f32.mrf.mxu1  ;;  %v1810_v30 = vadd.f32 %v1809_v15, %v1761_v27 }
 0x235   : > { %v6367_v32 = vadd.f32 %v1858_v17, %v1810_v30 }
 0x236   : > { %v6369_v35 = vpop.f32.mrf.mxu2  ;;  %v6371_v36 = vpop.f32.mrf.mxu3 }
 0x23b   : > { %v1970_v37 = vpop.f32.mrf.mxu0  ;;  %v2019_v29 = vpop.f32.mrf.mxu1 }
 0x23e   : > { %v1872_v42 = vpop.f32.mrf.mxu2  ;;  %v1921_v51 = vpop.f32.mrf.mxu3 }
 0x23f   : > { %v1873_v18 = vadd.f32 %v1872_v42, %v6249_v26 }
 0x241   : > { %v1922_v11 = vadd.f32 %v1921_v51, %v1873_v18 }
 0x243   : > { %v1972_v48 = vpop.f32.mrf.mxu0  ;;  %v2021_v22 = vpop.f32.mrf.mxu1  ;;  %v1971_v16 = vadd.f32 %v1970_v37, %v1922_v11 }
 0x245   : > { %v2020_v31 = vadd.f32 %v2019_v29, %v1971_v16 }
 0x246   : > { %v1874_v49 = vpop.f32.mrf.mxu2  ;;  %v1923_v52 = vpop.f32.mrf.mxu3 }
 0x247   : > { %v4944_v58 = vmul.f32 -1.442695, %v2020_v31  ;;  %v1875_v59 = vadd.f32 %v1874_v49, %v6260_v13 }
 0x249   : > { %5414 = vpow2.f32 %v4944_v58  ;;  %v1924_v60 = vadd.f32 %v1923_v52, %v1875_v59 }
 0x24b   : > { %v1975_v61 = vpop.f32.mrf.mxu0  ;;  %v2024_v2 = vpop.f32.mrf.mxu1  ;;  %v1973_v50 = vadd.f32 %v1972_v48, %v1924_v60 }
 0x24d   : > { %v2022_v40 = vadd.f32 %v2021_v22, %v1973_v50 }
 0x24e   : > { %v1877_v43 = vpop.f32.mrf.mxu2  ;;  %v1926_v44 = vpop.f32.mrf.mxu3 }
 0x24f   : > { %v5415_v5 = vpop.eup %5414  ;;  %v4945_v26 = vmul.f32 -1.442695, %v2022_v40  ;;  %v1878_v12 = vadd.f32 %v1877_v43, %v6274_v7 }
 0x250   : > { %v2107_v34 = vadd.f32 1.0, %v5415_v5 }
 0x251   : > { %5416 = vpow2.f32 %v4945_v26  ;;  %v1927_v14 = vadd.f32 %v1926_v44, %v1878_v12 }
 0x252   : > { %5418 = vrcp.f32 %v2107_v34  ;;  %v2132_v44 = vand.u32 2147483647, %v2107_v34  ;;  %vm2128_vm6 = vweird.f32 %v2107_v34 }
 0x253   : > { %v1977_v15 = vpop.f32.mrf.mxu0  ;;  %v2026_v17 = vpop.f32.mrf.mxu1  ;;  %v1976_v20 = vadd.f32 %v1975_v61, %v1927_v14  ;;  %v2134_v14 = vand.u32 2147483648, %v2107_v34 }
 0x254   : > { %vm6385_vm9 = vcmp.eq.f32.partialorder %v2132_v44, 8.507059e+37 }
 0x255   : > { %v2025_v13 = vadd.f32 %v2024_v2, %v1976_v20 }
 0x256   : > { %v1879_v21 = vpop.f32.mrf.mxu2  ;;  %v1928_v24 = vpop.f32.mrf.mxu3 }
 0x257   : > { %v5417_v27 = vpop.eup %5416  ;;  %v4946_v30 = vmul.f32 -1.442695, %v2025_v13  ;;  %v1880_v37 = vadd.f32 %v1879_v21, %v6279_v62 }
 0x258   : > { %v5419_v29 = vpop.eup %5418  ;;  %v2108_v42 = vadd.f32 1.0, %v5417_v27 }
 0x259   : > { %v2124_v51 = vmul.f32 %v5419_v29, %v2107_v34  ;;  %5420 = vpow2.f32 %v4946_v30  ;;  %v1929_v18 = vadd.f32 %v1928_v24, %v1880_v37  ;;  %vm2129_vm5 = vweird.f32 %v5419_v29 }
 0x25a   : > { %5422 = vrcp.f32 %v2108_v42  ;;  %vm6381_vm8 = vmor %vm2128_vm6, %vm2129_vm5  ;;  %vm2143_vm10 = vweird.f32 %v2108_v42 }
 0x25b   : > { %v1980_v7 = vpop.f32.mrf.mxu0  ;;  %v2029_v11 = vpop.f32.mrf.mxu1  ;;  %v2125_v48 = vsub.f32 1.0, %v2124_v51  ;;  %v1978_v22 = vadd.f32 %v1977_v15, %v1929_v18  ;;  %v2147_v15 = vand.u32 2147483647, %v2108_v42 }
 0x25d   : > { %v2027_v16 = vadd.f32 %v2026_v17, %v1978_v22  ;;  %v2126_v58 = vmul.f32 %v5419_v29, %v2125_v48  ;;  %v2149_v17 = vand.u32 2147483648, %v2108_v42  ;;  %vm2148_vm12 = vcmp.eq.f32.partialorder %v2147_v15, 8.507059e+37 }
 0x25e   : > { %v1882_v31 = vpop.f32.mrf.mxu2  ;;  %v1931_v49 = vpop.f32.mrf.mxu3 }
 0x25f   : > { %v5421_v52 = vpop.eup %5420  ;;  %v4947_v59 = vmul.f32 -1.442695, %v2027_v16  ;;  %v1883_v60 = vadd.f32 %v1882_v31, %v6292_v25  ;;  %v2127_v5 = vadd.f32 %v5419_v29, %v2126_v58  ;;  %v2150_v48 = vor.u32 1.1754944e-38, %v2149_v17 }
 0x260   : > { %v5423_v61 = vpop.eup %5422  ;;  %v6378_v62 = vadd.f32 1.0, %v5421_v52 }
 0x261   : > { %v2139_v2 = vmul.f32 %v5423_v61, %v2108_v42  ;;  %5424 = vpow2.f32 %v4947_v59  ;;  %v1932_v50 = vadd.f32 %v1931_v49, %v1883_v60  ;;  %vm2144_vm7 = vweird.f32 %v5423_v61 }
 0x262   : > { %5426 = vrcp.f32 %v6378_v62  ;;  %v2131_v34 = vsel %vm6381_vm8, %v5419_v29, %v2127_v5  ;;  %vm2145_vm11 = vmor %vm2143_vm10, %vm2144_vm7  ;;  %vm2158_vm14 = vweird.f32 %v6378_v62 }
 0x263   : > { %v1982_v40 = vpop.f32.mrf.mxu0  ;;  %v2031_v43 = vpop.f32.mrf.mxu1  ;;  %v2140_v26 = vsub.f32 1.0, %v2139_v2  ;;  %v1981_v12 = vadd.f32 %v1980_v7, %v1932_v50 }
 0x265   : > { %v2141_v25 = vmul.f32 %v5423_v61, %v2140_v26  ;;  %v2030_v20 = vadd.f32 %v2029_v11, %v1981_v12  ;;  %v2135_v11 = vor.u32 1.1754944e-38, %v2134_v14 }
 0x266   : > { %v1884_v24 = vpop.f32.mrf.mxu2  ;;  %v1933_v27 = vpop.f32.mrf.mxu3 }
 0x267   : > { %v5425_v30 = vpop.eup %5424  ;;  %v4948_v37 = vmul.f32 -1.442695, %v2030_v20  ;;  %v1885_v51 = vadd.f32 %v1884_v24, %v6297_v3  ;;  %v2142_v18 = vadd.f32 %v5423_v61, %v2141_v25  ;;  %v2136_v3 = vsel %vm6385_vm9, %v2135_v11, %v2131_v34 }
 0x268   : > { %v6392_v7 = vpop.eup %5426  ;;  %v2110_v22 = vadd.f32 1.0, %v5425_v30  ;;  %v2164_v24 = vand.u32 2147483648, %v6378_v62  ;;  %v1699_v34 = vadd.f32 %v6334_v47, %v6178_v19 }
 0x269   : > { %5428 = vpow2.f32 %v4948_v37  ;;  %v1934_v16 = vadd.f32 %v1933_v27, %v1885_v51  ;;  %v2146_v49 = vsel %vm2145_vm11, %v5423_v61, %v2142_v18  ;;  %v2154_v52 = vmul.f32 %v6392_v7, %v6378_v62 }
 0x26a   : > { %5430 = vrcp.f32 %v2110_v22  ;;  %v2151_v29 = vsel %vm2148_vm12, %v2150_v48, %v2146_v49  ;;  %vm2159_vm13 = vweird.f32 %v6392_v7  ;;  %v2177_v27 = vand.u32 2147483647, %v2110_v22 }
 0x26b   : > { %v1985_v42 = vpop.f32.mrf.mxu0  ;;  %v2034_v31 = vpop.f32.mrf.mxu1  ;;  %v1983_v58 = vadd.f32 %v1982_v40, %v1934_v16  ;;  %v2366_v59 = vpack.c.bf16 %v2151_v29, %v2136_v3  ;;  %v2155_v60 = vsub.f32 1.0, %v2154_v52  ;;  %v2179_v30 = vand.u32 2147483648, %v2110_v22  ;;  %vm6411_vm0 = vmor %vm2158_vm14, %vm2159_vm13 }
 0x26c   : > { %vm2173_vm2 = vweird.f32 %v2110_v22  ;;  %v2165_v3 = vor.u32 1.1754944e-38, %v2164_v24  ;;  %vm2178_vm5 = vcmp.eq.f32.partialorder %v2177_v27, 8.507059e+37  ;;  %vm2795_vm14 = vcmask 1044480  }
 0x26d   : > { %v2032_v2 = vadd.f32 %v2031_v43, %v1983_v58  ;;  %4960 = vmatmul.msk.bf16.vlgmr.msra.gmra.mxu2 %vm2376_vm4, %v2366_v59  ;;  %v2156_v12 = vmul.f32 %v6392_v7, %v2155_v60  ;;  %v2162_v43 = vand.u32 2147483647, %v6378_v62  ;;  %v2180_v29 = vor.u32 1.1754944e-38, %v2179_v30 }
 0x26e   : > { %v1887_v50 = vpop.f32.mrf.mxu2  ;;  %v1936_v44 = vpop.f32.mrf.mxu3 }
 0x26f   : > { %v5429_v5 = vpop.eup %5428  ;;  %v4949_v26 = vmul.f32 -1.442695, %v2032_v2  ;;  %v1888_v61 = vadd.f32 %v1887_v50, %v6310_v28  ;;  %v2157_v21 = vadd.f32 %v6392_v7, %v2156_v12  ;;  %vm6415_vm1 = vcmp.eq.f32.partialorder %v2162_v43, 8.507059e+37 }
 0x270   : > { %v5431_v14 = vpop.eup %5430  ;;  %v6401_v15 = vadd.f32 1.0, %v5429_v5 }
 0x271   : > { %5432 = vpow2.f32 %v4949_v26  ;;  %v1937_v17 = vadd.f32 %v1936_v44, %v1888_v61  ;;  %v2169_v20 = vmul.f32 %v5431_v14, %v2110_v22  ;;  %vm2174_vm15 = vweird.f32 %v5431_v14 }
 0x272   : > { %5434 = vrcp.f32 %v6401_v15  ;;  %v2161_v49 = vsel %vm6411_vm0, %v6392_v7, %v2157_v21  ;;  %vm2175_vm3 = vmor %vm2173_vm2, %vm2174_vm15  ;;  %v1748_v26 = vadd.f32 %v6336_v6, %v1699_v34  ;;  %v2192_v30 = vand.u32 2147483647, %v6401_v15 }
 0x273   : > { %v1987_v25 = vpop.f32.mrf.mxu0  ;;  %v2036_v40 = vpop.f32.mrf.mxu1  ;;  %v1986_v13 = vadd.f32 %v1985_v42, %v1937_v17  ;;  %v2170_v28 = vsub.f32 1.0, %v2169_v20  ;;  %v2166_v7 = vsel %vm6415_vm1, %v2165_v3, %v2161_v49  ;;  %v2194_v34 = vand.u32 2147483648, %v6401_v15 }
 0x274   : > { %vm2188_vm7 = vweird.f32 %v6401_v15  ;;  %vm6456_vm10 = vcmp.eq.f32.partialorder %v2192_v30, 8.507059e+37  ;;  %v1709_v49 = vadd.f32 %v6358_v4, %v6218_v57 }
 0x275   : > { %v2035_v37 = vadd.f32 %v2034_v31, %v1986_v13  ;;  %v2171_v51 = vmul.f32 %v5431_v14, %v2170_v28  ;;  %v1797_v28 = vadd.f32 %v6320_v53, %v1748_v26 }
 0x276   : > { %v1889_v18 = vpop.f32.mrf.mxu2  ;;  %v1938_v11 = vpop.f32.mrf.mxu3 }
 0x277   : > { %v5433_v42 = vpop.eup %5432  ;;  %v4950_v31 = vmul.f32 -1.442695, %v2035_v37  ;;  %v1890_v62 = vadd.f32 %v1889_v18, %v6315_v45  ;;  %v2172_v19 = vadd.f32 %v5431_v14, %v2171_v51  ;;  %v1846_v53 = vadd.f32 %v6322_v54, %v1797_v28 }
 0x278   : > { %v6423_v47 = vpop.eup %5434  ;;  %v6425_v52 = vadd.f32 1.0, %v5433_v42  ;;  %v1704_v42 = vadd.f32 %v6347_v39, %v6200_v46 }
 0x279   : > { %5436 = vpow2.f32 %v4950_v31  ;;  %v1939_v22 = vadd.f32 %v1938_v11, %v1890_v62  ;;  %v2176_v60 = vsel %vm2175_vm3, %v5431_v14, %v2172_v19  ;;  %v2184_v45 = vmul.f32 %v6423_v47, %v6401_v15 }
 0x27a   : > { %5438 = vrcp.f32 %v6425_v52  ;;  %v2181_v2 = vsel %vm2178_vm5, %v2180_v29, %v2176_v60  ;;  %vm2189_vm6 = vweird.f32 %v6423_v47  ;;  %v2207_v18 = vand.u32 2147483647, %v6425_v52 }
 0x27b   : > { %v1990_v58 = vpop.f32.mrf.mxu0  ;;  %v2039_v59 = vpop.f32.mrf.mxu1  ;;  %v1988_v50 = vadd.f32 %v1987_v25, %v1939_v22  ;;  %v2367_v44 = vpack.c.bf16 %v2181_v2, %v2166_v7  ;;  %v2185_v5 = vsub.f32 1.0, %v2184_v45  ;;  %v2209_v11 = vand.u32 2147483648, %v6425_v52  ;;  %vm6452_vm9 = vmor %vm2188_vm7, %vm2189_vm6 }
 0x27c   : > { %vm2203_vm11 = vweird.f32 %v6425_v52  ;;  %vm2208_vm13 = vcmp.eq.f32.partialorder %v2207_v18, 8.507059e+37 }
 0x27d   : > { %v2037_v61 = vadd.f32 %v2036_v40, %v1988_v50  ;;  %4961 = vmatmul.msk.bf16.gmra.mxu2 %vm2376_vm4, %v2367_v44  ;;  %v2186_v13 = vmul.f32 %v6423_v47, %v2185_v5  ;;  %v2757_v44 = vld [vmem:[%s7696_s2 + $0x20] sm:$0xff]  ;;  %v2758_v5 = vld [vmem:[%s7696_s2 + $0x28] sm:$0x3] }
 0x27e   : > { %v1892_v12 = vpop.f32.mrf.mxu2  ;;  %v1941_v17 = vpop.f32.mrf.mxu3 }
 0x27f   : > { %v5437_v14 = vpop.eup %5436  ;;  %v4951_v20 = vmul.f32 -1.442695, %v2037_v61  ;;  %v1893_v43 = vadd.f32 %v1892_v12, %v6332_v33  ;;  %v2187_v33 = vadd.f32 %v6423_v47, %v2186_v13  ;;  %v2759_v12 = vpack.c.bf16 %v2758_v5, %v2757_v44 }
 0x280   : > { %v5439_v21 = vpop.eup %5438  ;;  %v6438_v24 = vadd.f32 1.0, %v5437_v14  ;;  %v1753_v14 = vadd.f32 %v6349_v41, %v1704_v42  ;;  %v1758_v5 = vadd.f32 %v6360_v10, %v1709_v49 }
 0x281   : > { %5440 = vpow2.f32 %v4951_v20  ;;  %v1942_v25 = vadd.f32 %v1941_v17, %v1893_v43  ;;  %v2199_v40 = vmul.f32 %v5439_v21, %v6425_v52  ;;  %vm2204_vm8 = vweird.f32 %v5439_v21 }
 0x282   : > { %5442 = vrcp.f32 %v6438_v24  ;;  %v2191_v29 = vsel %vm6452_vm9, %v6423_v47, %v2187_v33  ;;  %vm2205_vm12 = vmor %vm2203_vm11, %vm2204_vm8  ;;  %v2797_v43 = vsel %vm2795_vm14, %v2759_v12, 0  ;;  %vm2218_vm0 = vweird.f32 %v6438_v24 }
 0x283   : > { %v1992_v27 = vpop.f32.mrf.mxu0  ;;  %v2041_v6 = vpop.f32.mrf.mxu1  ;;  %v1991_v37 = vadd.f32 %v1990_v58, %v1942_v25  ;;  %v2200_v51 = vsub.f32 1.0, %v2199_v40  ;;  %v2195_v58 = vor.u32 1.1754944e-38, %v2194_v34  ;;  %2806 = vmatpush.bf16.msra.mxu3 %v2797_v43 }
 0x285   : > { %v2040_v48 = vadd.f32 %v2039_v59, %v1991_v37  ;;  %v2201_v16 = vmul.f32 %v5439_v21, %v2200_v51  ;;  %v2210_v59 = vor.u32 1.1754944e-38, %v2209_v11  ;;  %v2196_v47 = vsel %vm6456_vm10, %v2195_v58, %v2191_v29 }
 0x286   : > { %v1894_v31 = vpop.f32.mrf.mxu2  ;;  %v1943_v62 = vpop.f32.mrf.mxu3 }
 0x287   : > { %v5441_v19 = vpop.eup %5440  ;;  %v4952_v3 = vmul.f32 -1.442695, %v2040_v48  ;;  %v1895_v15 = vadd.f32 %v1894_v31, %v1846_v53  ;;  %v2202_v46 = vadd.f32 %v5439_v21, %v2201_v16  ;;  %v2222_v53 = vand.u32 2147483647, %v6438_v24 }
 0x288   : > { %v6464_v39 = vpop.eup %5442  ;;  %v6466_v22 = vadd.f32 1.0, %v5441_v19  ;;  %v2224_v48 = vand.u32 2147483648, %v6438_v24 }
 0x289   : > { %5444 = vpow2.f32 %v4952_v3  ;;  %v1944_v60 = vadd.f32 %v1943_v62, %v1895_v15  ;;  %v2206_v7 = vsel %vm2205_vm12, %v5439_v21, %v2202_v46  ;;  %v2214_v2 = vmul.f32 %v6464_v39, %v6438_v24 }
 0x28a   : > { %5446 = vrcp.f32 %v6466_v22  ;;  %v2211_v50 = vsel %vm2208_vm13, %v2210_v59, %v2206_v7  ;;  %vm2219_vm15 = vweird.f32 %v6464_v39  ;;  %v2237_v16 = vand.u32 2147483647, %v6466_v22 }
 0x28b   : > { %v1995_v52 = vpop.f32.mrf.mxu0  ;;  %v2044_v45 = vpop.f32.mrf.mxu1  ;;  %v1993_v26 = vadd.f32 %v1992_v27, %v1944_v60  ;;  %v2368_v61 = vpack.c.bf16 %v2211_v50, %v2196_v47  ;;  %v2215_v17 = vsub.f32 1.0, %v2214_v2  ;;  %v1802_v27 = vadd.f32 %v6341_v23, %v1753_v14  ;;  %vm6499_vm2 = vmor %vm2218_vm0, %vm2219_vm15 }
 0x28c   : > { %v2239_v42 = vand.u32 2147483648, %v6466_v22  ;;  %vm6503_vm3 = vcmp.eq.f32.partialorder %v2222_v53, 8.507059e+37  ;;  %vm2233_vm5 = vweird.f32 %v6466_v22  ;;  %v2225_v59 = vor.u32 1.1754944e-38, %v2224_v48 }
 0x28d   : > { %v2042_v20 = vadd.f32 %v2041_v6, %v1993_v26  ;;  %4962 = vmatmul.msk.bf16.gmra.mxu2 %vm2376_vm4, %v2368_v61  ;;  %v2216_v30 = vmul.f32 %v6464_v39, %v2215_v17  ;;  %v1851_v23 = vadd.f32 %v6343_v1, %v1802_v27  ;;  %vm2238_vm7 = vcmp.eq.f32.partialorder %v2237_v16, 8.507059e+37 }
 0x28e   : > { %v1897_v13 = vpop.f32.mrf.mxu2  ;;  %v1946_v21 = vpop.f32.mrf.mxu3  ;;  %v2240_v60 = vor.u32 1.1754944e-38, %v2239_v42 }
 0x28f   : > { %v5445_v28 = vpop.eup %5444  ;;  %v4953_v25 = vmul.f32 -1.442695, %v2042_v20  ;;  %v1898_v40 = vadd.f32 %v1897_v13, %v6345_v38  ;;  %v2217_v38 = vadd.f32 %v6464_v39, %v2216_v30 }
 0x290   : > { %v5447_v37 = vpop.eup %5446  ;;  %v6485_v33 = vadd.f32 1.0, %v5445_v28  ;;  %v1807_v28 = vadd.f32 %v6352_v55, %v1758_v5 }
 0x291   : > { %5448 = vpow2.f32 %v4953_v25  ;;  %v1947_v41 = vadd.f32 %v1946_v21, %v1898_v40  ;;  %v2229_v51 = vmul.f32 %v5447_v37, %v6466_v22  ;;  %vm2234_vm1 = vweird.f32 %v5447_v37 }
 0x292   : > { %5450 = vrcp.f32 %v6485_v33  ;;  %v2221_v46 = vsel %vm6499_vm2, %v6464_v39, %v2217_v38  ;;  %vm2235_vm6 = vmor %vm2233_vm5, %vm2234_vm1  ;;  %v2252_v30 = vand.u32 2147483647, %v6485_v33  ;;  %v2254_v55 = vand.u32 2147483648, %v6485_v33 }
 0x293   : > { %v1997_v6 = vpop.f32.mrf.mxu0  ;;  %v1996_v34 = vadd.f32 %v1995_v52, %v1947_v41  ;;  %v2046_v18 = vpop.f32.mrf.mxu1  ;;  %v2230_v11 = vsub.f32 1.0, %v2229_v51  ;;  %v2226_v39 = vsel %vm6503_vm3, %v2225_v59, %v2221_v46  ;;  %v1856_v41 = vadd.f32 %v6354_v56, %v1807_v28 }
 0x294   : > { %vm2248_vm9 = vweird.f32 %v6485_v33  ;;  %v1714_v38 = vadd.f32 %v6369_v35, %v6236_v63  ;;  %vm6544_vm12 = vcmp.eq.f32.partialorder %v2252_v30, 8.507059e+37 }
 0x295   : > { %v2045_v31 = vadd.f32 %v2044_v45, %v1996_v34  ;;  %v2231_v62 = vmul.f32 %v5447_v37, %v2230_v11 }
 0x296   : > { %v1899_v54 = vpop.f32.mrf.mxu2  ;;  %v1948_v19 = vpop.f32.mrf.mxu3 }
 0x297   : > { %v5449_v15 = vpop.eup %5448  ;;  %v4954_v29 = vmul.f32 -1.442695, %v2045_v31  ;;  %v1900_v24 = vadd.f32 %v1899_v54, %v1851_v23  ;;  %v2232_v57 = vadd.f32 %v5447_v37, %v2231_v62  ;;  %v2255_v54 = vor.u32 1.1754944e-38, %v2254_v55 }
 0x298   : > { %v6511_v4 = vpop.eup %5450  ;;  %v6513_v58 = vadd.f32 1.0, %v5449_v15 }
 0x299   : > { %5452 = vpow2.f32 %v4954_v29  ;;  %v1949_v52 = vadd.f32 %v1948_v19, %v1900_v24  ;;  %v2236_v22 = vsel %vm2235_vm6, %v5447_v37, %v2232_v57  ;;  %v2244_v45 = vmul.f32 %v6511_v4, %v6485_v33 }
 0x29a   : > { %5454 = vrcp.f32 %v6513_v58  ;;  %v2241_v7 = vsel %vm2238_vm7, %v2240_v60, %v2236_v22  ;;  %vm2249_vm8 = vweird.f32 %v6511_v4  ;;  %v2269_v51 = vand.u32 2147483648, %v6513_v58 }
 0x29b   : > { %v1998_v2 = vadd.f32 %v1997_v6, %v1949_v52  ;;  %v2000_v47 = vpop.f32.mrf.mxu0  ;;  %v2369_v50 = vpack.c.bf16 %v2241_v7, %v2226_v39  ;;  %v2245_v44 = vsub.f32 1.0, %v2244_v45  ;;  %v2049_v61 = vpop.f32.mrf.mxu1  ;;  %v2267_v6 = vand.u32 2147483647, %v6513_v58  ;;  %vm6540_vm11 = vmor %vm2248_vm9, %vm2249_vm8 }
 0x29c   : > { %vm2263_vm13 = vweird.f32 %v6513_v58  ;;  %v2270_v19 = vor.u32 1.1754944e-38, %v2269_v51 }
 0x29d   : > { %v2047_v26 = vadd.f32 %v2046_v18, %v1998_v2  ;;  %4963 = vmatmul.msk.bf16.gmra.mxu2 %vm2376_vm4, %v2369_v50  ;;  %v2246_v13 = vmul.f32 %v6511_v4, %v2245_v44  ;;  %vm2268_vm15 = vcmp.eq.f32.partialorder %v2267_v6, 8.507059e+37 }
 0x29e   : > { %v1902_v12 = vpop.f32.mrf.mxu2  ;;  %v1951_v17 = vpop.f32.mrf.mxu3 }
 0x29f   : > { %v5453_v14 = vpop.eup %5452  ;;  %v4955_v20 = vmul.f32 -1.442695, %v2047_v26  ;;  %v1903_v43 = vadd.f32 %v1902_v12, %v6356_v8  ;;  %v2247_v27 = vadd.f32 %v6511_v4, %v2246_v13 }
 0x2a0   : > { %v5455_v21 = vpop.eup %5454  ;;  %v6526_v25 = vadd.f32 1.0, %v5453_v14 }
 0x2a1   : > { %5456 = vpow2.f32 %v4955_v20  ;;  %v1952_v40 = vadd.f32 %v1951_v17, %v1903_v43  ;;  %v2259_v10 = vmul.f32 %v5455_v21, %v6513_v58  ;;  %vm2264_vm10 = vweird.f32 %v5455_v21 }
 0x2a2   : > { %5458 = vrcp.f32 %v6526_v25  ;;  %v2251_v31 = vsel %vm6540_vm11, %v6511_v4, %v2247_v27  ;;  %vm2265_vm14 = vmor %vm2263_vm13, %vm2264_vm10  ;;  %v1763_v58 = vadd.f32 %v6371_v36, %v1714_v38  ;;  %vm2278_vm1 = vweird.f32 %v6526_v25 }
 0x2a3   : > { %v2001_v37 = vadd.f32 %v2000_v47, %v1952_v40  ;;  %v2260_v8 = vsub.f32 1.0, %v2259_v10  ;;  %v2002_v34 = vpop.f32.mrf.mxu0  ;;  %v2051_v49 = vpop.f32.mrf.mxu1  ;;  %v2256_v29 = vsel %vm6544_vm12, %v2255_v54, %v2251_v31 }
 0x2a4   : > { %v1812_v47 = vadd.f32 %v6363_v9, %v1763_v58  ;;  %v2284_v9 = vand.u32 2147483648, %v6526_v25 }
 0x2a5   : > { %v2050_v53 = vadd.f32 %v2049_v61, %v2001_v37  ;;  %v2261_v18 = vmul.f32 %v5455_v21, %v2260_v8  ;;  %v2282_v61 = vand.u32 2147483647, %v6526_v25 }
 0x2a6   : > { %v1904_v11 = vpop.f32.mrf.mxu2  ;;  %v1953_v23 = vpop.f32.mrf.mxu3  ;;  %v1861_v14 = vadd.f32 %v6365_v0, %v1812_v47  ;;  %v2285_v6 = vor.u32 1.1754944e-38, %v2284_v9 }
 0x2a7   : > { %v5457_v16 = vpop.eup %5456  ;;  %v4956_v42 = vmul.f32 -1.442695, %v2050_v53  ;;  %v1905_v33 = vadd.f32 %v1904_v11, %v1856_v41  ;;  %v2262_v63 = vadd.f32 %v5455_v21, %v2261_v18  ;;  %vm6577_vm5 = vcmp.eq.f32.partialorder %v2282_v61, 8.507059e+37 }
 0x2a8   : > { %v6552_v35 = vpop.eup %5458  ;;  %v2118_v62 = vadd.f32 1.0, %v5457_v16 }
 0x2a9   : > { %5460 = vpow2.f32 %v4956_v42  ;;  %v1954_v3 = vadd.f32 %v1953_v23, %v1905_v33  ;;  %v2266_v1 = vsel %vm2265_vm14, %v5455_v21, %v2262_v63  ;;  %v2274_v15 = vmul.f32 %v6552_v35, %v6526_v25 }
 0x2aa   : > { %5462 = vrcp.f32 %v2118_v62  ;;  %v2271_v24 = vsel %vm2268_vm15, %v2270_v19, %v2266_v1  ;;  %vm2279_vm0 = vweird.f32 %v6552_v35  ;;  %v2297_v20 = vand.u32 2147483647, %v2118_v62 }
 0x2ab   : > { %v2003_v46 = vadd.f32 %v2002_v34, %v1954_v3  ;;  %v2370_v57 = vpack.c.bf16 %v2271_v24, %v2256_v29  ;;  %v2275_v4 = vsub.f32 1.0, %v2274_v15  ;;  %v2005_v44 = vpop.f32.mrf.mxu0  ;;  %v2054_v26 = vpop.f32.mrf.mxu1  ;;  %v2299_v43 = vand.u32 2147483648, %v2118_v62  ;;  %vm6573_vm3 = vmor %vm2278_vm1, %vm2279_vm0 }
 0x2ac   : > { %vm2293_vm6 = vweird.f32 %v2118_v62  ;;  %vm2298_vm8 = vcmp.eq.f32.partialorder %v2297_v20, 8.507059e+37 }
 0x2ad   : > { %v2052_v59 = vadd.f32 %v2051_v49, %v2003_v46  ;;  %4964 = vmatmul.msk.bf16.gmra.mxu2 %vm2376_vm4, %v2370_v57  ;;  %v2276_v7 = vmul.f32 %v6552_v35, %v2275_v4  ;;  %v2300_v51 = vor.u32 1.1754944e-38, %v2299_v43 }
 0x2ae   : > { %v1907_v60 = vpop.f32.mrf.mxu2  ;;  %v1956_v52 = vpop.f32.mrf.mxu3 }
 0x2af   : > { %v5461_v22 = vpop.eup %5460  ;;  %v4957_v45 = vmul.f32 -1.442695, %v2052_v59  ;;  %v1908_v39 = vadd.f32 %v1907_v60, %v6367_v32  ;;  %v2277_v17 = vadd.f32 %v6552_v35, %v2276_v7 }
 0x2b0   : > { %v5463_v2 = vpop.eup %5462  ;;  %v6564_v50 = vadd.f32 1.0, %v5461_v22 }
 0x2b1   : > { %5464 = vpow2.f32 %v4957_v45  ;;  %v1957_v5 = vadd.f32 %v1956_v52, %v1908_v39  ;;  %v2289_v36 = vmul.f32 %v5463_v2, %v2118_v62  ;;  %vm2294_vm2 = vweird.f32 %v5463_v2 }
 0x2b2   : > { %5466 = vrcp.f32 %v6564_v50  ;;  %v2281_v27 = vsel %vm6573_vm3, %v6552_v35, %v2277_v17  ;;  %vm2295_vm7 = vmor %vm2293_vm6, %vm2294_vm2  ;;  %vm2308_vm10 = vweird.f32 %v6564_v50  ;;  %v2314_v1 = vand.u32 2147483648, %v6564_v50 }
 0x2b3   : > { %v2006_v12 = vadd.f32 %v2005_v44, %v1957_v5  ;;  %v2290_v32 = vsub.f32 1.0, %v2289_v36  ;;  %v2007_v38 = vpop.f32.mrf.mxu0  ;;  %v2286_v11 = vsel %vm6577_vm5, %v2285_v6, %v2281_v27  ;;  %v2056_v42 = vpop.f32.mrf.mxu1  ;;  %v2312_v29 = vand.u32 2147483647, %v6564_v50 }
 0x2b4   : > { %v2315_v22 = vor.u32 1.1754944e-38, %v2314_v1 }
 0x2b5   : > { %v2055_v13 = vadd.f32 %v2054_v26, %v2006_v12  ;;  %v2291_v21 = vmul.f32 %v5463_v2, %v2290_v32  ;;  %vm2313_vm15 = vcmp.eq.f32.partialorder %v2312_v29, 8.507059e+37 }
 0x2b6   : > { %v1909_v28 = vpop.f32.mrf.mxu2  ;;  %v1958_v55 = vpop.f32.mrf.mxu3 }
 0x2b7   : > { %v5465_v0 = vpop.eup %5464  ;;  %v4958_v30 = vmul.f32 -1.442695, %v2055_v13  ;;  %v1910_v37 = vadd.f32 %v1909_v28, %v1861_v14  ;;  %v2292_v25 = vadd.f32 %v5463_v2, %v2291_v21 }
 0x2b8   : > { %v5467_v8 = vpop.eup %5466  ;;  %v2120_v41 = vadd.f32 1.0, %v5465_v0 }
 0x2b9   : > { %5468 = vpow2.f32 %v4958_v30  ;;  %v1959_v53 = vadd.f32 %v1958_v55, %v1910_v37  ;;  %v2296_v34 = vsel %vm2295_vm7, %v5463_v2, %v2292_v25  ;;  %v2304_v18 = vmul.f32 %v5467_v8, %v6564_v50  ;;  %v6602_v37 = vld [vmem:[%s7696_s2 + $0x18] ss:$0 sm:$0xff] }
 0x2ba   : > { %5470 = vrcp.f32 %v2120_v41  ;;  %v2301_v23 = vsel %vm2298_vm8, %v2300_v51, %v2296_v34  ;;  %vm2309_vm9 = vweird.f32 %v5467_v8  ;;  %v2329_v15 = vand.u32 2147483648, %v2120_v41 }
 0x2bb   : > { %v2008_v48 = vadd.f32 %v2007_v38, %v1959_v53  ;;  %v2371_v56 = vpack.c.bf16 %v2301_v23, %v2286_v11  ;;  %v2305_v16 = vsub.f32 1.0, %v2304_v18  ;;  %v2327_v46 = vand.u32 2147483647, %v2120_v41  ;;  %vm6591_vm12 = vmor %vm2308_vm10, %vm2309_vm9 }
 0x2bc   : > { %vm2323_vm13 = vweird.f32 %v2120_v41  ;;  %v2330_v45 = vor.u32 1.1754944e-38, %v2329_v15 }
 0x2bd   : > { %v2057_v33 = vadd.f32 %v2056_v42, %v2008_v48  ;;  %4965 = vmatmul.msk.bf16.gmra.mxu2 %vm2376_vm4, %v2371_v56  ;;  %v2306_v35 = vmul.f32 %v5467_v8, %v2305_v16  ;;  %vm2328_vm0 = vcmp.eq.f32.partialorder %v2327_v46, 8.507059e+37 }
 0x2bf   : > { %v5469_v31 = vpop.eup %5468  ;;  %v4959_v63 = vmul.f32 -1.442695, %v2057_v33  ;;  %v2307_v19 = vadd.f32 %v5467_v8, %v2306_v35 }
 0x2c0   : > { %v5471_v62 = vpop.eup %5470  ;;  %v2121_v49 = vadd.f32 1.0, %v5469_v31 }
 0x2c1   : > { %5472 = vpow2.f32 %v4959_v63  ;;  %v2319_v54 = vmul.f32 %v5471_v62, %v2120_v41  ;;  %vm2324_vm11 = vweird.f32 %v5471_v62  ;;  %v2311_v58 = vsel %vm6591_vm12, %v5467_v8, %v2307_v19 }
 0x2c2   : > { %5474 = vrcp.f32 %v2121_v49  ;;  %vm2325_vm14 = vmor %vm2323_vm13, %vm2324_vm11  ;;  %v2316_v2 = vsel %vm2313_vm15, %v2315_v22, %v2311_v58  ;;  %vm2338_vm2 = vweird.f32 %v2121_v49  ;;  %v2344_v17 = vand.u32 2147483648, %v2121_v49 }
 0x2c3   : > { %v2320_v3 = vsub.f32 1.0, %v2319_v54  ;;  %v2342_v14 = vand.u32 2147483647, %v2121_v49 }
 0x2c4   : > { %v2345_v21 = vor.u32 1.1754944e-38, %v2344_v17 }
 0x2c5   : > { %v2321_v24 = vmul.f32 %v5471_v62, %v2320_v3  ;;  %vm2343_vm8 = vcmp.eq.f32.partialorder %v2342_v14, 8.507059e+37 }
 0x2c7   : > { %v5473_v4 = vpop.eup %5472  ;;  %v2322_v59 = vadd.f32 %v5471_v62, %v2321_v24 }
 0x2c8   : > { %v5475_v60 = vpop.eup %5474  ;;  %v2122_v52 = vadd.f32 1.0, %v5473_v4 }
 0x2c9   : > { %v2326_v39 = vsel %vm2325_vm14, %v5471_v62, %v2322_v59  ;;  %v2334_v7 = vmul.f32 %v5475_v60, %v2121_v49  ;;  %vm2339_vm1 = vweird.f32 %v5475_v60 }
 0x2ca   : > { %5476 = vrcp.f32 %v2122_v52  ;;  %v2331_v47 = vsel %vm2328_vm0, %v2330_v45, %v2326_v39  ;;  %v2359_v32 = vand.u32 2147483648, %v2122_v52  ;;  %v2357_v20 = vand.u32 2147483647, %v2122_v52  ;;  %vm2340_vm5 = vmor %vm2338_vm2, %vm2339_vm1 }
 0x2cb   : > { %v2372_v50 = vpack.c.bf16 %v2331_v47, %v2316_v2  ;;  %v2335_v44 = vsub.f32 1.0, %v2334_v7  ;;  %vm2353_vm6 = vweird.f32 %v2122_v52  ;;  %vm2770_vm2 = vcmask 80896  }
 0x2cc   : > { %v2360_v28 = vor.u32 1.1754944e-38, %v2359_v32  ;;  %vm2358_vm9 = vcmp.eq.f32.partialorder %v2357_v20, 8.507059e+37 }
 0x2cd   : > { %4966 = vmatmul.msk.bf16.gmra.mxu2 %vm2376_vm4, %v2372_v50  ;;  %v2336_v5 = vmul.f32 %v5475_v60, %v2335_v44 }
 0x2cf   : > { %v2337_v61 = vadd.f32 %v5475_v60, %v2336_v5 }
 0x2d0   : > { %v5477_v36 = vpop.eup %5476 }
 0x2d1   : > { %v2349_v26 = vmul.f32 %v5477_v36, %v2122_v52  ;;  %vm2354_vm3 = vweird.f32 %v5477_v36  ;;  %v2341_v43 = vsel %vm2340_vm5, %v5475_v60, %v2337_v61 }
 0x2d2   : > { %vm2355_vm7 = vmor %vm2353_vm6, %vm2354_vm3  ;;  %v2346_v10 = vsel %vm2343_vm8, %v2345_v21, %v2341_v43 }
 0x2d3   : > { %v2350_v12 = vsub.f32 1.0, %v2349_v26 }
 0x2d5   : > { %v2351_v9 = vmul.f32 %v5477_v36, %v2350_v12 }
 0x2d7   : > { %v2352_v13 = vadd.f32 %v5477_v36, %v2351_v9 }
 0x2d9   : > { %v2356_v40 = vsel %vm2355_vm7, %v5477_v36, %v2352_v13 }
 0x2da   : > { %v2361_v0 = vsel %vm2358_vm9, %v2360_v28, %v2356_v40 }
 0x2db   : > { %v2373_v30 = vpack.c.bf16 %v2361_v0, %v2346_v10 }
 0x2dd   : > { %4967 = vmatmul.msk.bf16.gmra.mxu2 %vm2376_vm4, %v2373_v30 }
 0x2f0   : > { %v2413_v27 = vpop.f32.mrf.mxu2 }
 0x2f1   : > { %v2414_v25 = vadd.f32 %v6602_v37, %v2413_v27 }
 0x2f3   : > { %v4968_v8 = vmul.f32 -1.442695, %v2414_v25 }
 0x2f5   : > { %5478 = vpow2.f32 %v4968_v8 }
 0x2f8   : > { %v2415_v41 = vpop.f32.mrf.mxu2 }
 0x2f9   : > { %v2416_v55 = vadd.f32 %v6602_v37, %v2415_v41 }
 0x2fb   : > { %v5479_v6 = vpop.eup %5478  ;;  %v4969_v51 = vmul.f32 -1.442695, %v2416_v55 }
 0x2fc   : > { %v2501_v53 = vadd.f32 1.0, %v5479_v6 }
 0x2fd   : > { %5480 = vpow2.f32 %v4969_v51 }
 0x2fe   : > { %5482 = vrcp.f32 %v2501_v53  ;;  %vm2522_vm11 = vweird.f32 %v2501_v53  ;;  %v2526_v1 = vand.u32 2147483647, %v2501_v53  ;;  %v2528_v15 = vand.u32 2147483648, %v2501_v53 }
 0x300   : > { %v2418_v34 = vpop.f32.mrf.mxu2  ;;  %vm2527_vm15 = vcmp.eq.f32.partialorder %v2526_v1, 8.507059e+37  ;;  %v2529_v39 = vor.u32 1.1754944e-38, %v2528_v15 }
 0x301   : > { %v2419_v18 = vadd.f32 %v6602_v37, %v2418_v34 }
 0x303   : > { %v5481_v38 = vpop.eup %5480  ;;  %v4970_v11 = vmul.f32 -1.442695, %v2419_v18 }
 0x304   : > { %v5483_v23 = vpop.eup %5482  ;;  %v2502_v48 = vadd.f32 1.0, %v5481_v38 }
 0x305   : > { %v2518_v56 = vmul.f32 %v5483_v23, %v2501_v53  ;;  %5484 = vpow2.f32 %v4970_v11  ;;  %vm2523_vm10 = vweird.f32 %v5483_v23 }
 0x306   : > { %5486 = vrcp.f32 %v2502_v48  ;;  %v2543_v29 = vand.u32 2147483648, %v2502_v48  ;;  %v2541_v57 = vand.u32 2147483647, %v2502_v48  ;;  %vm6612_vm13 = vmor %vm2522_vm11, %vm2523_vm10  ;;  %vm2537_vm14 = vweird.f32 %v2502_v48 }
 0x307   : > { %v2519_v16 = vsub.f32 1.0, %v2518_v56 }
 0x308   : > { %v2420_v42 = vpop.f32.mrf.mxu2  ;;  %v2544_v7 = vor.u32 1.1754944e-38, %v2543_v29  ;;  %vm2542_vm1 = vcmp.eq.f32.partialorder %v2541_v57, 8.507059e+37 }
 0x309   : > { %v2421_v33 = vadd.f32 %v6602_v37, %v2420_v42  ;;  %v2520_v63 = vmul.f32 %v5483_v23, %v2519_v16 }
 0x30b   : > { %v5485_v31 = vpop.eup %5484  ;;  %v4971_v35 = vmul.f32 -1.442695, %v2421_v33  ;;  %v2521_v19 = vadd.f32 %v5483_v23, %v2520_v63 }
 0x30c   : > { %v5487_v62 = vpop.eup %5486  ;;  %v6608_v49 = vadd.f32 1.0, %v5485_v31 }
 0x30d   : > { %v2533_v54 = vmul.f32 %v5487_v62, %v2502_v48  ;;  %5488 = vpow2.f32 %v4971_v35  ;;  %vm2538_vm12 = vweird.f32 %v5487_v62  ;;  %v2525_v60 = vsel %vm6612_vm13, %v5483_v23, %v2521_v19 }
 0x30e   : > { %5490 = vrcp.f32 %v6608_v49  ;;  %vm2539_vm0 = vmor %vm2537_vm14, %vm2538_vm12  ;;  %v2530_v44 = vsel %vm2527_vm15, %v2529_v39, %v2525_v60  ;;  %vm2552_vm5 = vweird.f32 %v6608_v49  ;;  %v2556_v40 = vand.u32 2147483647, %v6608_v49 }
 0x30f   : > { %v2534_v3 = vsub.f32 1.0, %v2533_v54  ;;  %v2558_v10 = vand.u32 2147483648, %v6608_v49 }
 0x310   : > { %v2423_v24 = vpop.f32.mrf.mxu2  ;;  %vm2557_vm9 = vcmp.eq.f32.partialorder %v2556_v40, 8.507059e+37 }
 0x311   : > { %v2535_v46 = vmul.f32 %v5487_v62, %v2534_v3  ;;  %v2424_v4 = vadd.f32 %v6602_v37, %v2423_v24  ;;  %v2559_v18 = vor.u32 1.1754944e-38, %v2558_v10 }
 0x313   : > { %v5489_v59 = vpop.eup %5488  ;;  %v2536_v52 = vadd.f32 %v5487_v62, %v2535_v46  ;;  %v4972_v22 = vmul.f32 -1.442695, %v2424_v4 }
 0x314   : > { %v5491_v45 = vpop.eup %5490  ;;  %v2504_v2 = vadd.f32 1.0, %v5489_v59 }
 0x315   : > { %v2540_v47 = vsel %vm2539_vm0, %v5487_v62, %v2536_v52  ;;  %v2548_v50 = vmul.f32 %v5491_v45, %v6608_v49  ;;  %5492 = vpow2.f32 %v4972_v22  ;;  %vm2553_vm3 = vweird.f32 %v5491_v45 }
 0x316   : > { %5494 = vrcp.f32 %v2504_v2  ;;  %v2545_v5 = vsel %vm2542_vm1, %v2544_v7, %v2540_v47  ;;  %v2573_v0 = vand.u32 2147483648, %v2504_v2  ;;  %v2571_v25 = vand.u32 2147483647, %v2504_v2  ;;  %vm6628_vm7 = vmor %vm2552_vm5, %vm2553_vm3 }
 0x317   : > { %v2549_v36 = vsub.f32 1.0, %v2548_v50  ;;  %v2760_v26 = vpack.c.bf16 %v2545_v5, %v2530_v44  ;;  %vm2567_vm8 = vweird.f32 %v2504_v2 }
 0x318   : > { %v2425_v61 = vpop.f32.mrf.mxu2  ;;  %v2574_v38 = vor.u32 1.1754944e-38, %v2573_v0  ;;  %vm2572_vm11 = vcmp.eq.f32.partialorder %v2571_v25, 8.507059e+37 }
 0x319   : > { %v2426_v12 = vadd.f32 %v6602_v37, %v2425_v61  ;;  %4984 = vmatmul.msk.bf16.vlgmr.msra.gmra.mxu3 %vm2770_vm2, %v2760_v26  ;;  %v2550_v14 = vmul.f32 %v5491_v45, %v2549_v36 }
 0x31b   : > { %v5493_v17 = vpop.eup %5492  ;;  %v4973_v32 = vmul.f32 -1.442695, %v2426_v12  ;;  %v2551_v21 = vadd.f32 %v5491_v45, %v2550_v14  ;;  %v3174_v12 = vld [vmem:[#allocation8 + $0x70] sm:$0x33] }
 0x31c   : > { %v5495_v9 = vpop.eup %5494  ;;  %v6621_v20 = vadd.f32 1.0, %v5493_v17  ;;  %v3263_v14 = vunpack.c.h.b16 %v3174_v12 }
 0x31d   : > { %v2563_v43 = vmul.f32 %v5495_v9, %v2504_v2  ;;  %5496 = vpow2.f32 %v4973_v32  ;;  %vm2568_vm6 = vweird.f32 %v5495_v9  ;;  %v2555_v6 = vsel %vm6628_vm7, %v5491_v45, %v2551_v21 }
 0x31e   : > { %5498 = vrcp.f32 %v6621_v20  ;;  %vm2569_vm10 = vmor %vm2567_vm8, %vm2568_vm6  ;;  %v2560_v48 = vsel %vm2557_vm9, %v2559_v18, %v2555_v6  ;;  %vm2582_vm13 = vweird.f32 %v6621_v20  ;;  %v2586_v29 = vand.u32 2147483647, %v6621_v20 }
 0x31f   : > { %v2564_v13 = vsub.f32 1.0, %v2563_v43  ;;  %v2588_v24 = vand.u32 2147483648, %v6621_v20  ;;  %v3262_v32 = vunpack.c.l.b16 %v3174_v12  ;;  %vm3342_vm6 = vcmask 1041408  }
 0x320   : > { %v2428_v28 = vpop.f32.mrf.mxu2  ;;  %vm2587_vm1 = vcmp.eq.f32.partialorder %v2586_v29, 8.507059e+37  ;;  %v3291_v43 = vpack.c.b16 %v3263_v14, %v3263_v14 }
 0x321   : > { %v2429_v30 = vadd.f32 %v6602_v37, %v2428_v28  ;;  %v2565_v27 = vmul.f32 %v5495_v9, %v2564_v13  ;;  %v2589_v2 = vor.u32 1.1754944e-38, %v2588_v24 }
 0x323   : > { %v5497_v41 = vpop.eup %5496  ;;  %v4974_v55 = vmul.f32 -1.442695, %v2429_v30  ;;  %v2566_v51 = vadd.f32 %v5495_v9, %v2565_v27  ;;  %v3347_v30 = vsel %vm3342_vm6, %v3291_v43, 0 }
 0x324   : > { %v5499_v53 = vpop.eup %5498  ;;  %v2506_v34 = vadd.f32 1.0, %v5497_v41  ;;  %3440 = vmatpush.bf16.msra.mxu1 %v3347_v30 }
 0x325   : > { %v2578_v11 = vmul.f32 %v5499_v53, %v6621_v20  ;;  %5500 = vpow2.f32 %v4974_v55  ;;  %v2570_v23 = vsel %vm2569_vm10, %v5495_v9, %v2566_v51  ;;  %vm2583_vm12 = vweird.f32 %v5499_v53 }
 0x326   : > { %5502 = vrcp.f32 %v2506_v34  ;;  %v2575_v56 = vsel %vm2572_vm11, %v2574_v38, %v2570_v23  ;;  %v2603_v46 = vand.u32 2147483648, %v2506_v34  ;;  %v2601_v58 = vand.u32 2147483647, %v2506_v34  ;;  %vm6644_vm15 = vmor %vm2582_vm13, %vm2583_vm12 }
 0x327   : > { %v2579_v16 = vsub.f32 1.0, %v2578_v11  ;;  %v2761_v42 = vpack.c.bf16 %v2575_v56, %v2560_v48  ;;  %vm2597_vm0 = vweird.f32 %v2506_v34  ;;  %v3290_v20 = vpack.c.b16 %v3262_v32, %v3262_v32 }
 0x328   : > { %v2430_v33 = vpop.f32.mrf.mxu2  ;;  %v2604_v47 = vor.u32 1.1754944e-38, %v2603_v46  ;;  %vm2602_vm5 = vcmp.eq.f32.partialorder %v2601_v58, 8.507059e+37 }
 0x329   : > { %v2431_v31 = vadd.f32 %v6602_v37, %v2430_v33  ;;  %4985 = vmatmul.msk.bf16.gmra.mxu3 %vm2770_vm2, %v2761_v42  ;;  %v2580_v62 = vmul.f32 %v5499_v53, %v2579_v16  ;;  %v3344_v0 = vsel %vm3342_vm6, %v3290_v20, 0 }
 0x32a   : > { %3391 = vmatpush.bf16.msra.mxu0 %v3344_v0 }
 0x32b   : > { %v5501_v63 = vpop.eup %5500  ;;  %v4975_v35 = vmul.f32 -1.442695, %v2431_v31  ;;  %v2581_v1 = vadd.f32 %v5499_v53, %v2580_v62 }
 0x32c   : > { %v5503_v49 = vpop.eup %5502  ;;  %v6637_v54 = vadd.f32 1.0, %v5501_v63 }
 0x32d   : > { %v2593_v19 = vmul.f32 %v5503_v49, %v2506_v34  ;;  %5504 = vpow2.f32 %v4975_v35  ;;  %vm2598_vm14 = vweird.f32 %v5503_v49  ;;  %v2585_v22 = vsel %vm6644_vm15, %v5499_v53, %v2581_v1 }
 0x32e   : > { %5506 = vrcp.f32 %v6637_v54  ;;  %vm2599_vm3 = vmor %vm2597_vm0, %vm2598_vm14  ;;  %v2590_v5 = vsel %vm2587_vm1, %v2589_v2, %v2585_v22  ;;  %vm2612_vm8 = vweird.f32 %v6637_v54  ;;  %v2616_v55 = vand.u32 2147483647, %v6637_v54 }
 0x32f   : > { %v2594_v3 = vsub.f32 1.0, %v2593_v19  ;;  %v2618_v6 = vand.u32 2147483648, %v6637_v54 }
 0x330   : > { %v2433_v15 = vpop.f32.mrf.mxu2  ;;  %vm2617_vm12 = vcmp.eq.f32.partialorder %v2616_v55, 8.507059e+37 }
 0x331   : > { %v2434_v57 = vadd.f32 %v6602_v37, %v2433_v15  ;;  %v2595_v4 = vmul.f32 %v5503_v49, %v2594_v3  ;;  %v2619_v33 = vor.u32 1.1754944e-38, %v2618_v6 }
 0x333   : > { %v5505_v60 = vpop.eup %5504  ;;  %v4976_v52 = vmul.f32 -1.442695, %v2434_v57  ;;  %v2596_v45 = vadd.f32 %v5503_v49, %v2595_v4 }
 0x334   : > { %v6650_v39 = vpop.eup %5506  ;;  %v6652_v7 = vadd.f32 1.0, %v5505_v60 }
 0x335   : > { %v2608_v50 = vmul.f32 %v6650_v39, %v6637_v54  ;;  %5508 = vpow2.f32 %v4976_v52  ;;  %v2600_v44 = vsel %vm2599_vm3, %v5503_v49, %v2596_v45  ;;  %vm2613_vm7 = vweird.f32 %v6650_v39 }
 0x336   : > { %5510 = vrcp.f32 %v6652_v7  ;;  %v2605_v36 = vsel %vm2602_vm5, %v2604_v47, %v2600_v44  ;;  %v2633_v51 = vand.u32 2147483648, %v6652_v7  ;;  %v2631_v18 = vand.u32 2147483647, %v6652_v7  ;;  %vm6674_vm10 = vmor %vm2612_vm8, %vm2613_vm7 }
 0x337   : > { %v2609_v26 = vsub.f32 1.0, %v2608_v50  ;;  %v2762_v61 = vpack.c.bf16 %v2605_v36, %v2590_v5  ;;  %vm2627_vm11 = vweird.f32 %v6652_v7 }
 0x338   : > { %v2435_v17 = vpop.f32.mrf.mxu2  ;;  %v2634_v31 = vor.u32 1.1754944e-38, %v2633_v51  ;;  %vm2632_vm14 = vcmp.eq.f32.partialorder %v2631_v18, 8.507059e+37  ;;  %v5010_v51 = vld [vmem:[#allocation8] sm:$0xf] }
 0x339   : > { %v2436_v9 = vadd.f32 %v6602_v37, %v2435_v17  ;;  %4986 = vmatmul.msk.bf16.gmra.mxu3 %vm2770_vm2, %v2762_v61  ;;  %v2610_v28 = vmul.f32 %v6650_v39, %v2609_v26 }
 0x33b   : > { %v5509_v13 = vpop.eup %5508  ;;  %v4977_v21 = vmul.f32 -1.442695, %v2436_v9  ;;  %v2611_v8 = vadd.f32 %v6650_v39, %v2610_v28 }
 0x33c   : > { %v5511_v40 = vpop.eup %5510  ;;  %v6660_v10 = vadd.f32 1.0, %v5509_v13 }
 0x33d   : > { %v2623_v27 = vmul.f32 %v5511_v40, %v6652_v7  ;;  %5512 = vpow2.f32 %v4977_v21  ;;  %vm2628_vm9 = vweird.f32 %v5511_v40  ;;  %v2615_v48 = vsel %vm6674_vm10, %v6650_v39, %v2611_v8 }
 0x33e   : > { %5514 = vrcp.f32 %v6660_v10  ;;  %vm2629_vm13 = vmor %vm2627_vm11, %vm2628_vm9  ;;  %v2620_v62 = vsel %vm2617_vm12, %v2619_v33, %v2615_v48  ;;  %vm2642_vm0 = vweird.f32 %v6660_v10  ;;  %v2646_v52 = vand.u32 2147483647, %v6660_v10  ;;  %v5012_v48 = vld [vmem:[#allocation8 + $0x38] sm:$0xf0] }
 0x33f   : > { %v2624_v25 = vsub.f32 1.0, %v2623_v27  ;;  %v2648_v22 = vand.u32 2147483648, %v6660_v10 }
 0x340   : > { %v2438_v41 = vpop.f32.mrf.mxu2  ;;  %vm2647_vm7 = vcmp.eq.f32.partialorder %v2646_v52, 8.507059e+37 }
 0x341   : > { %v2439_v53 = vadd.f32 %v6602_v37, %v2438_v41  ;;  %v2625_v34 = vmul.f32 %v5511_v40, %v2624_v25  ;;  %v2649_v12 = vor.u32 1.1754944e-38, %v2648_v22 }
 0x343   : > { %v5513_v11 = vpop.eup %5512  ;;  %v4978_v23 = vmul.f32 -1.442695, %v2439_v53  ;;  %v2626_v56 = vadd.f32 %v5511_v40, %v2625_v34  ;;  %v5318_v53 = vld [vmem:[#allocation8 + $0x34] sm:$0xf0] }
 0x344   : > { %v5515_v16 = vpop.eup %5514  ;;  %v2510_v42 = vadd.f32 1.0, %v5513_v11  ;;  %v5011_v11 = vor.u32 %v5318_v53, %v5010_v51 }
 0x345   : > { %v2638_v63 = vmul.f32 %v5515_v16, %v6660_v10  ;;  %5516 = vpow2.f32 %v4978_v23  ;;  %v2630_v35 = vsel %vm2629_vm13, %v5511_v40, %v2626_v56  ;;  %vm2643_vm15 = vweird.f32 %v5515_v16  ;;  %v5311_v23 = vld [vmem:[#allocation8 + $0x4] sm:$0xf] }
 0x346   : > { %5518 = vrcp.f32 %v2510_v42  ;;  %v2635_v49 = vsel %vm2632_vm14, %v2634_v31, %v2630_v35  ;;  %v2663_v45 = vand.u32 2147483648, %v2510_v42  ;;  %v2661_v2 = vand.u32 2147483647, %v2510_v42  ;;  %vm6692_vm3 = vmor %vm2642_vm0, %vm2643_vm15  ;;  %3392 = vmatpush.bf16.msra.mxu0 %v5011_v11 }
 0x347   : > { %v2639_v54 = vsub.f32 1.0, %v2638_v63  ;;  %v2763_v19 = vpack.c.bf16 %v2635_v49, %v2620_v62  ;;  %vm2657_vm5 = vweird.f32 %v2510_v42 }
 0x348   : > { %v2440_v3 = vpop.f32.mrf.mxu2  ;;  %v2664_v17 = vor.u32 1.1754944e-38, %v2663_v45  ;;  %vm2662_vm9 = vcmp.eq.f32.partialorder %v2661_v2, 8.507059e+37 }
 0x349   : > { %v2441_v1 = vadd.f32 %v6602_v37, %v2440_v3  ;;  %4987 = vmatmul.msk.bf16.gmra.mxu3 %vm2770_vm2, %v2763_v19  ;;  %v2640_v24 = vmul.f32 %v5515_v16, %v2639_v54 }
 0x34b   : > { %v5517_v15 = vpop.eup %5516  ;;  %v4979_v29 = vmul.f32 -1.442695, %v2441_v1  ;;  %v2641_v59 = vadd.f32 %v5515_v16, %v2640_v24 }
 0x34c   : > { %v5519_v46 = vpop.eup %5518  ;;  %v6685_v57 = vadd.f32 1.0, %v5517_v15 }
 0x34d   : > { %v2653_v4 = vmul.f32 %v5519_v46, %v2510_v42  ;;  %5520 = vpow2.f32 %v4979_v29  ;;  %vm2658_vm1 = vweird.f32 %v5519_v46  ;;  %v2645_v5 = vsel %vm6692_vm3, %v5515_v16, %v2641_v59 }
 0x34e   : > { %5522 = vrcp.f32 %v6685_v57  ;;  %vm2659_vm8 = vmor %vm2657_vm5, %vm2658_vm1  ;;  %v2650_v9 = vsel %vm2647_vm7, %v2649_v12, %v2645_v5  ;;  %v2676_v8 = vand.u32 2147483647, %v6685_v57  ;;  %vm2672_vm11 = vweird.f32 %v6685_v57 }
 0x34f   : > { %v2654_v58 = vsub.f32 1.0, %v2653_v4  ;;  %v2678_v18 = vand.u32 2147483648, %v6685_v57  ;;  %v5015_v42 = vor.u32 %v5311_v23, %v5012_v48 }
 0x350   : > { %v2443_v60 = vpop.f32.mrf.mxu2  ;;  %vm2677_vm15 = vcmp.eq.f32.partialorder %v2676_v8, 8.507059e+37 }
 0x351   : > { %v2444_v39 = vadd.f32 %v6602_v37, %v2443_v60  ;;  %v2655_v7 = vmul.f32 %v5519_v46, %v2654_v58  ;;  %3441 = vmatpush.bf16.msra.mxu1 %v5015_v42  ;;  %v2679_v19 = vor.u32 1.1754944e-38, %v2678_v18  ;;  %v3175_v42 = vld [vmem:[#allocation8 + $0x78] sm:$0x33] }
 0x352   : > { %v3264_v33 = vunpack.c.l.b16 %v3175_v42 }
 0x353   : > { %v5521_v50 = vpop.eup %5520  ;;  %v4980_v44 = vmul.f32 -1.442695, %v2444_v39  ;;  %v2656_v36 = vadd.f32 %v5519_v46, %v2655_v7 }
 0x354   : > { %v6698_v26 = vpop.eup %5522  ;;  %v2512_v61 = vadd.f32 1.0, %v5521_v50 }
 0x355   : > { %v2668_v32 = vmul.f32 %v6698_v26, %v6685_v57  ;;  %5524 = vpow2.f32 %v4980_v44  ;;  %v2660_v14 = vsel %vm2659_vm8, %v5519_v46, %v2656_v36  ;;  %vm2673_vm10 = vweird.f32 %v6698_v26 }
 0x356   : > { %5526 = vrcp.f32 %v2512_v61  ;;  %v2665_v20 = vsel %vm2662_vm9, %v2664_v17, %v2660_v14  ;;  %v2691_v41 = vand.u32 2147483647, %v2512_v61  ;;  %v2693_v38 = vand.u32 2147483648, %v2512_v61  ;;  %vm6714_vm13 = vmor %vm2672_vm11, %vm2673_vm10 }
 0x357   : > { %v2669_v43 = vsub.f32 1.0, %v2668_v32  ;;  %v2764_v13 = vpack.c.bf16 %v2665_v20, %v2650_v9  ;;  %vm2687_vm14 = vweird.f32 %v2512_v61 }
 0x358   : > { %v2445_v21 = vpop.f32.mrf.mxu2  ;;  %v2694_v3 = vor.u32 1.1754944e-38, %v2693_v38  ;;  %vm2692_vm1 = vcmp.eq.f32.partialorder %v2691_v41, 8.507059e+37 }
 0x359   : > { %v2446_v28 = vadd.f32 %v6602_v37, %v2445_v21  ;;  %4988 = vmatmul.msk.bf16.gmra.mxu3 %vm2770_vm2, %v2764_v13  ;;  %v2670_v0 = vmul.f32 %v6698_v26, %v2669_v43 }
 0x35b   : > { %v5525_v40 = vpop.eup %5524  ;;  %v4981_v10 = vmul.f32 -1.442695, %v2446_v28  ;;  %v2671_v6 = vadd.f32 %v6698_v26, %v2670_v0 }
 0x35c   : > { %v5527_v30 = vpop.eup %5526  ;;  %v6705_v27 = vadd.f32 1.0, %v5525_v40 }
 0x35d   : > { %v2683_v25 = vmul.f32 %v5527_v30, %v2512_v61  ;;  %5528 = vpow2.f32 %v4981_v10  ;;  %vm2688_vm12 = vweird.f32 %v5527_v30  ;;  %v2675_v35 = vsel %vm6714_vm13, %v6698_v26, %v2671_v6 }
 0x35e   : > { %5530 = vrcp.f32 %v6705_v27  ;;  %vm2689_vm0 = vmor %vm2687_vm14, %vm2688_vm12  ;;  %v2680_v29 = vsel %vm2677_vm15, %v2679_v19, %v2675_v35  ;;  %vm2702_vm5 = vweird.f32 %v6705_v27  ;;  %v2708_v47 = vand.u32 2147483648, %v6705_v27 }
 0x35f   : > { %v2684_v55 = vsub.f32 1.0, %v2683_v25 }
 0x360   : > { %v2448_v34 = vpop.f32.mrf.mxu2  ;;  %v2709_v14 = vor.u32 1.1754944e-38, %v2708_v47 }
 0x361   : > { %v2449_v56 = vadd.f32 %v6602_v37, %v2448_v34  ;;  %v2685_v16 = vmul.f32 %v5527_v30, %v2684_v55 }
 0x363   : > { %v5529_v31 = vpop.eup %5528  ;;  %v4982_v63 = vmul.f32 -1.442695, %v2449_v56  ;;  %v2686_v62 = vadd.f32 %v5527_v30, %v2685_v16  ;;  %v6738_v16 = vld [vmem:[%s7696_s2 + $0x30] ss:$0 sm:$0xff] }
 0x364   : > { %v5531_v49 = vpop.eup %5530  ;;  %v2514_v54 = vadd.f32 1.0, %v5529_v31  ;;  %v3265_v31 = vunpack.c.h.b16 %v3175_v42 }
 0x365   : > { %v2698_v1 = vmul.f32 %v5531_v49, %v6705_v27  ;;  %5532 = vpow2.f32 %v4982_v63  ;;  %v2690_v15 = vsel %vm2689_vm0, %v5527_v30, %v2686_v62  ;;  %vm2703_vm3 = vweird.f32 %v5531_v49 }
 0x366   : > { %5534 = vrcp.f32 %v2514_v54  ;;  %v2695_v24 = vsel %vm2692_vm1, %v2694_v3, %v2690_v15  ;;  %v2723_v50 = vand.u32 2147483648, %v2514_v54  ;;  %v2721_v5 = vand.u32 2147483647, %v2514_v54  ;;  %vm6727_vm8 = vmor %vm2702_vm5, %vm2703_vm3  ;;  %v5319_v15 = vld [vmem:[#allocation8 + $0x3c] sm:$0xf0] }
 0x367   : > { %v2699_v46 = vsub.f32 1.0, %v2698_v1  ;;  %v2765_v57 = vpack.c.bf16 %v2695_v24, %v2680_v29  ;;  %vm2717_vm9 = vweird.f32 %v2514_v54  ;;  %v3292_v62 = vpack.c.b16 %v3264_v33, %v3264_v33  ;;  %v5018_v1 = vld [vmem:[#allocation8 + $0x8] sm:$0xf]  ;;  %v5312_v29 = vld [vmem:[#allocation8 + $0xc] sm:$0xf] }
 0x368   : > { %v2450_v4 = vpop.f32.mrf.mxu2  ;;  %v2724_v9 = vor.u32 1.1754944e-38, %v2723_v50  ;;  %vm2722_vm12 = vcmp.eq.f32.partialorder %v2721_v5, 8.507059e+37  ;;  %v5019_v24 = vor.u32 %v5319_v15, %v5018_v1 }
 0x369   : > { %v2451_v58 = vadd.f32 %v6602_v37, %v2450_v4  ;;  %4989 = vmatmul.msk.bf16.gmra.mxu3 %vm2770_vm2, %v2765_v57  ;;  %v2700_v52 = vmul.f32 %v5531_v49, %v2699_v46  ;;  %v2706_v37 = vand.u32 2147483647, %v6705_v27  ;;  %v3350_v19 = vsel %vm3342_vm6, %v3292_v62, 0  ;;  %v5020_v46 = vld [vmem:[#allocation8 + $0x40] sm:$0xf0] }
 0x36a   : > { %3489 = vmatpush.bf16.msrb.mxu2 %v3350_v19  ;;  %v5023_v57 = vor.u32 %v5312_v29, %v5020_v46 }
 0x36b   : > { %v5533_v59 = vpop.eup %5532  ;;  %v4983_v60 = vmul.f32 -1.442695, %v2451_v58  ;;  %v2701_v2 = vadd.f32 %v5531_v49, %v2700_v52  ;;  %vm2707_vm11 = vcmp.eq.f32.partialorder %v2706_v37, 8.507059e+37 }
 0x36c   : > { %v5535_v22 = vpop.eup %5534  ;;  %v2515_v45 = vadd.f32 1.0, %v5533_v59 }
 0x36d   : > { %v2713_v39 = vmul.f32 %v5535_v22, %v2514_v54  ;;  %5536 = vpow2.f32 %v4983_v60  ;;  %vm2718_vm7 = vweird.f32 %v5535_v22  ;;  %v2705_v61 = vsel %vm6727_vm8, %v5531_v49, %v2701_v2 }
 0x36e   : > { %5538 = vrcp.f32 %v2515_v45  ;;  %vm2719_vm10 = vmor %vm2717_vm9, %vm2718_vm7  ;;  %v2710_v13 = vsel %vm2707_vm11, %v2709_v14, %v2705_v61  ;;  %vm2732_vm14 = vweird.f32 %v2515_v45  ;;  %v2738_v8 = vand.u32 2147483648, %v2515_v45  ;;  %3490 = vmatpush.bf16.msrb.mxu2 %v5019_v24 }
 0x36f   : > { %v2714_v7 = vsub.f32 1.0, %v2713_v39  ;;  %v2736_v55 = vand.u32 2147483647, %v2515_v45  ;;  %v3293_v49 = vpack.c.b16 %v3265_v31, %v3265_v31 }
 0x370   : > { %v2739_v18 = vor.u32 1.1754944e-38, %v2738_v8 }
 0x371   : > { %v2715_v44 = vmul.f32 %v5535_v22, %v2714_v7  ;;  %vm2737_vm5 = vcmp.eq.f32.partialorder %v2736_v55, 8.507059e+37  ;;  %v3353_v3 = vsel %vm3342_vm6, %v3293_v49, 0 }
 0x372   : > { %3538 = vmatpush.bf16.msrb.mxu3 %v3353_v3 }
 0x373   : > { %v5537_v26 = vpop.eup %5536  ;;  %v2716_v12 = vadd.f32 %v5535_v22, %v2715_v44 }
 0x374   : > { %v5539_v17 = vpop.eup %5538  ;;  %v2516_v32 = vadd.f32 1.0, %v5537_v26 }
 0x375   : > { %v2728_v20 = vmul.f32 %v5539_v17, %v2515_v45  ;;  %v2720_v43 = vsel %vm2719_vm10, %v5535_v22, %v2716_v12  ;;  %vm2733_vm13 = vweird.f32 %v5539_v17 }
 0x376   : > { %5540 = vrcp.f32 %v2516_v32  ;;  %v2725_v21 = vsel %vm2722_vm12, %v2724_v9, %v2720_v43  ;;  %v2753_v41 = vand.u32 2147483648, %v2516_v32  ;;  %v2751_v51 = vand.u32 2147483647, %v2516_v32  ;;  %vm2734_vm0 = vmor %vm2732_vm14, %vm2733_vm13  ;;  %3539 = vmatpush.bf16.msrb.mxu3 %v5023_v57 }
 0x377   : > { %v2729_v28 = vsub.f32 1.0, %v2728_v20  ;;  %v2766_v40 = vpack.c.bf16 %v2725_v21, %v2710_v13  ;;  %vm2747_vm1 = vweird.f32 %v2516_v32 }
 0x378   : > { %v2754_v38 = vor.u32 1.1754944e-38, %v2753_v41  ;;  %vm2752_vm7 = vcmp.eq.f32.partialorder %v2751_v51, 8.507059e+37 }
 0x379   : > { %4990 = vmatmul.msk.bf16.gmra.mxu3 %vm2770_vm2, %v2766_v40  ;;  %v2730_v10 = vmul.f32 %v5539_v17, %v2729_v28 }
 0x37b   : > { %v2731_v25 = vadd.f32 %v5539_v17, %v2730_v10 }
 0x37c   : > { %v5541_v0 = vpop.eup %5540 }
 0x37d   : > { %v2743_v30 = vmul.f32 %v5541_v0, %v2516_v32  ;;  %vm2748_vm15 = vweird.f32 %v5541_v0  ;;  %v2735_v53 = vsel %vm2734_vm0, %v5539_v17, %v2731_v25 }
 0x37e   : > { %vm2749_vm3 = vmor %vm2747_vm1, %vm2748_vm15  ;;  %v2740_v23 = vsel %vm2737_vm5, %v2739_v18, %v2735_v53 }
 0x37f   : > { %v2744_v27 = vsub.f32 1.0, %v2743_v30 }
 0x381   : > { %v2745_v6 = vmul.f32 %v5541_v0, %v2744_v27 }
 0x383   : > { %v2746_v34 = vadd.f32 %v5541_v0, %v2745_v6 }
 0x385   : > { %v2750_v11 = vsel %vm2749_vm3, %v5541_v0, %v2746_v34 }
 0x386   : > { %v2755_v48 = vsel %vm2752_vm7, %v2754_v38, %v2750_v11 }
 0x387   : > { %v2767_v56 = vpack.c.bf16 %v2755_v48, %v2740_v23  ;;  %v3176_v48 = vld [vmem:[#allocation8 + $0x80] sm:$0x33] }
 0x388   : > { %v3266_v42 = vunpack.c.l.b16 %v3176_v48  ;;  %v3267_v33 = vunpack.c.h.b16 %v3176_v48 }
 0x389   : > { %4991 = vmatmul.msk.bf16.gmra.mxu3 %vm2770_vm2, %v2767_v56 }
 0x39c   : > { %v2808_v63 = vpop.f32.mrf.mxu3 }
 0x39d   : > { %v2809_v35 = vadd.f32 %v6738_v16, %v2808_v63  ;;  %v3294_v63 = vpack.c.b16 %v3266_v42, %v3266_v42 }
 0x39f   : > { %v4992_v54 = vmul.f32 -1.442695, %v2809_v35  ;;  %v3295_v35 = vpack.c.b16 %v3267_v33, %v3267_v33  ;;  %v3356_v1 = vsel %vm3342_vm6, %v3294_v63, 0 }
 0x3a0   : > { %3587 = vmatpush.bf16.msrb.mxu0 %v3356_v1 }
 0x3a1   : > { %5542 = vpow2.f32 %v4992_v54  ;;  %v3359_v15 = vsel %vm3342_vm6, %v3295_v35, 0 }
 0x3a2   : > { %3636 = vmatpush.bf16.msrb.mxu1 %v3359_v15 }
 0x3a4   : > { %v2810_v4 = vpop.f32.mrf.mxu3 }
 0x3a5   : > { %v2811_v58 = vadd.f32 %v6738_v16, %v2810_v4 }
 0x3a7   : > { %v5543_v59 = vpop.eup %5542  ;;  %v4993_v60 = vmul.f32 -1.442695, %v2811_v58 }
 0x3a8   : > { %v2896_v52 = vadd.f32 1.0, %v5543_v59 }
 0x3a9   : > { %5544 = vpow2.f32 %v4993_v60 }
 0x3aa   : > { %5546 = vrcp.f32 %v2896_v52  ;;  %vm2917_vm8 = vweird.f32 %v2896_v52  ;;  %v2921_v20 = vand.u32 2147483647, %v2896_v52  ;;  %v2923_v43 = vand.u32 2147483648, %v2896_v52 }
 0x3ac   : > { %v2813_v22 = vpop.f32.mrf.mxu3  ;;  %vm2922_vm12 = vcmp.eq.f32.partialorder %v2921_v20, 8.507059e+37  ;;  %v2924_v55 = vor.u32 1.1754944e-38, %v2923_v43 }
 0x3ad   : > { %v2814_v45 = vadd.f32 %v6738_v16, %v2813_v22 }
 0x3af   : > { %v5545_v39 = vpop.eup %5544  ;;  %v4994_v7 = vmul.f32 -1.442695, %v2814_v45 }
 0x3b0   : > { %v5547_v2 = vpop.eup %5546  ;;  %v2897_v47 = vadd.f32 1.0, %v5545_v39 }
 0x3b1   : > { %v2913_v50 = vmul.f32 %v5547_v2, %v2896_v52  ;;  %5548 = vpow2.f32 %v4994_v7  ;;  %vm2918_vm2 = vweird.f32 %v5547_v2 }
 0x3b2   : > { %5550 = vrcp.f32 %v2897_v47  ;;  %v2938_v13 = vand.u32 2147483648, %v2897_v47  ;;  %v2936_v40 = vand.u32 2147483647, %v2897_v47  ;;  %vm6750_vm10 = vmor %vm2917_vm8, %vm2918_vm2  ;;  %vm2932_vm11 = vweird.f32 %v2897_v47 }
 0x3b3   : > { %v2914_v37 = vsub.f32 1.0, %v2913_v50 }
 0x3b4   : > { %v2815_v44 = vpop.f32.mrf.mxu3  ;;  %v2939_v6 = vor.u32 1.1754944e-38, %v2938_v13  ;;  %vm2937_vm14 = vcmp.eq.f32.partialorder %v2936_v40, 8.507059e+37 }
 0x3b5   : > { %v2816_v5 = vadd.f32 %v6738_v16, %v2815_v44  ;;  %v2915_v26 = vmul.f32 %v5547_v2, %v2914_v37 }
 0x3b7   : > { %v5549_v36 = vpop.eup %5548  ;;  %v4995_v61 = vmul.f32 -1.442695, %v2816_v5  ;;  %v2916_v14 = vadd.f32 %v5547_v2, %v2915_v26 }
 0x3b8   : > { %v5551_v12 = vpop.eup %5550  ;;  %v6746_v17 = vadd.f32 1.0, %v5549_v36 }
 0x3b9   : > { %v2928_v32 = vmul.f32 %v5551_v12, %v2897_v47  ;;  %5552 = vpow2.f32 %v4995_v61  ;;  %vm2933_vm9 = vweird.f32 %v5551_v12  ;;  %v2920_v27 = vsel %vm6750_vm10, %v5547_v2, %v2916_v14 }
 0x3ba   : > { %5554 = vrcp.f32 %v6746_v17  ;;  %vm2934_vm13 = vmor %vm2932_vm11, %vm2933_vm9  ;;  %v2925_v18 = vsel %vm2922_vm12, %v2924_v55, %v2920_v27  ;;  %vm2947_vm0 = vweird.f32 %v6746_v17  ;;  %v2951_v57 = vand.u32 2147483647, %v6746_v17 }
 0x3bb   : > { %v2929_v9 = vsub.f32 1.0, %v2928_v32  ;;  %v2953_v4 = vand.u32 2147483648, %v6746_v17 }
 0x3bc   : > { %v2818_v21 = vpop.f32.mrf.mxu3  ;;  %vm2952_vm7 = vcmp.eq.f32.partialorder %v2951_v57, 8.507059e+37 }
 0x3bd   : > { %v2930_v28 = vmul.f32 %v5551_v12, %v2929_v9  ;;  %v2819_v10 = vadd.f32 %v6738_v16, %v2818_v21  ;;  %v2954_v37 = vor.u32 1.1754944e-38, %v2953_v4 }
 0x3bf   : > { %v5553_v30 = vpop.eup %5552  ;;  %v2931_v25 = vadd.f32 %v5551_v12, %v2930_v28  ;;  %v4996_v8 = vmul.f32 -1.442695, %v2819_v10 }
 0x3c0   : > { %v6756_v41 = vpop.eup %5554  ;;  %v2899_v51 = vadd.f32 1.0, %v5553_v30 }
 0x3c1   : > { %v2935_v53 = vsel %vm2934_vm13, %v5551_v12, %v2931_v25  ;;  %v2943_v34 = vmul.f32 %v6756_v41, %v6746_v17  ;;  %5556 = vpow2.f32 %v4996_v8  ;;  %vm2948_vm15 = vweird.f32 %v6756_v41 }
 0x3c2   : > { %v2940_v38 = vsel %vm2937_vm14, %v2939_v6, %v2935_v53  ;;  %5558 = vrcp.f32 %v2899_v51  ;;  %v2968_v58 = vand.u32 2147483648, %v2899_v51  ;;  %v2966_v52 = vand.u32 2147483647, %v2899_v51  ;;  %vm6783_vm3 = vmor %vm2947_vm0, %vm2948_vm15 }
 0x3c3   : > { %v6760_v11 = vpack.c.bf16 %v2940_v38, %v2925_v18  ;;  %v2944_v23 = vsub.f32 1.0, %v2943_v34  ;;  %vm2962_vm5 = vweird.f32 %v2899_v51 }
 0x3c4   : > { %v2820_v56 = vpop.f32.mrf.mxu3  ;;  %v2969_v44 = vor.u32 1.1754944e-38, %v2968_v58  ;;  %vm2967_vm8 = vcmp.eq.f32.partialorder %v2966_v52, 8.507059e+37 }
 0x3c5   : > { %v2821_v31 = vadd.f32 %v6738_v16, %v2820_v56  ;;  %5064 = vmatmul.msk.bf16.vlgmr.msra.gmra.mxu0 %vm2376_vm4, %v6760_v11  ;;  %5072 = vmatmul.msk.bf16.vlgmr.msra.gmra.mxu1 %vm2376_vm4, %v6760_v11  ;;  %v2945_v49 = vmul.f32 %v6756_v41, %v2944_v23 }
 0x3c6   : > { %5080 = vmatmul.msk.bf16.vlgmr.msrb.gmra.mxu2 %vm2376_vm4, %v6760_v11  ;;  %5088 = vmatmul.msk.bf16.vlgmr.msrb.gmra.mxu3 %vm2376_vm4, %v6760_v11 }
 0x3c7   : > { %v5557_v62 = vpop.eup %5556  ;;  %v4997_v54 = vmul.f32 -1.442695, %v2821_v31  ;;  %v2946_v24 = vadd.f32 %v6756_v41, %v2945_v49 }
 0x3c8   : > { %v5559_v19 = vpop.eup %5558  ;;  %v6772_v3 = vadd.f32 1.0, %v5557_v62 }
 0x3c9   : > { %v2958_v29 = vmul.f32 %v5559_v19, %v2899_v51  ;;  %5560 = vpow2.f32 %v4997_v54  ;;  %vm2963_vm1 = vweird.f32 %v5559_v19  ;;  %v2950_v7 = vsel %vm6783_vm3, %v6756_v41, %v2946_v24 }
 0x3ca   : > { %5562 = vrcp.f32 %v6772_v3  ;;  %vm2964_vm2 = vmor %vm2962_vm5, %vm2963_vm1  ;;  %v2955_v61 = vsel %vm2952_vm7, %v2954_v37, %v2950_v7  ;;  %vm2977_vm10 = vweird.f32 %v6772_v3  ;;  %v2981_v30 = vand.u32 2147483647, %v6772_v3 }
 0x3cb   : > { %v2959_v46 = vsub.f32 1.0, %v2958_v29  ;;  %v2983_v27 = vand.u32 2147483648, %v6772_v3 }
 0x3cc   : > { %v2823_v59 = vpop.f32.mrf.mxu3  ;;  %vm2982_vm14 = vcmp.eq.f32.partialorder %v2981_v30, 8.507059e+37 }
 0x3cd   : > { %v2960_v60 = vmul.f32 %v5559_v19, %v2959_v46  ;;  %v2824_v22 = vadd.f32 %v6738_v16, %v2823_v59  ;;  %v2984_v48 = vor.u32 1.1754944e-38, %v2983_v27 }
 0x3cf   : > { %v5561_v39 = vpop.eup %5560  ;;  %v2961_v2 = vadd.f32 %v5559_v19, %v2960_v60  ;;  %v4998_v47 = vmul.f32 -1.442695, %v2824_v22 }
 0x3d0   : > { %v5563_v50 = vpop.eup %5562  ;;  %v2901_v5 = vadd.f32 1.0, %v5561_v39 }
 0x3d1   : > { %v2965_v36 = vsel %vm2964_vm2, %v5559_v19, %v2961_v2  ;;  %v2973_v26 = vmul.f32 %v5563_v50, %v6772_v3  ;;  %5564 = vpow2.f32 %v4998_v47  ;;  %vm2978_vm9 = vweird.f32 %v5563_v50 }
 0x3d2   : > { %v2970_v12 = vsel %vm2967_vm8, %v2969_v44, %v2965_v36  ;;  %5566 = vrcp.f32 %v2901_v5  ;;  %v2998_v25 = vand.u32 2147483648, %v2901_v5  ;;  %v2996_v55 = vand.u32 2147483647, %v2901_v5  ;;  %vm6809_vm12 = vmor %vm2977_vm10, %vm2978_vm9 }
 0x3d3   : > { %v6791_v17 = vpack.c.bf16 %v2970_v12, %v2955_v61  ;;  %v2974_v32 = vsub.f32 1.0, %v2973_v26  ;;  %vm2992_vm13 = vweird.f32 %v2901_v5 }
 0x3d4   : > { %v2825_v14 = vpop.f32.mrf.mxu3  ;;  %v2999_v56 = vor.u32 1.1754944e-38, %v2998_v25  ;;  %vm2997_vm0 = vcmp.eq.f32.partialorder %v2996_v55, 8.507059e+37 }
 0x3d5   : > { %v2826_v9 = vadd.f32 %v6738_v16, %v2825_v14  ;;  %5065 = vmatmul.msk.bf16.gmra.mxu0 %vm2376_vm4, %v6791_v17  ;;  %5073 = vmatmul.msk.bf16.gmra.mxu1 %vm2376_vm4, %v6791_v17  ;;  %v2975_v43 = vmul.f32 %v5563_v50, %v2974_v32 }
 0x3d6   : > { %5081 = vmatmul.msk.bf16.gmra.mxu2 %vm2376_vm4, %v6791_v17  ;;  %5089 = vmatmul.msk.bf16.gmra.mxu3 %vm2376_vm4, %v6791_v17 }
 0x3d7   : > { %v5565_v20 = vpop.eup %5564  ;;  %v4999_v13 = vmul.f32 -1.442695, %v2826_v9  ;;  %v2976_v10 = vadd.f32 %v5563_v50, %v2975_v43 }
 0x3d8   : > { %v5567_v21 = vpop.eup %5566  ;;  %v6802_v28 = vadd.f32 1.0, %v5565_v20 }
 0x3d9   : > { %v2988_v40 = vmul.f32 %v5567_v21, %v2901_v5  ;;  %5568 = vpow2.f32 %v4999_v13  ;;  %vm2993_vm11 = vweird.f32 %v5567_v21  ;;  %v2980_v34 = vsel %vm6809_vm12, %v5563_v50, %v2976_v10 }
 0x3da   : > { %5570 = vrcp.f32 %v6802_v28  ;;  %vm2994_vm15 = vmor %vm2992_vm13, %vm2993_vm11  ;;  %v2985_v63 = vsel %vm2982_vm14, %v2984_v48, %v2980_v34  ;;  %vm3007_vm3 = vweird.f32 %v6802_v28  ;;  %v3011_v58 = vand.u32 2147483647, %v6802_v28 }
 0x3db   : > { %v2989_v0 = vsub.f32 1.0, %v2988_v40  ;;  %v3013_v59 = vand.u32 2147483648, %v6802_v28 }
 0x3dc   : > { %v2828_v8 = vpop.f32.mrf.mxu3  ;;  %vm3012_vm8 = vcmp.eq.f32.partialorder %v3011_v58, 8.507059e+37 }
 0x3dd   : > { %v2990_v41 = vmul.f32 %v5567_v21, %v2989_v0  ;;  %v2829_v6 = vadd.f32 %v6738_v16, %v2828_v8  ;;  %v3014_v5 = vor.u32 1.1754944e-38, %v3013_v59 }
 0x3df   : > { %v5569_v53 = vpop.eup %5568  ;;  %v2991_v18 = vadd.f32 %v5567_v21, %v2990_v41  ;;  %v5000_v38 = vmul.f32 -1.442695, %v2829_v6 }
 0x3e0   : > { %v5571_v23 = vpop.eup %5570  ;;  %v2903_v42 = vadd.f32 1.0, %v5569_v53 }
 0x3e1   : > { %v2995_v33 = vsel %vm2994_vm15, %v5567_v21, %v2991_v18  ;;  %v3003_v31 = vmul.f32 %v5571_v23, %v6802_v28  ;;  %5572 = vpow2.f32 %v5000_v38  ;;  %vm3008_vm1 = vweird.f32 %v5571_v23 }
 0x3e2   : > { %v3000_v35 = vsel %vm2997_vm0, %v2999_v56, %v2995_v33  ;;  %5574 = vrcp.f32 %v2903_v42  ;;  %v3028_v60 = vand.u32 2147483648, %v2903_v42  ;;  %v3026_v45 = vand.u32 2147483647, %v2903_v42  ;;  %vm6834_vm7 = vmor %vm3007_vm3, %vm3008_vm1 }
 0x3e3   : > { %v6816_v62 = vpack.c.bf16 %v3000_v35, %v2985_v63  ;;  %v3004_v49 = vsub.f32 1.0, %v3003_v31  ;;  %vm3022_vm2 = vweird.f32 %v2903_v42 }
 0x3e4   : > { %v2830_v54 = vpop.f32.mrf.mxu3  ;;  %v3029_v36 = vor.u32 1.1754944e-38, %v3028_v60  ;;  %vm3027_vm10 = vcmp.eq.f32.partialorder %v3026_v45, 8.507059e+37 }
 0x3e5   : > { %v2831_v19 = vadd.f32 %v6738_v16, %v2830_v54  ;;  %5066 = vmatmul.msk.bf16.gmra.mxu0 %vm2376_vm4, %v6816_v62  ;;  %5074 = vmatmul.msk.bf16.gmra.mxu1 %vm2376_vm4, %v6816_v62  ;;  %v3005_v1 = vmul.f32 %v5571_v23, %v3004_v49 }
 0x3e6   : > { %5082 = vmatmul.msk.bf16.gmra.mxu2 %vm2376_vm4, %v6816_v62  ;;  %5090 = vmatmul.msk.bf16.gmra.mxu3 %vm2376_vm4, %v6816_v62 }
 0x3e7   : > { %v5573_v3 = vpop.eup %5572  ;;  %v5001_v15 = vmul.f32 -1.442695, %v2831_v19  ;;  %v3006_v57 = vadd.f32 %v5571_v23, %v3005_v1 }
 0x3e8   : > { %v5575_v29 = vpop.eup %5574  ;;  %v6827_v24 = vadd.f32 1.0, %v5573_v3 }
 0x3e9   : > { %v3018_v46 = vmul.f32 %v5575_v29, %v2903_v42  ;;  %5576 = vpow2.f32 %v5001_v15  ;;  %vm3023_vm5 = vweird.f32 %v5575_v29  ;;  %v3010_v47 = vsel %vm6834_vm7, %v5571_v23, %v3006_v57  ;;  %v5026_v15 = vld [vmem:[#allocation8 + $0x10] sm:$0xf]  ;;  %v5313_v57 = vld [vmem:[#allocation8 + $0x14] sm:$0xf] }
 0x3ea   : > { %5578 = vrcp.f32 %v6827_v24  ;;  %vm3024_vm9 = vmor %vm3022_vm2, %vm3023_vm5  ;;  %v3015_v32 = vsel %vm3012_vm8, %v3014_v5, %v3010_v47  ;;  %vm3037_vm12 = vweird.f32 %v6827_v24  ;;  %v3041_v8 = vand.u32 2147483647, %v6827_v24 }
 0x3eb   : > { %v3019_v4 = vsub.f32 1.0, %v3018_v46  ;;  %v3043_v41 = vand.u32 2147483648, %v6827_v24 }
 0x3ec   : > { %v2833_v52 = vpop.f32.mrf.mxu3  ;;  %vm3042_vm0 = vcmp.eq.f32.partialorder %v3041_v8, 8.507059e+37 }
 0x3ed   : > { %v3020_v22 = vmul.f32 %v5575_v29, %v3019_v4  ;;  %v2834_v39 = vadd.f32 %v6738_v16, %v2833_v52  ;;  %v3044_v33 = vor.u32 1.1754944e-38, %v3043_v41  ;;  %v5028_v4 = vld [vmem:[#allocation8 + $0x48] sm:$0xf0] }
 0x3ee   : > { %v5031_v59 = vor.u32 %v5313_v57, %v5028_v4 }
 0x3ef   : > { %v5577_v2 = vpop.eup %5576  ;;  %v3021_v50 = vadd.f32 %v5575_v29, %v3020_v22  ;;  %v5002_v37 = vmul.f32 -1.442695, %v2834_v39 }
 0x3f0   : > { %v5579_v44 = vpop.eup %5578  ;;  %v2905_v26 = vadd.f32 1.0, %v5577_v2  ;;  %3637 = vmatpush.bf16.msrb.mxu1 %v5031_v59 }
 0x3f1   : > { %v3025_v61 = vsel %vm3024_vm9, %v5575_v29, %v3021_v50  ;;  %v3033_v12 = vmul.f32 %v5579_v44, %v6827_v24  ;;  %5580 = vpow2.f32 %v5002_v37  ;;  %vm3038_vm11 = vweird.f32 %v5579_v44  ;;  %v5320_v29 = vld [vmem:[#allocation8 + $0x44] sm:$0xf0] }
 0x3f2   : > { %v3030_v14 = vsel %vm3027_vm10, %v3029_v36, %v3025_v61  ;;  %5582 = vrcp.f32 %v2905_v26  ;;  %v3058_v55 = vand.u32 2147483648, %v2905_v26  ;;  %v3056_v53 = vand.u32 2147483647, %v2905_v26  ;;  %vm6859_vm14 = vmor %vm3037_vm12, %vm3038_vm11 }
 0x3f3   : > { %v6841_v9 = vpack.c.bf16 %v3030_v14, %v3015_v32  ;;  %v3034_v20 = vsub.f32 1.0, %v3033_v12  ;;  %vm3052_vm15 = vweird.f32 %v2905_v26  ;;  %v5027_v46 = vor.u32 %v5320_v29, %v5026_v15 }
 0x3f4   : > { %v2835_v43 = vpop.f32.mrf.mxu3  ;;  %v3059_v31 = vor.u32 1.1754944e-38, %v3058_v55  ;;  %vm3057_vm3 = vcmp.eq.f32.partialorder %v3056_v53, 8.507059e+37 }
 0x3f5   : > { %v2836_v13 = vadd.f32 %v6738_v16, %v2835_v43  ;;  %5067 = vmatmul.msk.bf16.gmra.mxu0 %vm2376_vm4, %v6841_v9  ;;  %5075 = vmatmul.msk.bf16.gmra.mxu1 %vm2376_vm4, %v6841_v9  ;;  %v3035_v28 = vmul.f32 %v5579_v44, %v3034_v20 }
 0x3f6   : > { %5083 = vmatmul.msk.bf16.gmra.mxu2 %vm2376_vm4, %v6841_v9  ;;  %5091 = vmatmul.msk.bf16.gmra.mxu3 %vm2376_vm4, %v6841_v9 }
 0x3f7   : > { %v5581_v21 = vpop.eup %5580  ;;  %v5003_v40 = vmul.f32 -1.442695, %v2836_v13  ;;  %v3036_v27 = vadd.f32 %v5579_v44, %v3035_v28  ;;  %3588 = vmatpush.bf16.msrb.mxu0 %v5027_v46 }
 0x3f8   : > { %v5583_v10 = vpop.eup %5582  ;;  %v6852_v0 = vadd.f32 1.0, %v5581_v21 }
 0x3f9   : > { %v3048_v30 = vmul.f32 %v5583_v10, %v2905_v26  ;;  %5584 = vpow2.f32 %v5003_v40  ;;  %vm3053_vm13 = vweird.f32 %v5583_v10  ;;  %v3040_v23 = vsel %vm6859_vm14, %v5579_v44, %v3036_v27 }
 0x3fa   : > { %5586 = vrcp.f32 %v6852_v0  ;;  %vm3054_vm1 = vmor %vm3052_vm15, %vm3053_vm13  ;;  %v3045_v54 = vsel %vm3042_vm0, %v3044_v33, %v3040_v23  ;;  %vm3067_vm7 = vweird.f32 %v6852_v0  ;;  %v3071_v50 = vand.u32 2147483647, %v6852_v0 }
 0x3fb   : > { %v3049_v25 = vsub.f32 1.0, %v3048_v30  ;;  %v3073_v37 = vand.u32 2147483648, %v6852_v0 }
 0x3fc   : > { %v2838_v6 = vpop.f32.mrf.mxu3  ;;  %vm3072_vm10 = vcmp.eq.f32.partialorder %v3071_v50, 8.507059e+37  ;;  %v5036_v50 = vld [vmem:[#allocation8 + $0x50] sm:$0xf0] }
 0x3fd   : > { %v3050_v51 = vmul.f32 %v5583_v10, %v3049_v25  ;;  %v2839_v34 = vadd.f32 %v6738_v16, %v2838_v6  ;;  %v3074_v21 = vor.u32 1.1754944e-38, %v3073_v37  ;;  %v3177_v6 = vld [vmem:[#allocation8 + $0x88] sm:$0x33] }
 0x3fe   : > { %v3268_v18 = vunpack.c.l.b16 %v3177_v6 }
 0x3ff   : > { %v5585_v38 = vpop.eup %5584  ;;  %v3051_v48 = vadd.f32 %v5583_v10, %v3050_v51  ;;  %v5004_v56 = vmul.f32 -1.442695, %v2839_v34 }
 0x400   : > { %v6865_v42 = vpop.eup %5586  ;;  %v2907_v63 = vadd.f32 1.0, %v5585_v38  ;;  %v3269_v38 = vunpack.c.h.b16 %v3177_v6 }
 0x401   : > { %v3055_v35 = vsel %vm3054_vm1, %v5583_v10, %v3051_v48  ;;  %v3063_v49 = vmul.f32 %v6865_v42, %v6852_v0  ;;  %5588 = vpow2.f32 %v5004_v56  ;;  %vm3068_vm5 = vweird.f32 %v6865_v42 }
 0x402   : > { %v3060_v19 = vsel %vm3057_vm3, %v3059_v31, %v3055_v35  ;;  %5590 = vrcp.f32 %v2907_v63  ;;  %v3088_v44 = vand.u32 2147483648, %v2907_v63  ;;  %v3086_v26 = vand.u32 2147483647, %v2907_v63  ;;  %vm6890_vm8 = vmor %vm3067_vm7, %vm3068_vm5 }
 0x403   : > { %v6869_v3 = vpack.c.bf16 %v3060_v19, %v3045_v54  ;;  %v3064_v1 = vsub.f32 1.0, %v3063_v49  ;;  %vm3082_vm9 = vweird.f32 %v2907_v63  ;;  %v3296_v31 = vpack.c.b16 %v3268_v18, %v3268_v18 }
 0x404   : > { %v2840_v24 = vpop.f32.mrf.mxu3  ;;  %v3089_v28 = vor.u32 1.1754944e-38, %v3088_v44  ;;  %vm3087_vm12 = vcmp.eq.f32.partialorder %v3086_v26, 8.507059e+37  ;;  %v3178_v26 = vld [vmem:[#allocation8 + $0x90] sm:$0x33] }
 0x405   : > { %v2841_v58 = vadd.f32 %v6738_v16, %v2840_v24  ;;  %5068 = vmatmul.msk.bf16.gmra.mxu0 %vm2376_vm4, %v6869_v3  ;;  %5076 = vmatmul.msk.bf16.gmra.mxu1 %vm2376_vm4, %v6869_v3  ;;  %v3065_v52 = vmul.f32 %v6865_v42, %v3064_v1  ;;  %v3362_v1 = vsel %vm3342_vm6, %v3296_v31, 0  ;;  %v3270_v12 = vunpack.c.l.b16 %v3178_v26 }
 0x406   : > { %5084 = vmatmul.msk.bf16.gmra.mxu2 %vm2376_vm4, %v6869_v3  ;;  %5092 = vmatmul.msk.bf16.gmra.mxu3 %vm2376_vm4, %v6869_v3 }
 0x407   : > { %v5589_v60 = vpop.eup %5588  ;;  %v5005_v22 = vmul.f32 -1.442695, %v2841_v58  ;;  %v3066_v2 = vadd.f32 %v6865_v42, %v3065_v52  ;;  %3685 = vmatpush.bf16.msra.mxu2 %v3362_v1 }
 0x408   : > { %v5591_v45 = vpop.eup %5590  ;;  %v6881_v39 = vadd.f32 1.0, %v5589_v60 }
 0x409   : > { %v3078_v7 = vmul.f32 %v5591_v45, %v2907_v63  ;;  %5592 = vpow2.f32 %v5005_v22  ;;  %vm3083_vm2 = vweird.f32 %v5591_v45  ;;  %v3070_v14 = vsel %vm6890_vm8, %v6865_v42, %v3066_v2 }
 0x40a   : > { %5594 = vrcp.f32 %v6881_v39  ;;  %vm3084_vm11 = vmor %vm3082_vm9, %vm3083_vm2  ;;  %v3075_v30 = vsel %vm3072_vm10, %v3074_v21, %v3070_v14  ;;  %v3101_v56 = vand.u32 2147483647, %v6881_v39  ;;  %v3297_v63 = vpack.c.b16 %v3269_v38, %v3269_v38 }
 0x40b   : > { %v3079_v47 = vsub.f32 1.0, %v3078_v7  ;;  %vm3097_vm14 = vweird.f32 %v6881_v39  ;;  %v3103_v35 = vand.u32 2147483648, %v6881_v39  ;;  %v5314_v7 = vld [vmem:[#allocation8 + $0x1c] sm:$0xf] }
 0x40c   : > { %v2843_v5 = vpop.f32.mrf.mxu3  ;;  %v3365_v15 = vsel %vm3342_vm6, %v3297_v63, 0  ;;  %vm3102_vm1 = vcmp.eq.f32.partialorder %v3101_v56, 8.507059e+37 }
 0x40d   : > { %v3080_v36 = vmul.f32 %v5591_v45, %v3079_v47  ;;  %v2844_v61 = vadd.f32 %v6738_v16, %v2843_v5  ;;  %3734 = vmatpush.bf16.msra.mxu3 %v3365_v15  ;;  %v3104_v58 = vor.u32 1.1754944e-38, %v3103_v35 }
 0x40f   : > { %v5593_v32 = vpop.eup %5592  ;;  %v3081_v20 = vadd.f32 %v5591_v45, %v3080_v36  ;;  %v5006_v43 = vmul.f32 -1.442695, %v2844_v61  ;;  %v5039_v36 = vor.u32 %v5314_v7, %v5036_v50 }
 0x410   : > { %v6897_v13 = vpop.eup %5594  ;;  %v2909_v40 = vadd.f32 1.0, %v5593_v32  ;;  %v3271_v32 = vunpack.c.h.b16 %v3178_v26 }
 0x411   : > { %v3085_v10 = vsel %vm3084_vm11, %v5591_v45, %v3081_v20  ;;  %v3093_v0 = vmul.f32 %v6897_v13, %v6881_v39  ;;  %5596 = vpow2.f32 %v5006_v43  ;;  %vm3098_vm13 = vweird.f32 %v6897_v13  ;;  %v5034_v45 = vld [vmem:[#allocation8 + $0x18] sm:$0xf]  ;;  %v5321_v39 = vld [vmem:[#allocation8 + $0x4c] sm:$0xf0]  ;;  %3735 = vmatpush.bf16.msra.mxu3 %v5039_v36 }
 0x412   : > { %v3090_v27 = vsel %vm3087_vm12, %v3089_v28, %v3085_v10  ;;  %5598 = vrcp.f32 %v2909_v40  ;;  %v3116_v49 = vand.u32 2147483647, %v2909_v40  ;;  %v3118_v54 = vand.u32 2147483648, %v2909_v40  ;;  %vm6925_vm0 = vmor %vm3097_vm14, %vm3098_vm13 }
 0x413   : > { %v6901_v25 = vpack.c.bf16 %v3090_v27, %v3075_v30  ;;  %v3094_v8 = vsub.f32 1.0, %v3093_v0  ;;  %vm3112_vm3 = vweird.f32 %v2909_v40  ;;  %v5035_v5 = vor.u32 %v5321_v39, %v5034_v45 }
 0x414   : > { %v2845_v41 = vpop.f32.mrf.mxu3  ;;  %vm3117_vm7 = vcmp.eq.f32.partialorder %v3116_v49, 8.507059e+37  ;;  %v3119_v59 = vor.u32 1.1754944e-38, %v3118_v54  ;;  %v3298_v43 = vpack.c.b16 %v3270_v12, %v3270_v12 }
 0x415   : > { %v2846_v55 = vadd.f32 %v6738_v16, %v2845_v41  ;;  %5069 = vmatmul.msk.bf16.gmra.mxu0 %vm2376_vm4, %v6901_v25  ;;  %5077 = vmatmul.msk.bf16.gmra.mxu1 %vm2376_vm4, %v6901_v25  ;;  %v3095_v53 = vmul.f32 %v6897_v13, %v3094_v8 }
 0x416   : > { %5085 = vmatmul.msk.bf16.gmra.mxu2 %vm2376_vm4, %v6901_v25  ;;  %5093 = vmatmul.msk.bf16.gmra.mxu3 %vm2376_vm4, %v6901_v25 }
 0x417   : > { %v5597_v51 = vpop.eup %5596  ;;  %v5007_v34 = vmul.f32 -1.442695, %v2846_v55  ;;  %v3096_v42 = vadd.f32 %v6897_v13, %v3095_v53  ;;  %3686 = vmatpush.bf16.msra.mxu2 %v5035_v5 }
 0x418   : > { %v5599_v16 = vpop.eup %5598  ;;  %v6913_v23 = vadd.f32 1.0, %v5597_v51 }
 0x419   : > { %v3108_v48 = vmul.f32 %v5599_v16, %v2909_v40  ;;  %5600 = vpow2.f32 %v5007_v34  ;;  %vm3113_vm15 = vweird.f32 %v5599_v16  ;;  %v3100_v46 = vsel %vm6925_vm0, %v6897_v13, %v3096_v42 }
 0x41a   : > { %5602 = vrcp.f32 %v6913_v23  ;;  %vm3114_vm5 = vmor %vm3112_vm3, %vm3113_vm15  ;;  %v3105_v2 = vsel %vm3102_vm1, %v3104_v58, %v3100_v46  ;;  %v3299_v13 = vpack.c.b16 %v3271_v32, %v3271_v32  ;;  %v3368_v40 = vsel %vm3342_vm6, %v3298_v43, 0 }
 0x41b   : > { %v3109_v33 = vsub.f32 1.0, %v3108_v48  ;;  %vm3127_vm8 = vweird.f32 %v6913_v23  ;;  %v3133_v10 = vand.u32 2147483648, %v6913_v23  ;;  %3783 = vmatpush.bf16.msra.mxu0 %v3368_v40  ;;  %v3131_v27 = vand.u32 2147483647, %v6913_v23  ;;  %v5322_v40 = vld [vmem:[#allocation8 + $0x54] sm:$0xf0] }
 0x41c   : > { %v3371_v30 = vsel %vm3342_vm6, %v3299_v13, 0 }
 0x41d   : > { %v3110_v19 = vmul.f32 %v5599_v16, %v3109_v33  ;;  %3832 = vmatpush.bf16.msra.mxu1 %v3371_v30  ;;  %v3134_v51 = vor.u32 1.1754944e-38, %v3133_v10  ;;  %vm3132_vm13 = vcmp.eq.f32.partialorder %v3131_v27, 8.507059e+37  ;;  %v5044_v30 = vld [vmem:[#allocation8 + $0x58] sm:$0xf0] }
 0x41f   : > { %v5601_v24 = vpop.eup %5600  ;;  %v3111_v57 = vadd.f32 %v5599_v16, %v3110_v19 }
 0x420   : > { %v5603_v4 = vpop.eup %5602  ;;  %v2911_v60 = vadd.f32 1.0, %v5601_v24 }
 0x421   : > { %v3115_v52 = vsel %vm3114_vm5, %v5599_v16, %v3111_v57  ;;  %v3123_v22 = vmul.f32 %v5603_v4, %v6913_v23  ;;  %vm3128_vm2 = vweird.f32 %v5603_v4  ;;  %v6958_v23 = vld [vmem:[#allocation9] sm:$0xff] }
 0x422   : > { %v3120_v47 = vsel %vm3117_vm7, %v3119_v59, %v3115_v52  ;;  %5604 = vrcp.f32 %v2911_v60  ;;  %v3148_v0 = vand.u32 2147483648, %v2911_v60  ;;  %v3146_v41 = vand.u32 2147483647, %v2911_v60  ;;  %vm3129_vm10 = vmor %vm3127_vm8, %vm3128_vm2 }
 0x423   : > { %v6933_v37 = vpack.c.bf16 %v3120_v47, %v3105_v2  ;;  %v3124_v44 = vsub.f32 1.0, %v3123_v22  ;;  %vm3142_vm11 = vweird.f32 %v2911_v60  ;;  %v6962_v48 = vperm.slane %v6958_v23, 0 }
 0x424   : > { %v3149_v53 = vor.u32 1.1754944e-38, %v3148_v0  ;;  %vm3147_vm14 = vcmp.eq.f32.partialorder %v3146_v41, 8.507059e+37  ;;  %v6965_v56 = vperm.slane %v6958_v23, 1  ;;  %v6982_v35 = vperm.slane %v6958_v23, 2  ;;  %v5315_v0 = vld [vmem:[#allocation8 + $0x24] sm:$0xf] }
 0x425   : > { %5070 = vmatmul.msk.bf16.gmra.mxu0 %vm2376_vm4, %v6933_v37  ;;  %5078 = vmatmul.msk.bf16.gmra.mxu1 %vm2376_vm4, %v6933_v37  ;;  %v3125_v61 = vmul.f32 %v5603_v4, %v3124_v44  ;;  %v6985_v49 = vperm.slane %v6958_v23, 3  ;;  %v5047_v41 = vor.u32 %v5315_v0, %v5044_v30 }
 0x426   : > { %5086 = vmatmul.msk.bf16.gmra.mxu2 %vm2376_vm4, %v6933_v37  ;;  %5094 = vmatmul.msk.bf16.gmra.mxu3 %vm2376_vm4, %v6933_v37 }
 0x427   : > { %v3126_v21 = vadd.f32 %v5603_v4, %v3125_v61  ;;  %3833 = vmatpush.bf16.msra.mxu1 %v5047_v41 }
 0x428   : > { %v5605_v14 = vpop.eup %5604 }
 0x429   : > { %v3138_v20 = vmul.f32 %v5605_v14, %v2911_v60  ;;  %vm3143_vm9 = vweird.f32 %v5605_v14  ;;  %v3130_v55 = vsel %vm3129_vm10, %v5603_v4, %v3126_v21 }
 0x42a   : > { %vm3144_vm12 = vmor %vm3142_vm11, %vm3143_vm9  ;;  %v3135_v18 = vsel %vm3132_vm13, %v3134_v51, %v3130_v55 }
 0x42b   : > { %v3139_v28 = vsub.f32 1.0, %v3138_v20 }
 0x42d   : > { %v3140_v8 = vmul.f32 %v5605_v14, %v3139_v28  ;;  %v5042_v28 = vld [vmem:[#allocation8 + $0x20] sm:$0xf] }
 0x42e   : > { %v5043_v10 = vor.u32 %v5322_v40, %v5042_v28 }
 0x42f   : > { %v3141_v6 = vadd.f32 %v5605_v14, %v3140_v8 }
 0x430   : > { %3784 = vmatpush.bf16.msra.mxu0 %v5043_v10 }
 0x431   : > { %v3145_v34 = vsel %vm3144_vm12, %v5605_v14, %v3141_v6 }
 0x432   : > { %v3150_v38 = vsel %vm3147_vm14, %v3149_v53, %v3145_v34 }
 0x433   : > { %v6948_v16 = vpack.c.bf16 %v3150_v38, %v3135_v18 }
 0x435   : > { %5071 = vmatmul.msk.bf16.gmra.mxu0 %vm2376_vm4, %v6948_v16  ;;  %5079 = vmatmul.msk.bf16.gmra.mxu1 %vm2376_vm4, %v6948_v16 }
 0x436   : > { %5087 = vmatmul.msk.bf16.gmra.mxu2 %vm2376_vm4, %v6948_v16  ;;  %5095 = vmatmul.msk.bf16.gmra.mxu3 %vm2376_vm4, %v6948_v16 }
 0x442   : > { %v3394_v42 = vpop.f32.mrf.mxu0  ;;  %v3443_v33 = vpop.f32.mrf.mxu1 }
 0x443   : > { %v3395_v31 = vadd.f32 %v3394_v42, %v6962_v48  ;;  %v3444_v63 = vadd.f32 %v3443_v33, %v6965_v56 }
 0x445   : > { %4071 = vst [vmem:[%s6969_s26] sm:$0xff] %v3395_v31  ;;  %5096 = vmatmul.msk.bf16.vlgmr.msrb.gmra.mxu0 %vm2376_vm4, %v6760_v11  ;;  %5104 = vmatmul.msk.bf16.vlgmr.msrb.gmra.mxu1 %vm2376_vm4, %v6760_v11 }
 0x446   : > { %4072 = vst [vmem:[%s6969_s26 + $0x8] sm:$0xff] %v3444_v63  ;;  %5112 = vmatmul.msk.bf16.vlgmr.msra.gmra.mxu2 %vm2376_vm4, %v6760_v11  ;;  %5120 = vmatmul.msk.bf16.vlgmr.msra.gmra.mxu3 %vm2376_vm4, %v6760_v11 }
 0x449   : > { %v3492_v54 = vpop.f32.mrf.mxu2  ;;  %v3541_v19 = vpop.f32.mrf.mxu3 }
 0x44a   : > { %v3493_v1 = vadd.f32 %v3492_v54, %v6982_v35  ;;  %v3542_v15 = vadd.f32 %v3541_v19, %v6985_v49  ;;  %v3396_v29 = vpop.f32.mrf.mxu0  ;;  %v3445_v24 = vpop.f32.mrf.mxu1 }
 0x44b   : > { %v3397_v46 = vadd.f32 %v3396_v29, %v6962_v48  ;;  %v3446_v57 = vadd.f32 %v3445_v24, %v6965_v56 }
 0x44c   : > { %4073 = vst [vmem:[%s6969_s26 + $0x10] sm:$0xff] %v3493_v1 }
 0x44d   : > { %4074 = vst [vmem:[%s6969_s26 + $0x18] sm:$0xff] %v3542_v15 }
 0x44e   : > { %4086 = vst [vmem:[%s6969_s26 + $0x70] sm:$0xff] %v3397_v46 }
 0x44f   : > { %4087 = vst [vmem:[%s6969_s26 + $0x78] sm:$0xff] %v3446_v57 }
 0x451   : > { %v3494_v4 = vpop.f32.mrf.mxu2  ;;  %v3543_v58 = vpop.f32.mrf.mxu3 }
 0x452   : > { %v3495_v59 = vadd.f32 %v3494_v4, %v6982_v35  ;;  %v3544_v60 = vadd.f32 %v3543_v58, %v6985_v49  ;;  %v3399_v52 = vpop.f32.mrf.mxu0  ;;  %v3448_v22 = vpop.f32.mrf.mxu1 }
 0x453   : > { %v3400_v45 = vadd.f32 %v3399_v52, %v6962_v48  ;;  %v3449_v39 = vadd.f32 %v3448_v22, %v6965_v56 }
 0x454   : > { %4088 = vst [vmem:[%s6969_s26 + $0x80] sm:$0xff] %v3495_v59 }
 0x455   : > { %4089 = vst [vmem:[%s6969_s26 + $0x88] sm:$0xff] %v3544_v60  ;;  %5097 = vmatmul.msk.bf16.gmra.mxu0 %vm2376_vm4, %v6791_v17  ;;  %5105 = vmatmul.msk.bf16.gmra.mxu1 %vm2376_vm4, %v6791_v17 }
 0x456   : > { %4100 = vst [vmem:[%s6969_s26 + $0xe0] sm:$0xff] %v3400_v45  ;;  %5113 = vmatmul.msk.bf16.gmra.mxu2 %vm2376_vm4, %v6791_v17  ;;  %5121 = vmatmul.msk.bf16.gmra.mxu3 %vm2376_vm4, %v6791_v17 }
 0x457   : > { %4101 = vst [vmem:[%s6969_s26 + $0xe8] sm:$0xff] %v3449_v39 }
 0x459   : > { %v3497_v7 = vpop.f32.mrf.mxu2  ;;  %v3546_v2 = vpop.f32.mrf.mxu3 }
 0x45a   : > { %v3498_v47 = vadd.f32 %v3497_v7, %v6982_v35  ;;  %v3547_v50 = vadd.f32 %v3546_v2, %v6985_v49  ;;  %v3401_v44 = vpop.f32.mrf.mxu0  ;;  %v3450_v5 = vpop.f32.mrf.mxu1 }
 0x45b   : > { %v3402_v36 = vadd.f32 %v3401_v44, %v6962_v48  ;;  %v3451_v26 = vadd.f32 %v3450_v5, %v6965_v56 }
 0x45c   : > { %4102 = vst [vmem:[%s6969_s26 + $0xf0] sm:$0xff] %v3498_v47 }
 0x45d   : > { %4103 = vst [vmem:[%s6969_s26 + $0xf8] sm:$0xff] %v3547_v50 }
 0x45e   : > { %4114 = vst [vmem:[%s6969_s26 + $0x150] sm:$0xff] %v3402_v36 }
 0x45f   : > { %4115 = vst [vmem:[%s6969_s26 + $0x158] sm:$0xff] %v3451_v26 }
 0x461   : > { %v3499_v61 = vpop.f32.mrf.mxu2  ;;  %v3548_v12 = vpop.f32.mrf.mxu3 }
 0x462   : > { %v3500_v32 = vadd.f32 %v3499_v61, %v6982_v35  ;;  %v3549_v14 = vadd.f32 %v3548_v12, %v6985_v49  ;;  %v3404_v20 = vpop.f32.mrf.mxu0  ;;  %v3453_v43 = vpop.f32.mrf.mxu1 }
 0x463   : > { %v3405_v13 = vadd.f32 %v3404_v20, %v6962_v48  ;;  %v3454_v21 = vadd.f32 %v3453_v43, %v6965_v56 }
 0x464   : > { %4116 = vst [vmem:[%s6969_s26 + $0x160] sm:$0xff] %v3500_v32 }
 0x465   : > { %4117 = vst [vmem:[%s6969_s26 + $0x168] sm:$0xff] %v3549_v14  ;;  %5098 = vmatmul.msk.bf16.gmra.mxu0 %vm2376_vm4, %v6816_v62  ;;  %5106 = vmatmul.msk.bf16.gmra.mxu1 %vm2376_vm4, %v6816_v62 }
 0x466   : > { %4128 = vst [vmem:[%s6969_s26 + $0x1c0] sm:$0xff] %v3405_v13  ;;  %5114 = vmatmul.msk.bf16.gmra.mxu2 %vm2376_vm4, %v6816_v62  ;;  %5122 = vmatmul.msk.bf16.gmra.mxu3 %vm2376_vm4, %v6816_v62 }
 0x467   : > { %4129 = vst [vmem:[%s6969_s26 + $0x1c8] sm:$0xff] %v3454_v21 }
 0x469   : > { %v3502_v27 = vpop.f32.mrf.mxu2  ;;  %v3551_v8 = vpop.f32.mrf.mxu3 }
 0x46a   : > { %v3503_v55 = vadd.f32 %v3502_v27, %v6982_v35  ;;  %v3552_v6 = vadd.f32 %v3551_v8, %v6985_v49  ;;  %v3406_v51 = vpop.f32.mrf.mxu0  ;;  %v3455_v53 = vpop.f32.mrf.mxu1 }
 0x46b   : > { %v3407_v34 = vadd.f32 %v3406_v51, %v6962_v48  ;;  %v3456_v18 = vadd.f32 %v3455_v53, %v6965_v56 }
 0x46c   : > { %4130 = vst [vmem:[%s6969_s26 + $0x1d0] sm:$0xff] %v3503_v55 }
 0x46d   : > { %4131 = vst [vmem:[%s6969_s26 + $0x1d8] sm:$0xff] %v3552_v6  ;;  %v3179_v6 = vld [vmem:[#allocation8 + $0x98] sm:$0x33] }
 0x46e   : > { %4142 = vst [vmem:[%s6969_s26 + $0x230] sm:$0xff] %v3407_v34  ;;  %v3272_v34 = vunpack.c.l.b16 %v3179_v6 }
 0x46f   : > { %4143 = vst [vmem:[%s6969_s26 + $0x238] sm:$0xff] %v3456_v18  ;;  %v3273_v18 = vunpack.c.h.b16 %v3179_v6 }
 0x471   : > { %v3504_v38 = vpop.f32.mrf.mxu2  ;;  %v3553_v42 = vpop.f32.mrf.mxu3 }
 0x472   : > { %v3505_v33 = vadd.f32 %v3504_v38, %v6982_v35  ;;  %v3554_v31 = vadd.f32 %v3553_v42, %v6985_v49  ;;  %v3409_v63 = vpop.f32.mrf.mxu0  ;;  %v3458_v54 = vpop.f32.mrf.mxu1  ;;  %v3300_v38 = vpack.c.b16 %v3272_v34, %v3272_v34  ;;  %v3301_v42 = vpack.c.b16 %v3273_v18, %v3273_v18 }
 0x473   : > { %v3410_v19 = vadd.f32 %v3409_v63, %v6962_v48  ;;  %v3459_v1 = vadd.f32 %v3458_v54, %v6965_v56  ;;  %v7168_v34 = vperm.slane %v6958_v23, 4  ;;  %v7171_v18 = vperm.slane %v6958_v23, 5 }
 0x474   : > { %4144 = vst [vmem:[%s6969_s26 + $0x240] sm:$0xff] %v3505_v33  ;;  %v3374_v33 = vsel %vm3342_vm6, %v3300_v38, 0 }
 0x475   : > { %4145 = vst [vmem:[%s6969_s26 + $0x248] sm:$0xff] %v3554_v31  ;;  %5099 = vmatmul.msk.bf16.gmra.mxu0 %vm2376_vm4, %v6841_v9  ;;  %5107 = vmatmul.msk.bf16.gmra.mxu1 %vm2376_vm4, %v6841_v9  ;;  %v3377_v31 = vsel %vm3342_vm6, %v3301_v42, 0 }
 0x476   : > { %4156 = vst [vmem:[%s6969_s26 + $0x2a0] sm:$0xff] %v3410_v19  ;;  %5115 = vmatmul.msk.bf16.gmra.mxu2 %vm2376_vm4, %v6841_v9  ;;  %5123 = vmatmul.msk.bf16.gmra.mxu3 %vm2376_vm4, %v6841_v9  ;;  %v5050_v19 = vld [vmem:[#allocation8 + $0x28] sm:$0xf] }
 0x477   : > { %4157 = vst [vmem:[%s6969_s26 + $0x2a8] sm:$0xff] %v3459_v1  ;;  %3881 = vmatpush.bf16.msrb.mxu2 %v3374_v33  ;;  %3930 = vmatpush.bf16.msrb.mxu3 %v3377_v31  ;;  %v5323_v1 = vld [vmem:[#allocation8 + $0x5c] sm:$0xf0] }
 0x479   : > { %v3507_v15 = vpop.f32.mrf.mxu2  ;;  %v3556_v29 = vpop.f32.mrf.mxu3 }
 0x47a   : > { %v3508_v24 = vadd.f32 %v3507_v15, %v6982_v35  ;;  %v3557_v46 = vadd.f32 %v3556_v29, %v6985_v49  ;;  %v3411_v57 = vpop.f32.mrf.mxu0  ;;  %v3460_v4 = vpop.f32.mrf.mxu1  ;;  %v5316_v15 = vld [vmem:[#allocation8 + $0x2c] sm:$0xf] }
 0x47b   : > { %v3412_v58 = vadd.f32 %v3411_v57, %v6962_v48  ;;  %v3461_v59 = vadd.f32 %v3460_v4, %v6965_v56  ;;  %v5051_v4 = vor.u32 %v5323_v1, %v5050_v19 }
 0x47c   : > { %4158 = vst [vmem:[%s6969_s26 + $0x2b0] sm:$0xff] %v3508_v24 }
 0x47d   : > { %4159 = vst [vmem:[%s6969_s26 + $0x2b8] sm:$0xff] %v3557_v46  ;;  %3882 = vmatpush.bf16.msrb.mxu2 %v5051_v4 }
 0x47e   : > { %4170 = vst [vmem:[%s6969_s26 + $0x310] sm:$0xff] %v3412_v58  ;;  %v5052_v58 = vld [vmem:[#allocation8 + $0x60] sm:$0xf0] }
 0x47f   : > { %4171 = vst [vmem:[%s6969_s26 + $0x318] sm:$0xff] %v3461_v59 }
 0x481   : > { %v3509_v60 = vpop.f32.mrf.mxu2  ;;  %v3558_v52 = vpop.f32.mrf.mxu3 }
 0x482   : > { %v3510_v22 = vadd.f32 %v3509_v60, %v6982_v35  ;;  %v3559_v45 = vadd.f32 %v3558_v52, %v6985_v49  ;;  %v3414_v39 = vpop.f32.mrf.mxu0  ;;  %v3463_v7 = vpop.f32.mrf.mxu1  ;;  %v5055_v52 = vor.u32 %v5316_v15, %v5052_v58 }
 0x483   : > { %v3415_v2 = vadd.f32 %v3414_v39, %v6962_v48  ;;  %v3464_v47 = vadd.f32 %v3463_v7, %v6965_v56 }
 0x484   : > { %4172 = vst [vmem:[%s6969_s26 + $0x320] sm:$0xff] %v3510_v22  ;;  %3931 = vmatpush.bf16.msrb.mxu3 %v5055_v52  ;;  %v3180_v22 = vld [vmem:[#allocation8 + $0xa0] sm:$0x33] }
 0x485   : > { %4173 = vst [vmem:[%s6969_s26 + $0x328] sm:$0xff] %v3559_v45  ;;  %5100 = vmatmul.msk.bf16.gmra.mxu0 %vm2376_vm4, %v6869_v3  ;;  %5108 = vmatmul.msk.bf16.gmra.mxu1 %vm2376_vm4, %v6869_v3  ;;  %v3274_v45 = vunpack.c.l.b16 %v3180_v22  ;;  %v3275_v39 = vunpack.c.h.b16 %v3180_v22 }
 0x486   : > { %4184 = vst [vmem:[%s6969_s26 + $0x380] sm:$0xff] %v3415_v2  ;;  %5116 = vmatmul.msk.bf16.gmra.mxu2 %vm2376_vm4, %v6869_v3  ;;  %5124 = vmatmul.msk.bf16.gmra.mxu3 %vm2376_vm4, %v6869_v3 }
 0x487   : > { %4185 = vst [vmem:[%s6969_s26 + $0x388] sm:$0xff] %v3464_v47 }
 0x489   : > { %v3512_v50 = vpop.f32.mrf.mxu2  ;;  %v3561_v44 = vpop.f32.mrf.mxu3 }
 0x48a   : > { %v3513_v5 = vadd.f32 %v3512_v50, %v6982_v35  ;;  %v3562_v36 = vadd.f32 %v3561_v44, %v6985_v49  ;;  %v3416_v26 = vpop.f32.mrf.mxu0  ;;  %v3465_v61 = vpop.f32.mrf.mxu1 }
 0x48b   : > { %v3417_v12 = vadd.f32 %v3416_v26, %v6962_v48  ;;  %v3466_v32 = vadd.f32 %v3465_v61, %v6965_v56  ;;  %v3303_v26 = vpack.c.b16 %v3275_v39, %v3275_v39 }
 0x48c   : > { %4186 = vst [vmem:[%s6969_s26 + $0x390] sm:$0xff] %v3513_v5 }
 0x48d   : > { %4187 = vst [vmem:[%s6969_s26 + $0x398] sm:$0xff] %v3562_v36  ;;  %v3302_v36 = vpack.c.b16 %v3274_v45, %v3274_v45 }
 0x48e   : > { %4198 = vst [vmem:[%s6969_s26 + $0x3f0] sm:$0xff] %v3417_v12 }
 0x48f   : > { %4199 = vst [vmem:[%s6969_s26 + $0x3f8] sm:$0xff] %v3466_v32  ;;  %v3380_v32 = vsel %vm3342_vm6, %v3302_v36, 0 }
 0x490   : > { %3979 = vmatpush.bf16.msrb.mxu0 %v3380_v32 }
 0x491   : > { %v3514_v14 = vpop.f32.mrf.mxu2  ;;  %v3563_v20 = vpop.f32.mrf.mxu3 }
 0x492   : > { %v3515_v43 = vadd.f32 %v3514_v14, %v6982_v35  ;;  %v3564_v13 = vadd.f32 %v3563_v20, %v6985_v49  ;;  %v3419_v21 = vpop.f32.mrf.mxu0  ;;  %v3468_v28 = vpop.f32.mrf.mxu1  ;;  %v3383_v14 = vsel %vm3342_vm6, %v3303_v26, 0 }
 0x493   : > { %v3420_v40 = vadd.f32 %v3419_v21, %v6962_v48  ;;  %v3469_v10 = vadd.f32 %v3468_v28, %v6965_v56  ;;  %4028 = vmatpush.bf16.msrb.mxu1 %v3383_v14 }
 0x494   : > { %4200 = vst [vmem:[%s6969_s26 + $0x400] sm:$0xff] %v3515_v43 }
 0x495   : > { %4201 = vst [vmem:[%s6969_s26 + $0x408] sm:$0xff] %v3564_v13  ;;  %5101 = vmatmul.msk.bf16.gmra.mxu0 %vm2376_vm4, %v6901_v25  ;;  %5109 = vmatmul.msk.bf16.gmra.mxu1 %vm2376_vm4, %v6901_v25 }
 0x496   : > { %4212 = vst [vmem:[%s6969_s26 + $0x460] sm:$0xff] %v3420_v40  ;;  %5117 = vmatmul.msk.bf16.gmra.mxu2 %vm2376_vm4, %v6901_v25  ;;  %5125 = vmatmul.msk.bf16.gmra.mxu3 %vm2376_vm4, %v6901_v25 }
 0x497   : > { %4213 = vst [vmem:[%s6969_s26 + $0x468] sm:$0xff] %v3469_v10 }
 0x499   : > { %v3517_v0 = vpop.f32.mrf.mxu2  ;;  %v3566_v30 = vpop.f32.mrf.mxu3 }
 0x49a   : > { %v3518_v27 = vadd.f32 %v3517_v0, %v6982_v35  ;;  %v3567_v8 = vadd.f32 %v3566_v30, %v6985_v49  ;;  %v3421_v41 = vpop.f32.mrf.mxu0  ;;  %v3470_v55 = vpop.f32.mrf.mxu1 }
 0x49b   : > { %v3422_v51 = vadd.f32 %v3421_v41, %v6962_v48  ;;  %v3471_v53 = vadd.f32 %v3470_v55, %v6965_v56 }
 0x49c   : > { %4214 = vst [vmem:[%s6969_s26 + $0x470] sm:$0xff] %v3518_v27 }
 0x49d   : > { %4215 = vst [vmem:[%s6969_s26 + $0x478] sm:$0xff] %v3567_v8 }
 0x49e   : > { %4226 = vst [vmem:[%s6969_s26 + $0x4d0] sm:$0xff] %v3422_v51 }
 0x49f   : > { %4227 = vst [vmem:[%s6969_s26 + $0x4d8] sm:$0xff] %v3471_v53 }
 0x4a1   : > { %v3519_v63 = vpop.f32.mrf.mxu2  ;;  %v3568_v54 = vpop.f32.mrf.mxu3 }
 0x4a2   : > { %v3520_v29 = vadd.f32 %v3519_v63, %v6982_v35  ;;  %v3569_v24 = vadd.f32 %v3568_v54, %v6985_v49  ;;  %v3424_v46 = vpop.f32.mrf.mxu0  ;;  %v3473_v57 = vpop.f32.mrf.mxu1 }
 0x4a3   : > { %v3425_v59 = vadd.f32 %v3424_v46, %v6962_v48  ;;  %v3474_v60 = vadd.f32 %v3473_v57, %v6965_v56 }
 0x4a4   : > { %4228 = vst [vmem:[%s6969_s26 + $0x4e0] sm:$0xff] %v3520_v29 }
 0x4a5   : > { %4229 = vst [vmem:[%s6969_s26 + $0x4e8] sm:$0xff] %v3569_v24  ;;  %5102 = vmatmul.msk.bf16.gmra.mxu0 %vm2376_vm4, %v6933_v37  ;;  %5110 = vmatmul.msk.bf16.gmra.mxu1 %vm2376_vm4, %v6933_v37 }
 0x4a6   : > { %4240 = vst [vmem:[%s6969_s26 + $0x540] sm:$0xff] %v3425_v59  ;;  %5118 = vmatmul.msk.bf16.gmra.mxu2 %vm2376_vm4, %v6933_v37  ;;  %5126 = vmatmul.msk.bf16.gmra.mxu3 %vm2376_vm4, %v6933_v37 }
 0x4a7   : > { %4241 = vst [vmem:[%s6969_s26 + $0x548] sm:$0xff] %v3474_v60 }
 0x4a9   : > { %v3522_v7 = vpop.f32.mrf.mxu2  ;;  %v3571_v2 = vpop.f32.mrf.mxu3 }
 0x4aa   : > { %v3523_v47 = vadd.f32 %v3522_v7, %v6982_v35  ;;  %v3572_v50 = vadd.f32 %v3571_v2, %v6985_v49  ;;  %v3426_v44 = vpop.f32.mrf.mxu0  ;;  %v3475_v5 = vpop.f32.mrf.mxu1 }
 0x4ab   : > { %v3427_v61 = vadd.f32 %v3426_v44, %v6962_v48  ;;  %v3476_v12 = vadd.f32 %v3475_v5, %v6965_v56 }
 0x4ac   : > { %4242 = vst [vmem:[%s6969_s26 + $0x550] sm:$0xff] %v3523_v47 }
 0x4ad   : > { %4243 = vst [vmem:[%s6969_s26 + $0x558] sm:$0xff] %v3572_v50 }
 0x4ae   : > { %4254 = vst [vmem:[%s6969_s26 + $0x5b0] sm:$0xff] %v3427_v61 }
 0x4af   : > { %4255 = vst [vmem:[%s6969_s26 + $0x5b8] sm:$0xff] %v3476_v12 }
 0x4b1   : > { %v3524_v20 = vpop.f32.mrf.mxu2  ;;  %v3573_v43 = vpop.f32.mrf.mxu3 }
 0x4b2   : > { %v3525_v13 = vadd.f32 %v3524_v20, %v6982_v35  ;;  %v3574_v21 = vadd.f32 %v3573_v43, %v6985_v49  ;;  %v3429_v28 = vpop.f32.mrf.mxu0  ;;  %v3478_v40 = vpop.f32.mrf.mxu1 }
 0x4b3   : > { %v3430_v10 = vadd.f32 %v3429_v28, %v6962_v48  ;;  %v3479_v0 = vadd.f32 %v3478_v40, %v6965_v56  ;;  %v5058_v28 = vld [vmem:[#allocation8 + $0x30] sm:$0xf]  ;;  %v5324_v40 = vld [vmem:[#allocation8 + $0x64] sm:$0xf0] }
 0x4b4   : > { %4256 = vst [vmem:[%s6969_s26 + $0x5c0] sm:$0xff] %v3525_v13 }
 0x4b5   : > { %4257 = vst [vmem:[%s6969_s26 + $0x5c8] sm:$0xff] %v3574_v21  ;;  %5103 = vmatmul.msk.bf16.gmra.mxu0 %vm2376_vm4, %v6948_v16  ;;  %5111 = vmatmul.msk.bf16.gmra.mxu1 %vm2376_vm4, %v6948_v16 }
 0x4b6   : > { %4268 = vst [vmem:[%s6969_s26 + $0x620] sm:$0xff] %v3430_v10  ;;  %5119 = vmatmul.msk.bf16.gmra.mxu2 %vm2376_vm4, %v6948_v16  ;;  %5127 = vmatmul.msk.bf16.gmra.mxu3 %vm2376_vm4, %v6948_v16  ;;  %v5059_v10 = vor.u32 %v5324_v40, %v5058_v28 }
 0x4b7   : > { %4269 = vst [vmem:[%s6969_s26 + $0x628] sm:$0xff] %v3479_v0  ;;  %v5317_v0 = vld [vmem:[#allocation8 + $0x34] sm:$0xf] }
 0x4b8   : > { %3980 = vmatpush.bf16.msrb.mxu0 %v5059_v10 }
 0x4b9   : > { %v3527_v30 = vpop.f32.mrf.mxu2  ;;  %v3576_v27 = vpop.f32.mrf.mxu3 }
 0x4ba   : > { %v3528_v8 = vadd.f32 %v3527_v30, %v6982_v35  ;;  %v3577_v41 = vadd.f32 %v3576_v27, %v6985_v49  ;;  %v3431_v55 = vpop.f32.mrf.mxu0  ;;  %v3480_v6 = vpop.f32.mrf.mxu1  ;;  %v5060_v30 = vld [vmem:[#allocation8 + $0x68] sm:$0xf0] }
 0x4bb   : > { %v3432_v51 = vadd.f32 %v3431_v55, %v6962_v48  ;;  %v3481_v53 = vadd.f32 %v3480_v6, %v6965_v56 }
 0x4bc   : > { %4270 = vst [vmem:[%s6969_s26 + $0x630] sm:$0xff] %v3528_v8 }
 0x4bd   : > { %4271 = vst [vmem:[%s6969_s26 + $0x638] sm:$0xff] %v3577_v41  ;;  %v5063_v41 = vor.u32 %v5317_v0, %v5060_v30 }
 0x4be   : > { %4282 = vst [vmem:[%s6969_s26 + $0x690] sm:$0xff] %v3432_v51 }
 0x4bf   : > { %4283 = vst [vmem:[%s6969_s26 + $0x698] sm:$0xff] %v3481_v53  ;;  %4029 = vmatpush.bf16.msrb.mxu1 %v5063_v41 }
 0x4c1   : > { %v3529_v38 = vpop.f32.mrf.mxu2  ;;  %v3578_v42 = vpop.f32.mrf.mxu3 }
 0x4c2   : > { %v3530_v48 = vadd.f32 %v3529_v38, %v6982_v35  ;;  %v3579_v33 = vadd.f32 %v3578_v42, %v6985_v49  ;;  %v3590_v56 = vpop.f32.mrf.mxu0  ;;  %v3639_v31 = vpop.f32.mrf.mxu1  ;;  %v7189_v35 = vperm.slane %v6958_v23, 6  ;;  %v7192_v49 = vperm.slane %v6958_v23, 7 }
 0x4c3   : > { %v3591_v63 = vadd.f32 %v3590_v56, %v7168_v34  ;;  %v3640_v54 = vadd.f32 %v3639_v31, %v7171_v18 }
 0x4c4   : > { %4284 = vst [vmem:[%s6969_s26 + $0x6a0] sm:$0xff] %v3530_v48 }
 0x4c5   : > { %4285 = vst [vmem:[%s6969_s26 + $0x6a8] sm:$0xff] %v3579_v33  ;;  %5128 = vmatmul.msk.bf16.vlgmr.msra.gmra.mxu0 %vm2376_vm4, %v6760_v11  ;;  %5136 = vmatmul.msk.bf16.vlgmr.msra.gmra.mxu1 %vm2376_vm4, %v6760_v11 }
 0x4c6   : > { %4075 = vst [vmem:[%s6969_s26 + $0x20] sm:$0xff] %v3591_v63  ;;  %5144 = vmatmul.msk.bf16.vlgmr.msrb.gmra.mxu2 %vm2376_vm4, %v6760_v11  ;;  %5152 = vmatmul.msk.bf16.vlgmr.msrb.gmra.mxu3 %vm2376_vm4, %v6760_v11 }
 0x4c7   : > { %4076 = vst [vmem:[%s6969_s26 + $0x28] sm:$0xff] %v3640_v54 }
 0x4c9   : > { %v3688_v19 = vpop.f32.mrf.mxu2  ;;  %v3737_v1 = vpop.f32.mrf.mxu3 }
 0x4ca   : > { %v3689_v15 = vadd.f32 %v3688_v19, %v7189_v35  ;;  %v3738_v29 = vadd.f32 %v3737_v1, %v7192_v49  ;;  %v3592_v24 = vpop.f32.mrf.mxu0  ;;  %v3641_v46 = vpop.f32.mrf.mxu1 }
 0x4cb   : > { %v3593_v57 = vadd.f32 %v3592_v24, %v7168_v34  ;;  %v3642_v4 = vadd.f32 %v3641_v46, %v7171_v18 }
 0x4cc   : > { %4077 = vst [vmem:[%s6969_s26 + $0x30] sm:$0xff] %v3689_v15 }
 0x4cd   : > { %4078 = vst [vmem:[%s6969_s26 + $0x38] sm:$0xff] %v3738_v29 }
 0x4ce   : > { %4090 = vst [vmem:[%s6969_s26 + $0x90] sm:$0xff] %v3593_v57 }
 0x4cf   : > { %4091 = vst [vmem:[%s6969_s26 + $0x98] sm:$0xff] %v3642_v4 }
 0x4d1   : > { %v3690_v23 = vpop.f32.mrf.mxu2  ;;  %v3739_v58 = vpop.f32.mrf.mxu3 }
 0x4d2   : > { %v3691_v59 = vadd.f32 %v3690_v23, %v7189_v35  ;;  %v3740_v60 = vadd.f32 %v3739_v58, %v7192_v49  ;;  %v3595_v52 = vpop.f32.mrf.mxu0  ;;  %v3644_v22 = vpop.f32.mrf.mxu1 }
 0x4d3   : > { %v3596_v45 = vadd.f32 %v3595_v52, %v7168_v34  ;;  %v3645_v39 = vadd.f32 %v3644_v22, %v7171_v18 }
 0x4d4   : > { %4092 = vst [vmem:[%s6969_s26 + $0xa0] sm:$0xff] %v3691_v59 }
 0x4d5   : > { %4093 = vst [vmem:[%s6969_s26 + $0xa8] sm:$0xff] %v3740_v60  ;;  %5129 = vmatmul.msk.bf16.gmra.mxu0 %vm2376_vm4, %v6791_v17  ;;  %5137 = vmatmul.msk.bf16.gmra.mxu1 %vm2376_vm4, %v6791_v17 }
 0x4d6   : > { %4104 = vst [vmem:[%s6969_s26 + $0x100] sm:$0xff] %v3596_v45  ;;  %5145 = vmatmul.msk.bf16.gmra.mxu2 %vm2376_vm4, %v6791_v17  ;;  %5153 = vmatmul.msk.bf16.gmra.mxu3 %vm2376_vm4, %v6791_v17 }
 0x4d7   : > { %4105 = vst [vmem:[%s6969_s26 + $0x108] sm:$0xff] %v3645_v39 }
 0x4d9   : > { %v3693_v7 = vpop.f32.mrf.mxu2  ;;  %v3742_v2 = vpop.f32.mrf.mxu3 }
 0x4da   : > { %v3694_v47 = vadd.f32 %v3693_v7, %v7189_v35  ;;  %v3743_v50 = vadd.f32 %v3742_v2, %v7192_v49  ;;  %v3597_v44 = vpop.f32.mrf.mxu0  ;;  %v3646_v5 = vpop.f32.mrf.mxu1 }
 0x4db   : > { %v3598_v36 = vadd.f32 %v3597_v44, %v7168_v34  ;;  %v3647_v26 = vadd.f32 %v3646_v5, %v7171_v18 }
 0x4dc   : > { %4106 = vst [vmem:[%s6969_s26 + $0x110] sm:$0xff] %v3694_v47 }
 0x4dd   : > { %4107 = vst [vmem:[%s6969_s26 + $0x118] sm:$0xff] %v3743_v50 }
 0x4de   : > { %4118 = vst [vmem:[%s6969_s26 + $0x170] sm:$0xff] %v3598_v36 }
 0x4df   : > { %4119 = vst [vmem:[%s6969_s26 + $0x178] sm:$0xff] %v3647_v26 }
 0x4e1   : > { %v3695_v61 = vpop.f32.mrf.mxu2  ;;  %v3744_v12 = vpop.f32.mrf.mxu3 }
 0x4e2   : > { %v3696_v32 = vadd.f32 %v3695_v61, %v7189_v35  ;;  %v3745_v14 = vadd.f32 %v3744_v12, %v7192_v49  ;;  %v3600_v20 = vpop.f32.mrf.mxu0  ;;  %v3649_v43 = vpop.f32.mrf.mxu1 }
 0x4e3   : > { %v3601_v13 = vadd.f32 %v3600_v20, %v7168_v34  ;;  %v3650_v21 = vadd.f32 %v3649_v43, %v7171_v18 }
 0x4e4   : > { %4120 = vst [vmem:[%s6969_s26 + $0x180] sm:$0xff] %v3696_v32 }
 0x4e5   : > { %4121 = vst [vmem:[%s6969_s26 + $0x188] sm:$0xff] %v3745_v14  ;;  %5130 = vmatmul.msk.bf16.gmra.mxu0 %vm2376_vm4, %v6816_v62  ;;  %5138 = vmatmul.msk.bf16.gmra.mxu1 %vm2376_vm4, %v6816_v62 }
 0x4e6   : > { %4132 = vst [vmem:[%s6969_s26 + $0x1e0] sm:$0xff] %v3601_v13  ;;  %5146 = vmatmul.msk.bf16.gmra.mxu2 %vm2376_vm4, %v6816_v62  ;;  %5154 = vmatmul.msk.bf16.gmra.mxu3 %vm2376_vm4, %v6816_v62 }
 0x4e7   : > { %4133 = vst [vmem:[%s6969_s26 + $0x1e8] sm:$0xff] %v3650_v21 }
 0x4e9   : > { %v3698_v27 = vpop.f32.mrf.mxu2  ;;  %v3747_v8 = vpop.f32.mrf.mxu3 }
 0x4ea   : > { %v3699_v55 = vadd.f32 %v3698_v27, %v7189_v35  ;;  %v3748_v6 = vadd.f32 %v3747_v8, %v7192_v49  ;;  %v3602_v51 = vpop.f32.mrf.mxu0  ;;  %v3651_v53 = vpop.f32.mrf.mxu1 }
 0x4eb   : > { %v3603_v38 = vadd.f32 %v3602_v51, %v7168_v34  ;;  %v3652_v42 = vadd.f32 %v3651_v53, %v7171_v18 }
 0x4ec   : > { %4134 = vst [vmem:[%s6969_s26 + $0x1f0] sm:$0xff] %v3699_v55 }
 0x4ed   : > { %4135 = vst [vmem:[%s6969_s26 + $0x1f8] sm:$0xff] %v3748_v6 }
 0x4ee   : > { %4146 = vst [vmem:[%s6969_s26 + $0x250] sm:$0xff] %v3603_v38 }
 0x4ef   : > { %4147 = vst [vmem:[%s6969_s26 + $0x258] sm:$0xff] %v3652_v42 }
 0x4f1   : > { %v3700_v48 = vpop.f32.mrf.mxu2  ;;  %v3749_v33 = vpop.f32.mrf.mxu3 }
 0x4f2   : > { %v3701_v56 = vadd.f32 %v3700_v48, %v7189_v35  ;;  %v3750_v31 = vadd.f32 %v3749_v33, %v7192_v49  ;;  %v3605_v63 = vpop.f32.mrf.mxu0  ;;  %v3654_v54 = vpop.f32.mrf.mxu1 }
 0x4f3   : > { %v3606_v19 = vadd.f32 %v3605_v63, %v7168_v34  ;;  %v3655_v1 = vadd.f32 %v3654_v54, %v7171_v18 }
 0x4f4   : > { %4148 = vst [vmem:[%s6969_s26 + $0x260] sm:$0xff] %v3701_v56 }
 0x4f5   : > { %4149 = vst [vmem:[%s6969_s26 + $0x268] sm:$0xff] %v3750_v31  ;;  %5131 = vmatmul.msk.bf16.gmra.mxu0 %vm2376_vm4, %v6841_v9  ;;  %5139 = vmatmul.msk.bf16.gmra.mxu1 %vm2376_vm4, %v6841_v9 }
 0x4f6   : > { %4160 = vst [vmem:[%s6969_s26 + $0x2c0] sm:$0xff] %v3606_v19  ;;  %5147 = vmatmul.msk.bf16.gmra.mxu2 %vm2376_vm4, %v6841_v9  ;;  %5155 = vmatmul.msk.bf16.gmra.mxu3 %vm2376_vm4, %v6841_v9 }
 0x4f7   : > { %4161 = vst [vmem:[%s6969_s26 + $0x2c8] sm:$0xff] %v3655_v1 }
 0x4f9   : > { %v3703_v15 = vpop.f32.mrf.mxu2  ;;  %v3752_v29 = vpop.f32.mrf.mxu3 }
 0x4fa   : > { %v3704_v24 = vadd.f32 %v3703_v15, %v7189_v35  ;;  %v3753_v46 = vadd.f32 %v3752_v29, %v7192_v49  ;;  %v3607_v57 = vpop.f32.mrf.mxu0  ;;  %v3656_v4 = vpop.f32.mrf.mxu1 }
 0x4fb   : > { %v3608_v23 = vadd.f32 %v3607_v57, %v7168_v34  ;;  %v3657_v58 = vadd.f32 %v3656_v4, %v7171_v18 }
 0x4fc   : > { %4162 = vst [vmem:[%s6969_s26 + $0x2d0] sm:$0xff] %v3704_v24 }
 0x4fd   : > { %4163 = vst [vmem:[%s6969_s26 + $0x2d8] sm:$0xff] %v3753_v46 }
 0x4fe   : > { %4174 = vst [vmem:[%s6969_s26 + $0x330] sm:$0xff] %v3608_v23 }
 0x4ff   : > { %4175 = vst [vmem:[%s6969_s26 + $0x338] sm:$0xff] %v3657_v58 }
 0x501   : > { %v3705_v59 = vpop.f32.mrf.mxu2  ;;  %v3754_v60 = vpop.f32.mrf.mxu3 }
 0x502   : > { %v3706_v52 = vadd.f32 %v3705_v59, %v7189_v35  ;;  %v3755_v22 = vadd.f32 %v3754_v60, %v7192_v49  ;;  %v3610_v45 = vpop.f32.mrf.mxu0  ;;  %v3659_v39 = vpop.f32.mrf.mxu1 }
 0x503   : > { %v3611_v7 = vadd.f32 %v3610_v45, %v7168_v34  ;;  %v3660_v2 = vadd.f32 %v3659_v39, %v7171_v18 }
 0x504   : > { %4176 = vst [vmem:[%s6969_s26 + $0x340] sm:$0xff] %v3706_v52 }
 0x505   : > { %4177 = vst [vmem:[%s6969_s26 + $0x348] sm:$0xff] %v3755_v22  ;;  %5132 = vmatmul.msk.bf16.gmra.mxu0 %vm2376_vm4, %v6869_v3  ;;  %5140 = vmatmul.msk.bf16.gmra.mxu1 %vm2376_vm4, %v6869_v3 }
 0x506   : > { %4188 = vst [vmem:[%s6969_s26 + $0x3a0] sm:$0xff] %v3611_v7  ;;  %5148 = vmatmul.msk.bf16.gmra.mxu2 %vm2376_vm4, %v6869_v3  ;;  %5156 = vmatmul.msk.bf16.gmra.mxu3 %vm2376_vm4, %v6869_v3 }
 0x507   : > { %4189 = vst [vmem:[%s6969_s26 + $0x3a8] sm:$0xff] %v3660_v2 }
 0x509   : > { %v3708_v47 = vpop.f32.mrf.mxu2  ;;  %v3757_v50 = vpop.f32.mrf.mxu3 }
 0x50a   : > { %v3709_v44 = vadd.f32 %v3708_v47, %v7189_v35  ;;  %v3758_v5 = vadd.f32 %v3757_v50, %v7192_v49  ;;  %v3612_v36 = vpop.f32.mrf.mxu0  ;;  %v3661_v26 = vpop.f32.mrf.mxu1 }
 0x50b   : > { %v3613_v61 = vadd.f32 %v3612_v36, %v7168_v34  ;;  %v3662_v12 = vadd.f32 %v3661_v26, %v7171_v18  ;;  %v7368_v36 = vld [vmem:[#allocation9 + $0x8] sm:$0x3f] }
 0x50c   : > { %4190 = vst [vmem:[%s6969_s26 + $0x3b0] sm:$0xff] %v3709_v44  ;;  %v7374_v26 = vperm.slane %v7368_v36, 0 }
 0x50d   : > { %4191 = vst [vmem:[%s6969_s26 + $0x3b8] sm:$0xff] %v3758_v5 }
 0x50e   : > { %4202 = vst [vmem:[%s6969_s26 + $0x410] sm:$0xff] %v3613_v61  ;;  %v7377_v61 = vperm.slane %v7368_v36, 1 }
 0x50f   : > { %4203 = vst [vmem:[%s6969_s26 + $0x418] sm:$0xff] %v3662_v12 }
 0x511   : > { %v3710_v32 = vpop.f32.mrf.mxu2  ;;  %v3759_v14 = vpop.f32.mrf.mxu3 }
 0x512   : > { %v3711_v20 = vadd.f32 %v3710_v32, %v7189_v35  ;;  %v3760_v43 = vadd.f32 %v3759_v14, %v7192_v49  ;;  %v3615_v13 = vpop.f32.mrf.mxu0  ;;  %v3664_v21 = vpop.f32.mrf.mxu1 }
 0x513   : > { %v3616_v28 = vadd.f32 %v3615_v13, %v7168_v34  ;;  %v3665_v40 = vadd.f32 %v3664_v21, %v7171_v18 }
 0x514   : > { %4204 = vst [vmem:[%s6969_s26 + $0x420] sm:$0xff] %v3711_v20 }
 0x515   : > { %4205 = vst [vmem:[%s6969_s26 + $0x428] sm:$0xff] %v3760_v43  ;;  %5133 = vmatmul.msk.bf16.gmra.mxu0 %vm2376_vm4, %v6901_v25  ;;  %5141 = vmatmul.msk.bf16.gmra.mxu1 %vm2376_vm4, %v6901_v25 }
 0x516   : > { %4216 = vst [vmem:[%s6969_s26 + $0x480] sm:$0xff] %v3616_v28  ;;  %5149 = vmatmul.msk.bf16.gmra.mxu2 %vm2376_vm4, %v6901_v25  ;;  %5157 = vmatmul.msk.bf16.gmra.mxu3 %vm2376_vm4, %v6901_v25 }
 0x517   : > { %4217 = vst [vmem:[%s6969_s26 + $0x488] sm:$0xff] %v3665_v40 }
 0x519   : > { %v3713_v10 = vpop.f32.mrf.mxu2  ;;  %v3762_v0 = vpop.f32.mrf.mxu3 }
 0x51a   : > { %v3714_v30 = vadd.f32 %v3713_v10, %v7189_v35  ;;  %v3763_v27 = vadd.f32 %v3762_v0, %v7192_v49  ;;  %v3617_v8 = vpop.f32.mrf.mxu0  ;;  %v3666_v41 = vpop.f32.mrf.mxu1 }
 0x51b   : > { %v3618_v55 = vadd.f32 %v3617_v8, %v7168_v34  ;;  %v3667_v6 = vadd.f32 %v3666_v41, %v7171_v18 }
 0x51c   : > { %4218 = vst [vmem:[%s6969_s26 + $0x490] sm:$0xff] %v3714_v30 }
 0x51d   : > { %4219 = vst [vmem:[%s6969_s26 + $0x498] sm:$0xff] %v3763_v27 }
 0x51e   : > { %4230 = vst [vmem:[%s6969_s26 + $0x4f0] sm:$0xff] %v3618_v55 }
 0x51f   : > { %4231 = vst [vmem:[%s6969_s26 + $0x4f8] sm:$0xff] %v3667_v6 }
 0x521   : > { %v3715_v51 = vpop.f32.mrf.mxu2  ;;  %v3764_v53 = vpop.f32.mrf.mxu3 }
 0x522   : > { %v3716_v38 = vadd.f32 %v3715_v51, %v7189_v35  ;;  %v3765_v42 = vadd.f32 %v3764_v53, %v7192_v49  ;;  %v3620_v48 = vpop.f32.mrf.mxu0  ;;  %v3669_v33 = vpop.f32.mrf.mxu1 }
 0x523   : > { %v3621_v56 = vadd.f32 %v3620_v48, %v7168_v34  ;;  %v3670_v31 = vadd.f32 %v3669_v33, %v7171_v18 }
 0x524   : > { %4232 = vst [vmem:[%s6969_s26 + $0x500] sm:$0xff] %v3716_v38 }
 0x525   : > { %4233 = vst [vmem:[%s6969_s26 + $0x508] sm:$0xff] %v3765_v42  ;;  %5134 = vmatmul.msk.bf16.gmra.mxu0 %vm2376_vm4, %v6933_v37  ;;  %5142 = vmatmul.msk.bf16.gmra.mxu1 %vm2376_vm4, %v6933_v37 }
 0x526   : > { %4244 = vst [vmem:[%s6969_s26 + $0x560] sm:$0xff] %v3621_v56  ;;  %5150 = vmatmul.msk.bf16.gmra.mxu2 %vm2376_vm4, %v6933_v37  ;;  %5158 = vmatmul.msk.bf16.gmra.mxu3 %vm2376_vm4, %v6933_v37 }
 0x527   : > { %4245 = vst [vmem:[%s6969_s26 + $0x568] sm:$0xff] %v3670_v31 }
 0x529   : > { %v3718_v63 = vpop.f32.mrf.mxu2  ;;  %v3767_v54 = vpop.f32.mrf.mxu3 }
 0x52a   : > { %v3719_v19 = vadd.f32 %v3718_v63, %v7189_v35  ;;  %v3768_v1 = vadd.f32 %v3767_v54, %v7192_v49  ;;  %v3622_v15 = vpop.f32.mrf.mxu0  ;;  %v3671_v29 = vpop.f32.mrf.mxu1 }
 0x52b   : > { %v3623_v24 = vadd.f32 %v3622_v15, %v7168_v34  ;;  %v3672_v46 = vadd.f32 %v3671_v29, %v7171_v18 }
 0x52c   : > { %4246 = vst [vmem:[%s6969_s26 + $0x570] sm:$0xff] %v3719_v19 }
 0x52d   : > { %4247 = vst [vmem:[%s6969_s26 + $0x578] sm:$0xff] %v3768_v1 }
 0x52e   : > { %4258 = vst [vmem:[%s6969_s26 + $0x5d0] sm:$0xff] %v3623_v24 }
 0x52f   : > { %4259 = vst [vmem:[%s6969_s26 + $0x5d8] sm:$0xff] %v3672_v46 }
 0x531   : > { %v3720_v57 = vpop.f32.mrf.mxu2  ;;  %v3769_v4 = vpop.f32.mrf.mxu3 }
 0x532   : > { %v3721_v23 = vadd.f32 %v3720_v57, %v7189_v35  ;;  %v3770_v58 = vadd.f32 %v3769_v4, %v7192_v49  ;;  %v3625_v59 = vpop.f32.mrf.mxu0  ;;  %v3674_v60 = vpop.f32.mrf.mxu1 }
 0x533   : > { %v3626_v52 = vadd.f32 %v3625_v59, %v7168_v34  ;;  %v3675_v22 = vadd.f32 %v3674_v60, %v7171_v18 }
 0x534   : > { %4260 = vst [vmem:[%s6969_s26 + $0x5e0] sm:$0xff] %v3721_v23 }
 0x535   : > { %4261 = vst [vmem:[%s6969_s26 + $0x5e8] sm:$0xff] %v3770_v58  ;;  %5135 = vmatmul.msk.bf16.gmra.mxu0 %vm2376_vm4, %v6948_v16  ;;  %5143 = vmatmul.msk.bf16.gmra.mxu1 %vm2376_vm4, %v6948_v16 }
 0x536   : > { %4272 = vst [vmem:[%s6969_s26 + $0x640] sm:$0xff] %v3626_v52  ;;  %5151 = vmatmul.msk.bf16.gmra.mxu2 %vm2376_vm4, %v6948_v16  ;;  %5159 = vmatmul.msk.bf16.gmra.mxu3 %vm2376_vm4, %v6948_v16 }
 0x537   : > { %4273 = vst [vmem:[%s6969_s26 + $0x648] sm:$0xff] %v3675_v22 }
 0x539   : > { %v3723_v45 = vpop.f32.mrf.mxu2  ;;  %v3772_v39 = vpop.f32.mrf.mxu3 }
 0x53a   : > { %v3724_v7 = vadd.f32 %v3723_v45, %v7189_v35  ;;  %v3773_v2 = vadd.f32 %v3772_v39, %v7192_v49  ;;  %v3627_v47 = vpop.f32.mrf.mxu0  ;;  %v3676_v50 = vpop.f32.mrf.mxu1 }
 0x53b   : > { %v3628_v44 = vadd.f32 %v3627_v47, %v7168_v34  ;;  %v3677_v5 = vadd.f32 %v3676_v50, %v7171_v18 }
 0x53c   : > { %4274 = vst [vmem:[%s6969_s26 + $0x650] sm:$0xff] %v3724_v7 }
 0x53d   : > { %4275 = vst [vmem:[%s6969_s26 + $0x658] sm:$0xff] %v3773_v2 }
 0x53e   : > { %4286 = vst [vmem:[%s6969_s26 + $0x6b0] sm:$0xff] %v3628_v44 }
 0x53f   : > { %4287 = vst [vmem:[%s6969_s26 + $0x6b8] sm:$0xff] %v3677_v5 }
 0x541   : > { %v3725_v12 = vpop.f32.mrf.mxu2  ;;  %v3774_v34 = vpop.f32.mrf.mxu3 }
 0x542   : > { %v3726_v18 = vadd.f32 %v3725_v12, %v7189_v35  ;;  %v3775_v32 = vadd.f32 %v3774_v34, %v7192_v49  ;;  %v3786_v14 = vpop.f32.mrf.mxu0  ;;  %v3835_v20 = vpop.f32.mrf.mxu1  ;;  %v7391_v35 = vperm.slane %v7368_v36, 2  ;;  %v7394_v49 = vperm.slane %v7368_v36, 3 }
 0x543   : > { %v3787_v43 = vadd.f32 %v3786_v14, %v7374_v26  ;;  %v3836_v13 = vadd.f32 %v3835_v20, %v7377_v61 }
 0x544   : > { %4288 = vst [vmem:[%s6969_s26 + $0x6c0] sm:$0xff] %v3726_v18 }
 0x545   : > { %4289 = vst [vmem:[%s6969_s26 + $0x6c8] sm:$0xff] %v3775_v32  ;;  %5160 = vmatmul.msk.bf16.vlgmr.msrb.gmra.mxu0 %vm2376_vm4, %v6760_v11  ;;  %5168 = vmatmul.msk.bf16.vlgmr.msrb.gmra.mxu1 %vm2376_vm4, %v6760_v11 }
 0x546   : > { %4079 = vst [vmem:[%s6969_s26 + $0x40] sm:$0xff] %v3787_v43 }
 0x547   : > { %4080 = vst [vmem:[%s6969_s26 + $0x48] sm:$0xff] %v3836_v13 }
 0x549   : > { %v3884_v21 = vpop.f32.mrf.mxu2  ;;  %v3933_v28 = vpop.f32.mrf.mxu3 }
 0x54a   : > { %v3885_v40 = vadd.f32 %v3884_v21, %v7391_v35  ;;  %v3934_v10 = vadd.f32 %v3933_v28, %v7394_v49  ;;  %v3788_v0 = vpop.f32.mrf.mxu0  ;;  %v3837_v30 = vpop.f32.mrf.mxu1 }
 0x54b   : > { %v3789_v11 = vadd.f32 %v3788_v0, %v7374_v26  ;;  %v3838_v27 = vadd.f32 %v3837_v30, %v7377_v61 }
 0x54c   : > { %4081 = vst [vmem:[%s6969_s26 + $0x50] sm:$0xff] %v3885_v40 }
 0x54d   : > { %4082 = vst [vmem:[%s6969_s26 + $0x58] sm:$0xff] %v3934_v10 }
 0x54e   : > { %4094 = vst [vmem:[%s6969_s26 + $0xb0] sm:$0xff] %v3789_v11 }
 0x54f   : > { %4095 = vst [vmem:[%s6969_s26 + $0xb8] sm:$0xff] %v3838_v27 }
 0x551   : > { %v3886_v8 = vpop.f32.mrf.mxu2  ;;  %v3935_v41 = vpop.f32.mrf.mxu3 }
 0x552   : > { %v3887_v55 = vadd.f32 %v3886_v8, %v7391_v35  ;;  %v3936_v6 = vadd.f32 %v3935_v41, %v7394_v49  ;;  %v3791_v51 = vpop.f32.mrf.mxu0  ;;  %v3840_v53 = vpop.f32.mrf.mxu1 }
 0x553   : > { %v3792_v38 = vadd.f32 %v3791_v51, %v7374_v26  ;;  %v3841_v42 = vadd.f32 %v3840_v53, %v7377_v61 }
 0x554   : > { %4096 = vst [vmem:[%s6969_s26 + $0xc0] sm:$0xff] %v3887_v55 }
 0x555   : > { %4097 = vst [vmem:[%s6969_s26 + $0xc8] sm:$0xff] %v3936_v6  ;;  %5161 = vmatmul.msk.bf16.gmra.mxu0 %vm2376_vm4, %v6791_v17  ;;  %5169 = vmatmul.msk.bf16.gmra.mxu1 %vm2376_vm4, %v6791_v17 }
 0x556   : > { %4108 = vst [vmem:[%s6969_s26 + $0x120] sm:$0xff] %v3792_v38 }
 0x557   : > { %4109 = vst [vmem:[%s6969_s26 + $0x128] sm:$0xff] %v3841_v42 }
 0x559   : > { %v3889_v48 = vpop.f32.mrf.mxu2  ;;  %v3938_v33 = vpop.f32.mrf.mxu3 }
 0x55a   : > { %v3890_v56 = vadd.f32 %v3889_v48, %v7391_v35  ;;  %v3939_v31 = vadd.f32 %v3938_v33, %v7394_v49  ;;  %v3793_v63 = vpop.f32.mrf.mxu0  ;;  %v3842_v54 = vpop.f32.mrf.mxu1 }
 0x55b   : > { %v3794_v19 = vadd.f32 %v3793_v63, %v7374_v26  ;;  %v3843_v1 = vadd.f32 %v3842_v54, %v7377_v61 }
 0x55c   : > { %4110 = vst [vmem:[%s6969_s26 + $0x130] sm:$0xff] %v3890_v56 }
 0x55d   : > { %4111 = vst [vmem:[%s6969_s26 + $0x138] sm:$0xff] %v3939_v31 }
 0x55e   : > { %4122 = vst [vmem:[%s6969_s26 + $0x190] sm:$0xff] %v3794_v19 }
 0x55f   : > { %4123 = vst [vmem:[%s6969_s26 + $0x198] sm:$0xff] %v3843_v1 }
 0x561   : > { %v3891_v17 = vpop.f32.mrf.mxu2  ;;  %v3940_v15 = vpop.f32.mrf.mxu3 }
 0x562   : > { %v3892_v29 = vadd.f32 %v3891_v17, %v7391_v35  ;;  %v3941_v24 = vadd.f32 %v3940_v15, %v7394_v49  ;;  %v3796_v46 = vpop.f32.mrf.mxu0  ;;  %v3845_v57 = vpop.f32.mrf.mxu1 }
 0x563   : > { %v3797_v4 = vadd.f32 %v3796_v46, %v7374_v26  ;;  %v3846_v23 = vadd.f32 %v3845_v57, %v7377_v61 }
 0x564   : > { %4124 = vst [vmem:[%s6969_s26 + $0x1a0] sm:$0xff] %v3892_v29 }
 0x565   : > { %4125 = vst [vmem:[%s6969_s26 + $0x1a8] sm:$0xff] %v3941_v24  ;;  %5162 = vmatmul.msk.bf16.gmra.mxu0 %vm2376_vm4, %v6816_v62  ;;  %5170 = vmatmul.msk.bf16.gmra.mxu1 %vm2376_vm4, %v6816_v62 }
 0x566   : > { %4136 = vst [vmem:[%s6969_s26 + $0x200] sm:$0xff] %v3797_v4 }
 0x567   : > { %4137 = vst [vmem:[%s6969_s26 + $0x208] sm:$0xff] %v3846_v23 }
 0x569   : > { %v3894_v58 = vpop.f32.mrf.mxu2  ;;  %v3943_v59 = vpop.f32.mrf.mxu3 }
 0x56a   : > { %v3895_v60 = vadd.f32 %v3894_v58, %v7391_v35  ;;  %v3944_v52 = vadd.f32 %v3943_v59, %v7394_v49  ;;  %v3798_v22 = vpop.f32.mrf.mxu0  ;;  %v3847_v45 = vpop.f32.mrf.mxu1 }
 0x56b   : > { %v3799_v39 = vadd.f32 %v3798_v22, %v7374_v26  ;;  %v3848_v7 = vadd.f32 %v3847_v45, %v7377_v61 }
 0x56c   : > { %4138 = vst [vmem:[%s6969_s26 + $0x210] sm:$0xff] %v3895_v60 }
 0x56d   : > { %4139 = vst [vmem:[%s6969_s26 + $0x218] sm:$0xff] %v3944_v52 }
 0x56e   : > { %4150 = vst [vmem:[%s6969_s26 + $0x270] sm:$0xff] %v3799_v39 }
 0x56f   : > { %4151 = vst [vmem:[%s6969_s26 + $0x278] sm:$0xff] %v3848_v7 }
 0x571   : > { %v3896_v62 = vpop.f32.mrf.mxu2  ;;  %v3945_v2 = vpop.f32.mrf.mxu3 }
 0x572   : > { %v3897_v47 = vadd.f32 %v3896_v62, %v7391_v35  ;;  %v3946_v50 = vadd.f32 %v3945_v2, %v7394_v49  ;;  %v3801_v44 = vpop.f32.mrf.mxu0  ;;  %v3850_v5 = vpop.f32.mrf.mxu1 }
 0x573   : > { %v3802_v12 = vadd.f32 %v3801_v44, %v7374_v26  ;;  %v3851_v34 = vadd.f32 %v3850_v5, %v7377_v61 }
 0x574   : > { %4152 = vst [vmem:[%s6969_s26 + $0x280] sm:$0xff] %v3897_v47 }
 0x575   : > { %4153 = vst [vmem:[%s6969_s26 + $0x288] sm:$0xff] %v3946_v50  ;;  %5163 = vmatmul.msk.bf16.gmra.mxu0 %vm2376_vm4, %v6841_v9  ;;  %5171 = vmatmul.msk.bf16.gmra.mxu1 %vm2376_vm4, %v6841_v9 }
 0x576   : > { %4164 = vst [vmem:[%s6969_s26 + $0x2e0] sm:$0xff] %v3802_v12 }
 0x577   : > { %4165 = vst [vmem:[%s6969_s26 + $0x2e8] sm:$0xff] %v3851_v34 }
 0x579   : > { %v3899_v18 = vpop.f32.mrf.mxu2  ;;  %v3948_v32 = vpop.f32.mrf.mxu3 }
 0x57a   : > { %v3900_v14 = vadd.f32 %v3899_v18, %v7391_v35  ;;  %v3949_v20 = vadd.f32 %v3948_v32, %v7394_v49  ;;  %v3803_v43 = vpop.f32.mrf.mxu0  ;;  %v3852_v13 = vpop.f32.mrf.mxu1 }
 0x57b   : > { %v3804_v21 = vadd.f32 %v3803_v43, %v7374_v26  ;;  %v3853_v28 = vadd.f32 %v3852_v13, %v7377_v61 }
 0x57c   : > { %4166 = vst [vmem:[%s6969_s26 + $0x2f0] sm:$0xff] %v3900_v14 }
 0x57d   : > { %4167 = vst [vmem:[%s6969_s26 + $0x2f8] sm:$0xff] %v3949_v20 }
 0x57e   : > { %4178 = vst [vmem:[%s6969_s26 + $0x350] sm:$0xff] %v3804_v21 }
 0x57f   : > { %4179 = vst [vmem:[%s6969_s26 + $0x358] sm:$0xff] %v3853_v28 }
 0x581   : > { %v3901_v9 = vpop.f32.mrf.mxu2  ;;  %v3950_v40 = vpop.f32.mrf.mxu3 }
 0x582   : > { %v3902_v10 = vadd.f32 %v3901_v9, %v7391_v35  ;;  %v3951_v0 = vadd.f32 %v3950_v40, %v7394_v49  ;;  %v3806_v30 = vpop.f32.mrf.mxu0  ;;  %v3855_v11 = vpop.f32.mrf.mxu1 }
 0x583   : > { %v3807_v27 = vadd.f32 %v3806_v30, %v7374_v26  ;;  %v3856_v8 = vadd.f32 %v3855_v11, %v7377_v61 }
 0x584   : > { %4180 = vst [vmem:[%s6969_s26 + $0x360] sm:$0xff] %v3902_v10 }
 0x585   : > { %4181 = vst [vmem:[%s6969_s26 + $0x368] sm:$0xff] %v3951_v0  ;;  %5164 = vmatmul.msk.bf16.gmra.mxu0 %vm2376_vm4, %v6869_v3  ;;  %5172 = vmatmul.msk.bf16.gmra.mxu1 %vm2376_vm4, %v6869_v3 }
 0x586   : > { %4192 = vst [vmem:[%s6969_s26 + $0x3c0] sm:$0xff] %v3807_v27  ;;  %v7549_v27 = vperm.slane %v7368_v36, 5 }
 0x587   : > { %4193 = vst [vmem:[%s6969_s26 + $0x3c8] sm:$0xff] %v3856_v8 }
 0x589   : > { %v3904_v41 = vpop.f32.mrf.mxu2  ;;  %v3953_v55 = vpop.f32.mrf.mxu3 }
 0x58a   : > { %v3905_v6 = vadd.f32 %v3904_v41, %v7391_v35  ;;  %v3954_v51 = vadd.f32 %v3953_v55, %v7394_v49  ;;  %v3808_v53 = vpop.f32.mrf.mxu0  ;;  %v3857_v38 = vpop.f32.mrf.mxu1 }
 0x58b   : > { %v3809_v42 = vadd.f32 %v3808_v53, %v7374_v26  ;;  %v3858_v48 = vadd.f32 %v3857_v38, %v7377_v61 }
 0x58c   : > { %4194 = vst [vmem:[%s6969_s26 + $0x3d0] sm:$0xff] %v3905_v6 }
 0x58d   : > { %4195 = vst [vmem:[%s6969_s26 + $0x3d8] sm:$0xff] %v3954_v51 }
 0x58e   : > { %4206 = vst [vmem:[%s6969_s26 + $0x430] sm:$0xff] %v3809_v42 }
 0x58f   : > { %4207 = vst [vmem:[%s6969_s26 + $0x438] sm:$0xff] %v3858_v48 }
 0x591   : > { %v3906_v3 = vpop.f32.mrf.mxu2  ;;  %v3955_v33 = vpop.f32.mrf.mxu3 }
 0x592   : > { %v3907_v56 = vadd.f32 %v3906_v3, %v7391_v35  ;;  %v3956_v31 = vadd.f32 %v3955_v33, %v7394_v49  ;;  %v3811_v63 = vpop.f32.mrf.mxu0  ;;  %v3860_v54 = vpop.f32.mrf.mxu1 }
 0x593   : > { %v3812_v19 = vadd.f32 %v3811_v63, %v7374_v26  ;;  %v3861_v1 = vadd.f32 %v3860_v54, %v7377_v61 }
 0x594   : > { %4208 = vst [vmem:[%s6969_s26 + $0x440] sm:$0xff] %v3907_v56 }
 0x595   : > { %4209 = vst [vmem:[%s6969_s26 + $0x448] sm:$0xff] %v3956_v31  ;;  %5165 = vmatmul.msk.bf16.gmra.mxu0 %vm2376_vm4, %v6901_v25  ;;  %5173 = vmatmul.msk.bf16.gmra.mxu1 %vm2376_vm4, %v6901_v25 }
 0x596   : > { %4220 = vst [vmem:[%s6969_s26 + $0x4a0] sm:$0xff] %v3812_v19 }
 0x597   : > { %4221 = vst [vmem:[%s6969_s26 + $0x4a8] sm:$0xff] %v3861_v1 }
 0x599   : > { %v3909_v17 = vpop.f32.mrf.mxu2  ;;  %v3958_v15 = vpop.f32.mrf.mxu3 }
 0x59a   : > { %v3910_v29 = vadd.f32 %v3909_v17, %v7391_v35  ;;  %v3959_v24 = vadd.f32 %v3958_v15, %v7394_v49  ;;  %v3813_v46 = vpop.f32.mrf.mxu0  ;;  %v3862_v57 = vpop.f32.mrf.mxu1 }
 0x59b   : > { %v3814_v4 = vadd.f32 %v3813_v46, %v7374_v26  ;;  %v3863_v23 = vadd.f32 %v3862_v57, %v7377_v61 }
 0x59c   : > { %4222 = vst [vmem:[%s6969_s26 + $0x4b0] sm:$0xff] %v3910_v29 }
 0x59d   : > { %4223 = vst [vmem:[%s6969_s26 + $0x4b8] sm:$0xff] %v3959_v24 }
 0x59e   : > { %4234 = vst [vmem:[%s6969_s26 + $0x510] sm:$0xff] %v3814_v4 }
 0x59f   : > { %4235 = vst [vmem:[%s6969_s26 + $0x518] sm:$0xff] %v3863_v23 }
 0x5a1   : > { %v3911_v25 = vpop.f32.mrf.mxu2  ;;  %v3960_v58 = vpop.f32.mrf.mxu3 }
 0x5a2   : > { %v3912_v59 = vadd.f32 %v3911_v25, %v7391_v35  ;;  %v3961_v60 = vadd.f32 %v3960_v58, %v7394_v49  ;;  %v3816_v52 = vpop.f32.mrf.mxu0  ;;  %v3865_v22 = vpop.f32.mrf.mxu1 }
 0x5a3   : > { %v3817_v45 = vadd.f32 %v3816_v52, %v7374_v26  ;;  %v3866_v39 = vadd.f32 %v3865_v22, %v7377_v61 }
 0x5a4   : > { %4236 = vst [vmem:[%s6969_s26 + $0x520] sm:$0xff] %v3912_v59 }
 0x5a5   : > { %4237 = vst [vmem:[%s6969_s26 + $0x528] sm:$0xff] %v3961_v60  ;;  %5166 = vmatmul.msk.bf16.gmra.mxu0 %vm2376_vm4, %v6933_v37  ;;  %5174 = vmatmul.msk.bf16.gmra.mxu1 %vm2376_vm4, %v6933_v37 }
 0x5a6   : > { %4248 = vst [vmem:[%s6969_s26 + $0x580] sm:$0xff] %v3817_v45 }
 0x5a7   : > { %4249 = vst [vmem:[%s6969_s26 + $0x588] sm:$0xff] %v3866_v39 }
 0x5a9   : > { %v3914_v7 = vpop.f32.mrf.mxu2  ;;  %v3963_v62 = vpop.f32.mrf.mxu3 }
 0x5aa   : > { %v3915_v2 = vadd.f32 %v3914_v7, %v7391_v35  ;;  %v3964_v47 = vadd.f32 %v3963_v62, %v7394_v49  ;;  %v3818_v50 = vpop.f32.mrf.mxu0  ;;  %v3867_v44 = vpop.f32.mrf.mxu1 }
 0x5ab   : > { %v3819_v5 = vadd.f32 %v3818_v50, %v7374_v26  ;;  %v3868_v12 = vadd.f32 %v3867_v44, %v7377_v61 }
 0x5ac   : > { %4250 = vst [vmem:[%s6969_s26 + $0x590] sm:$0xff] %v3915_v2 }
 0x5ad   : > { %4251 = vst [vmem:[%s6969_s26 + $0x598] sm:$0xff] %v3964_v47 }
 0x5ae   : > { %4262 = vst [vmem:[%s6969_s26 + $0x5f0] sm:$0xff] %v3819_v5 }
 0x5af   : > { %4263 = vst [vmem:[%s6969_s26 + $0x5f8] sm:$0xff] %v3868_v12 }
 0x5b1   : > { %v3916_v37 = vpop.f32.mrf.mxu2  ;;  %v3965_v34 = vpop.f32.mrf.mxu3 }
 0x5b2   : > { %v3917_v18 = vadd.f32 %v3916_v37, %v7391_v35  ;;  %v3966_v32 = vadd.f32 %v3965_v34, %v7394_v49  ;;  %v3821_v14 = vpop.f32.mrf.mxu0  ;;  %v3870_v20 = vpop.f32.mrf.mxu1 }
 0x5b3   : > { %v3822_v43 = vadd.f32 %v3821_v14, %v7374_v26  ;;  %v3871_v13 = vadd.f32 %v3870_v20, %v7377_v61 }
 0x5b4   : > { %4264 = vst [vmem:[%s6969_s26 + $0x600] sm:$0xff] %v3917_v18 }
 0x5b5   : > { %4265 = vst [vmem:[%s6969_s26 + $0x608] sm:$0xff] %v3966_v32  ;;  %5167 = vmatmul.msk.bf16.gmra.mxu0 %vm2376_vm4, %v6948_v16  ;;  %5175 = vmatmul.msk.bf16.gmra.mxu1 %vm2376_vm4, %v6948_v16  ;;  %v7546_v16 = vperm.slane %v7368_v36, 4  ;;  %vm4084_vm4 = vcmask 146432  }
 0x5b6   : > { %4276 = vst [vmem:[%s6969_s26 + $0x660] sm:$0xff] %v3822_v43 }
 0x5b7   : > { %4277 = vst [vmem:[%s6969_s26 + $0x668] sm:$0xff] %v3871_v13 }
 0x5b9   : > { %v3919_v21 = vpop.f32.mrf.mxu2  ;;  %v3968_v28 = vpop.f32.mrf.mxu3 }
 0x5ba   : > { %v3920_v9 = vadd.f32 %v3919_v21, %v7391_v35  ;;  %v3969_v40 = vadd.f32 %v3968_v28, %v7394_v49  ;;  %v3823_v10 = vpop.f32.mrf.mxu0  ;;  %v3872_v0 = vpop.f32.mrf.mxu1 }
 0x5bb   : > { %v3824_v30 = vadd.f32 %v3823_v10, %v7374_v26  ;;  %v3873_v11 = vadd.f32 %v3872_v0, %v7377_v61 }
 0x5bc   : > { %4278 = vst [vmem:[%s6969_s26 + $0x670] sm:$0xff] %v3920_v9 }
 0x5bd   : > { %4279 = vst [vmem:[%s6969_s26 + $0x678] sm:$0xff] %v3969_v40 }
 0x5be   : > { %4290 = vst [vmem:[%s6969_s26 + $0x6d0] sm:$0xff] %v3824_v30 }
 0x5bf   : > { %4291 = vst [vmem:[%s6969_s26 + $0x6d8] sm:$0xff] %v3873_v11 }
 0x5c1   : > { %v3921_v8 = vpop.f32.mrf.mxu2  ;;  %v3970_v41 = vpop.f32.mrf.mxu3 }
 0x5c2   : > { %v3922_v26 = vadd.f32 %v3921_v8, %v7391_v35  ;;  %v3971_v61 = vadd.f32 %v3970_v41, %v7394_v49  ;;  %v3982_v55 = vpop.f32.mrf.mxu0  ;;  %v4031_v6 = vpop.f32.mrf.mxu1 }
 0x5c3   : > { %v3983_v51 = vadd.f32 %v3982_v55, %v7546_v16  ;;  %v4032_v53 = vadd.f32 %v4031_v6, %v7549_v27 }
 0x5c4   : > { %4292 = vst [vmem:[%s6969_s26 + $0x6e0] sm:$0xff] %v3922_v26 }
 0x5c5   : > { %4293 = vst [vmem:[%s6969_s26 + $0x6e8] sm:$0xff] %v3971_v61 }
 0x5c6   : > { %4083 = vst [vmem:[%s6969_s26 + $0x60] sm:$0xff] %v3983_v51 }
 0x5c7   : > { %4085 = vst.msk [vmem:[%s6969_s26 + $0x68] sm:$0xff] %vm4084_vm4, %v4032_v53 }
 0x5ca   : > { %v3984_v36 = vpop.f32.mrf.mxu0  ;;  %v4033_v35 = vpop.f32.mrf.mxu1 }
 0x5cb   : > { %v3985_v49 = vadd.f32 %v3984_v36, %v7546_v16  ;;  %v4034_v38 = vadd.f32 %v4033_v35, %v7549_v27 }
 0x5cd   : > { %4098 = vst [vmem:[%s6969_s26 + $0xd0] sm:$0xff] %v3985_v49 }
 0x5ce   : > { %4099 = vst.msk [vmem:[%s6969_s26 + $0xd8] sm:$0xff] %vm4084_vm4, %v4034_v38 }
 0x5d2   : > { %v3987_v42 = vpop.f32.mrf.mxu0  ;;  %v4036_v48 = vpop.f32.mrf.mxu1 }
 0x5d3   : > { %v3988_v3 = vadd.f32 %v3987_v42, %v7546_v16  ;;  %v4037_v33 = vadd.f32 %v4036_v48, %v7549_v27 }
 0x5d5   : > { %4112 = vst [vmem:[%s6969_s26 + $0x140] sm:$0xff] %v3988_v3 }
 0x5d6   : > { %4113 = vst.msk [vmem:[%s6969_s26 + $0x148] sm:$0xff] %vm4084_vm4, %v4037_v33 }
 0x5da   : > { %v3989_v56 = vpop.f32.mrf.mxu0  ;;  %v4038_v31 = vpop.f32.mrf.mxu1 }
 0x5db   : > { %v3990_v63 = vadd.f32 %v3989_v56, %v7546_v16  ;;  %v4039_v54 = vadd.f32 %v4038_v31, %v7549_v27 }
 0x5dd   : > { %4126 = vst [vmem:[%s6969_s26 + $0x1b0] sm:$0xff] %v3990_v63 }
 0x5de   : > { %4127 = vst.msk [vmem:[%s6969_s26 + $0x1b8] sm:$0xff] %vm4084_vm4, %v4039_v54 }
 0x5e2   : > { %v3992_v19 = vpop.f32.mrf.mxu0  ;;  %v4041_v1 = vpop.f32.mrf.mxu1 }
 0x5e3   : > { %v3993_v17 = vadd.f32 %v3992_v19, %v7546_v16  ;;  %v4042_v15 = vadd.f32 %v4041_v1, %v7549_v27 }
 0x5e5   : > { %4140 = vst [vmem:[%s6969_s26 + $0x220] sm:$0xff] %v3993_v17 }
 0x5e6   : > { %4141 = vst.msk [vmem:[%s6969_s26 + $0x228] sm:$0xff] %vm4084_vm4, %v4042_v15 }
 0x5ea   : > { %v3994_v29 = vpop.f32.mrf.mxu0  ;;  %v4043_v24 = vpop.f32.mrf.mxu1 }
 0x5eb   : > { %v3995_v46 = vadd.f32 %v3994_v29, %v7546_v16  ;;  %v4044_v57 = vadd.f32 %v4043_v24, %v7549_v27 }
 0x5ed   : > { %4154 = vst [vmem:[%s6969_s26 + $0x290] sm:$0xff] %v3995_v46 }
 0x5ee   : > { %4155 = vst.msk [vmem:[%s6969_s26 + $0x298] sm:$0xff] %vm4084_vm4, %v4044_v57 }
 0x5f2   : > { %v3997_v4 = vpop.f32.mrf.mxu0  ;;  %v4046_v23 = vpop.f32.mrf.mxu1 }
 0x5f3   : > { %v3998_v25 = vadd.f32 %v3997_v4, %v7546_v16  ;;  %v4047_v58 = vadd.f32 %v4046_v23, %v7549_v27 }
 0x5f5   : > { %4168 = vst [vmem:[%s6969_s26 + $0x300] sm:$0xff] %v3998_v25 }
 0x5f6   : > { %4169 = vst.msk [vmem:[%s6969_s26 + $0x308] sm:$0xff] %vm4084_vm4, %v4047_v58 }
 0x5fa   : > { %v3999_v59 = vpop.f32.mrf.mxu0  ;;  %v4048_v60 = vpop.f32.mrf.mxu1 }
 0x5fb   : > { %v4000_v52 = vadd.f32 %v3999_v59, %v7546_v16  ;;  %v4049_v22 = vadd.f32 %v4048_v60, %v7549_v27 }
 0x5fd   : > { %4182 = vst [vmem:[%s6969_s26 + $0x370] sm:$0xff] %v4000_v52 }
 0x5fe   : > { %4183 = vst.msk [vmem:[%s6969_s26 + $0x378] sm:$0xff] %vm4084_vm4, %v4049_v22 }
 0x602   : > { %v4002_v45 = vpop.f32.mrf.mxu0  ;;  %v4051_v39 = vpop.f32.mrf.mxu1 }
 0x603   : > { %v4003_v7 = vadd.f32 %v4002_v45, %v7546_v16  ;;  %v4052_v62 = vadd.f32 %v4051_v39, %v7549_v27 }
 0x605   : > { %4196 = vst [vmem:[%s6969_s26 + $0x3e0] sm:$0xff] %v4003_v7 }
 0x606   : > { %4197 = vst.msk [vmem:[%s6969_s26 + $0x3e8] sm:$0xff] %vm4084_vm4, %v4052_v62 }
 0x60a   : > { %v4004_v2 = vpop.f32.mrf.mxu0  ;;  %v4053_v47 = vpop.f32.mrf.mxu1 }
 0x60b   : > { %v4005_v50 = vadd.f32 %v4004_v2, %v7546_v16  ;;  %v4054_v44 = vadd.f32 %v4053_v47, %v7549_v27 }
 0x60d   : > { %4210 = vst [vmem:[%s6969_s26 + $0x450] sm:$0xff] %v4005_v50 }
 0x60e   : > { %4211 = vst.msk [vmem:[%s6969_s26 + $0x458] sm:$0xff] %vm4084_vm4, %v4054_v44 }
 0x612   : > { %v4007_v5 = vpop.f32.mrf.mxu0  ;;  %v4056_v12 = vpop.f32.mrf.mxu1 }
 0x613   : > { %v4008_v37 = vadd.f32 %v4007_v5, %v7546_v16  ;;  %v4057_v34 = vadd.f32 %v4056_v12, %v7549_v27 }
 0x615   : > { %4224 = vst [vmem:[%s6969_s26 + $0x4c0] sm:$0xff] %v4008_v37 }
 0x616   : > { %4225 = vst.msk [vmem:[%s6969_s26 + $0x4c8] sm:$0xff] %vm4084_vm4, %v4057_v34 }
 0x61a   : > { %v4009_v18 = vpop.f32.mrf.mxu0  ;;  %v4058_v32 = vpop.f32.mrf.mxu1 }
 0x61b   : > { %v4010_v14 = vadd.f32 %v4009_v18, %v7546_v16  ;;  %v4059_v20 = vadd.f32 %v4058_v32, %v7549_v27 }
 0x61d   : > { %4238 = vst [vmem:[%s6969_s26 + $0x530] sm:$0xff] %v4010_v14 }
 0x61e   : > { %4239 = vst.msk [vmem:[%s6969_s26 + $0x538] sm:$0xff] %vm4084_vm4, %v4059_v20 }
 0x622   : > { %v4012_v43 = vpop.f32.mrf.mxu0  ;;  %v4061_v13 = vpop.f32.mrf.mxu1 }
 0x623   : > { %v4013_v21 = vadd.f32 %v4012_v43, %v7546_v16  ;;  %v4062_v28 = vadd.f32 %v4061_v13, %v7549_v27 }
 0x625   : > { %4252 = vst [vmem:[%s6969_s26 + $0x5a0] sm:$0xff] %v4013_v21 }
 0x626   : > { %4253 = vst.msk [vmem:[%s6969_s26 + $0x5a8] sm:$0xff] %vm4084_vm4, %v4062_v28 }
 0x62a   : > { %v4014_v9 = vpop.f32.mrf.mxu0  ;;  %v4063_v40 = vpop.f32.mrf.mxu1 }
 0x62b   : > { %v4015_v10 = vadd.f32 %v4014_v9, %v7546_v16  ;;  %v4064_v0 = vadd.f32 %v4063_v40, %v7549_v27 }
 0x62d   : > { %4266 = vst [vmem:[%s6969_s26 + $0x610] sm:$0xff] %v4015_v10 }
 0x62e   : > { %4267 = vst.msk [vmem:[%s6969_s26 + $0x618] sm:$0xff] %vm4084_vm4, %v4064_v0 }
 0x632   : > { %v4017_v30 = vpop.f32.mrf.mxu0  ;;  %v4066_v11 = vpop.f32.mrf.mxu1 }
 0x633   : > { %v4018_v8 = vadd.f32 %v4017_v30, %v7546_v16  ;;  %v4067_v41 = vadd.f32 %v4066_v11, %v7549_v27 }
 0x635   : > { %4280 = vst [vmem:[%s6969_s26 + $0x680] sm:$0xff] %v4018_v8 }
 0x636   : > { %4281 = vst.msk [vmem:[%s6969_s26 + $0x688] sm:$0xff] %vm4084_vm4, %v4067_v41 }
 0x63a   : > { %v4019_v26 = vpop.f32.mrf.mxu0  ;;  %v4068_v61 = vpop.f32.mrf.mxu1  ;;  %4303 = sbr.rel (!%p5916_p11) target bundleno = 1635 (0x663), region = 60 }
 0x63b   : > { %v4020_v55 = vadd.f32 %v4019_v26, %v7546_v16  ;;  %v4069_v6 = vadd.f32 %v4068_v61, %v7549_v27 }
 0x63d   : > { %4294 = vst [vmem:[%s6969_s26 + $0x6f0] sm:$0xff] %v4020_v55 }
 0x63e   : > { %4295 = vst.msk [vmem:[%s6969_s26 + $0x6f8] sm:$0xff] %vm4084_vm4, %v4069_v6 }
 0x63f   : > { %s7788_s7 = smov (!%p4306_p6, %s4305_s7), 16 }
 0x640   : > { %s5178_s9 = smul.u32 112, %s7788_s7 }
 0x642   : > { %s4310_s28 = ssub.s32 1792, %s5178_s9 }
 0x643   : > { %s4311_s14 = sshll.u32 %s4310_s28, 4 }
 0x644   : > { %4312 = vsyncadd %s4297_s8, %s4311_s14  ;;  %p7641_p10 = scmp.ne.s32.totalorder %s5178_s9, 0  ;;  %s5333_s10 = smul.u32 1792, %s5885_s22 }
 0x645   : > { %s4318_s30 = sshll.u32 %s6969_s26, 4  ;;  %s7647_s23 = smul.u32 1792, %s7788_s7  ;;  %s7652_s30 = int_to_ptr.vmem [resolvable:$true] %s4318_s30 }
 0x646   : > { %s4316_s12 = scalar_lea.hbm %s7699_s5, %s5333_s10  ;;  %s5735_s16 = sshra.s32 %s7652_s30, 4  ;;  %s5736_s16 = int_to_ptr.vmem [resolvable:$true] %s5735_s16 }
 0x647   : > { %s4320_s11 = sshll.u32 %s4316_s12, 4  ;;  %s5737_s1 = sshrl.u32 %s7647_s23, 4  ;;  %s7654_s11 = int_to_ptr.hbm [resolvable:$true] %s4320_s11 }
 0x648   : > { %s5773_s22 = sshll.u32 %s5737_s1, 4  ;;  %s5740_s13 = sadd.s32 1, %s5737_s1 }
 0x649   : > { %p5739_p11 = scmp.ne.s32.totalorder %s5773_s22, %s7647_s23  ;;  %s5831_s29 = smov [#allocation11]  }
 0x64a   : > { %s5746_s7 = scalar_lea.vmem %s5831_s29, 3584 }
 0x64b   : > { %s7790_s13 = smov (!%p5739_p11, %s5740_s13), %s5737_s1 }
 0x64c   : > { %s5742_s26 = scalar_lea.vmem %s5736_s16, %s7790_s13 }
 0x64d   : > { %p5743_p1 = scmp.ne.s32.totalorder %s5736_s16, %s5742_s26  ;;  %p5748_p3 = scmp.lt.s32.totalorder %s5746_s7, %s5742_s26 }
 0x64f   : > { %p5744_p0 = pnand %p5743_p1, %p7641_p10 }
 0x651   : > { %p5745_p2 = pneg %p5744_p0 }
 0x653   : > { %p5750_p5 = pnand %p5748_p3, %p5745_p2 }
 0x655   : > { %5753 = shalt.err (!%p5750_p5)
}
 0x656   : > { %s5754_s9 = sshra.s32 %s7654_s11, 4  ;;  %s5765_s17 = scalar_lea.hbm %s7699_s5, 5600  ;;  %s5755_s9 = int_to_ptr.hbm [resolvable:$true] %s5754_s9 }
 0x657   : > { %s5761_s28 = scalar_lea.hbm %s5755_s9, %s7790_s13  ;;  %p5766_p12 = scmp.lt.s32.totalorder %s5755_s9, %s7699_s5 }
 0x658   : > { %p5762_p8 = scmp.ne.s32.totalorder %s5755_s9, %s5761_s28  ;;  %p5767_p13 = scmp.lt.s32.totalorder %s5765_s17, %s5761_s28 }
 0x65a   : > { %p5763_p9 = pnand %p5762_p8, %p7641_p10  ;;  %p5768_p7 = por %p5767_p13, %p5766_p12 }
 0x65c   : > { %p5764_p4 = pneg %p5763_p9 }
 0x65e   : > { %p5769_p6 = pnand %p5768_p7, %p5764_p4 }
 0x660   : > { %5772 = shalt.err (!%p5769_p6)
}
 0x661   : > { %s5832_s16 = smov 1792   ;;  %s5833_s1 = smov 112  }
 0x662   : > { %4326 = dma.vmem_to_hbm [thread:$0]  (%p7641_p10), %s7652_s30, %s7647_s23, %s7654_s11, %s4297_s8, %s5832_s16, %s5832_s16, %s5833_s1  }
 0x663 PF: > { %p5368_p11 = scmp.ge.s32.totalorder %s5820_s21, 2  ;;  %s4335_s22 = sand.u32 1, %s5808_s18  }
 0x664   : > { %p7778_p1 = scmp.ne.s32.totalorder %s7708_s6, 0  ;;  %s4336_s13 = scalar_lea.sflag [#allocation5], %s4335_s22 }
 0x666   : > { %p5359_p0 = pnand %p5368_p11, %p7778_p1 }
 0x668   : > { %p5360_p2 = pneg %p5359_p0 }
 0x66a   : > { %5803 = dma.done.wait (%p5360_p2), %s4336_s13, 28672  }
 0x66b   : > { %5805 = vsyncadd (%p5360_p2), %s4336_s13, 4294938624  ;;  %p20_p3 = scmp.ge.s32.totalorder %s5889_s24, 6   ;;  %s7779_s18 = smov %s5812_s19 }
 0x66c   : > { %s7780_s19 = smov %s5816_s20  ;;  %s7781_s20 = smov %s5901_s27 }
 0x66d   : > { %s7782_s21 = smov %s5889_s24  ;;  %22 = sbr.rel (!%p20_p3) target bundleno = 10 (0xa), region = 97 }
 0x672   :  { %4342 = vsyncpa [#allocation4], 1 }
 0x673   :  { %4344 = vsyncpa [#allocation4 + $0x1], 1 }
 0x674   :  { %4345 = vsyncpa [#allocation7], 1 }
 0x675   :  { %4346 = vsyncpa [#allocation10], 1 }
 0x676   :  { %4347 = vsyncpa [#allocation5], 1 }
 0x677   :  { %4349 = vsyncpa [#allocation5 + $0x1], 1 }

</bundles_post_ra>
